<compile_context>
chip_gen: v7x
topology: tpu7x:2x2x1
jax: 0.10.0
libtpu: 0.0.40
codegen_flags: <defaults>
</compile_context>

<pallas_src>
import math
import functools

import jax
import jax.numpy as jnp
from jax import lax
from jax.experimental import pallas as pl
from jax.experimental.pallas import tpu as pltpu

# ----------------------------- small synthetic config -----------------------
SAMPLE_RATE = 16000
N_FFT = 64
HOP = 32
N_MELS = 8
N_FRAMES = 16                             # mel frames per clip
D_MODEL = 32
N_HEADS = 4
N_LAYERS = 2
D_FF = 64
OUT_DIM = 16                              # proj out_dim (module default 64, shrunk for test)
WAVE_LEN = (N_FRAMES - 1) * HOP + N_FFT   # 544 raw samples
SEQ_LEN = N_FRAMES // 2                   # sequence length after stride-2 conv2

_GELU_C = math.sqrt(2.0 / math.pi)
_MXU_DTYPE = jnp.bfloat16                 # bf16 MXU operands, fp32 accumulation

# ---- packed small-parameter slab layout: (N_SMALL_ROWS, 128) fp32, one operand ----
ROW_C1B = 0
ROW_C2B = 1
ROW_POS = 2                                # rows [ROW_POS, ROW_POS + SEQ_LEN)
ROW_LAYER0 = ROW_POS + SEQ_LEN
PER_LAYER = 9                              # ln1_w ln1_b bq bv bo ln2_w ln2_b b1 b2
ROW_LNF_W = ROW_LAYER0 + N_LAYERS * PER_LAYER
ROW_LNF_B = ROW_LNF_W + 1
ROW_PROJ_B = ROW_LNF_W + 2
N_SMALL_ROWS = ((ROW_PROJ_B + 1 + 7) // 8) * 8
SMALL_LANES = 128


# ----------------------------- in-kernel helpers -----------------------------
def _gelu(x):
    # TODO(synk): torch F.gelu defaults to the exact erf form; tanh approximation used
    # because erf is not guaranteed to lower in Mosaic.
    return 0.5 * x * (1.0 + jnp.tanh(_GELU_C * (x + 0.044715 * x * x * x)))


def _layernorm(x, w, b, eps=1e-5):
    mu = jnp.mean(x, axis=-1, keepdims=True)
    xc = x - mu
    var = jnp.mean(xc * xc, axis=-1, keepdims=True)
    return xc * lax.rsqrt(var + eps) * w + b


def _mm(a, b):
    """MXU matmul: bf16 operands (weights pre-cast at init), fp32 accumulation."""
    return jnp.dot(a.astype(_MXU_DTYPE), b, preferred_element_type=jnp.float32)


# ----------------------------- fused Pallas kernel ----------------------------
def _fused_encoder_kernel(feat_ref, c1w_ref, c2w_ref, wqkv_ref, wo_ref,
                          w1_ref, w2_ref, proj_w_ref, small_ref,
                          o_ref, pad1_ref, pad2_ref, *, n_layers, n_heads, bb):
    """Entire WhisperEncoder forward for a block of `bb` batch elements (on-chip)."""
    d = D_MODEL
    hd = d // n_heads
    t_in, t_out = N_FRAMES, SEQ_LEN

    def srow(r, n):  # (1, n) fp32 row slice of the packed small-parameter slab
        return small_ref[pl.ds(r, 1), pl.ds(0, n)]

    # ---- conv1 (k=3, s=1, p=1) + GELU: shifted views of a zero-padded scratch ----
    pad1_ref[...] = jnp.zeros_like(pad1_ref)
    pad1_ref[:, pl.ds(1, t_in), :] = feat_ref[...]
    acc = srow(ROW_C1B, d)
    for k in range(3):
        xk = pad1_ref[:, pl.ds(k, t_in), :].reshape(bb * t_in, N_MELS)
        acc = acc + _mm(xk, c1w_ref[k])
    y1 = _gelu(acc)                                          # (bb*t_in, d)

    # ---- conv2 (k=3, s=2, p=1) + GELU: strided shifted views (stride-2 sublane reads) ----
    pad2_ref[...] = jnp.zeros_like(pad2_ref)
    pad2_ref[:, pl.ds(1, t_in), :] = y1.reshape(bb, t_in, d)
    acc = srow(ROW_C2B, d)
    for k in range(3):
        yk = pad2_ref[:, pl.ds(k, t_out, stride=2), :].reshape(bb * t_out, d)
        acc = acc + _mm(yk, c2w_ref[k])
    pos = small_ref[pl.ds(ROW_POS, t_out), pl.ds(0, d)]      # (t_out, d)
    h = (_gelu(acc).reshape(bb, t_out, d) + pos[None, :, :]).reshape(bb * t_out, d)

    # ---- pre-norm transformer layers (static unroll, stacked bf16 weights) ----
    for l in range(n_layers):
        base = ROW_LAYER0 + l * PER_LAYER
        ln1_w, ln1_b = srow(base + 0, d), srow(base + 1, d)
        bq, bv, bo = srow(base + 2, d), srow(base + 3, d), srow(base + 4, d)
        ln2_w, ln2_b = srow(base + 5, d), srow(base + 6, d)
        b1, b2 = srow(base + 7, D_FF), srow(base + 8, d)

        hn = _layernorm(h, ln1_w, ln1_b).astype(_MXU_DTYPE)
        q = _mm(hn, wqkv_ref[l, 0]) + bq                     # 1/sqrt(hd) folded into wq/bq
        kk = _mm(hn, wqkv_ref[l, 1])                         # whisper k_proj has no bias
        v = _mm(hn, wqkv_ref[l, 2]) + bv

        wo_l = wo_ref[l]                                     # (d, d) bf16
        attn = bo
        for hh in range(n_heads):
            cs = slice(hh * hd, (hh + 1) * hd)
            q_h = q[:, cs].reshape(bb, t_out, hd).astype(_MXU_DTYPE)
            k_h = kk[:, cs].reshape(bb, t_out, hd).astype(_MXU_DTYPE)
            v_h = v[:, cs].reshape(bb, t_out, hd).astype(_MXU_DTYPE)
            s = jnp.einsum('bqd,bkd->bqk', q_h, k_h,
                           preferred_element_type=jnp.float32)          # (bb, t, t)
            s = s - jnp.max(s, axis=-1, keepdims=True)
            p = jnp.exp(s)
            p = p * pl.reciprocal(jnp.sum(p, axis=-1, keepdims=True), approx=True)
            ctx = jnp.einsum('bqk,bkd->bqd', p.astype(_MXU_DTYPE), v_h,
                             preferred_element_type=jnp.float32)        # (bb, t, hd)
            # fold each head's context straight through its rows of W_o (no ctx scratch)
            attn = attn + _mm(ctx.reshape(bb * t_out, hd), wo_l[cs, :])
        h = h + attn

        hn2 = _layernorm(h, ln2_w, ln2_b).astype(_MXU_DTYPE)
        ff = _gelu(_mm(hn2, w1_ref[l]) + b1)
        h = h + _mm(ff, w2_ref[l]) + b2

    # ---- final LayerNorm -> per-element mean over time -> projection (one dense store) ----
    hf = _layernorm(h, srow(ROW_LNF_W, d), srow(ROW_LNF_B, d))
    pooled = jnp.concatenate(
        [jnp.mean(hf[b * t_out:(b + 1) * t_out, :], axis=0, keepdims=True)
         for b in range(bb)], axis=0)                        # (bb, d)
    o_ref[...] = _mm(pooled, proj_w_ref[...]) + srow(ROW_PROJ_B, OUT_DIM)


# ----------------------------- kernel wrapper ---------------------------------
def _const_spec(a):
    nd = a.ndim
    return pl.BlockSpec(a.shape, lambda i, _nd=nd: (0,) * _nd)


def pallas_whisper_encoder(feats, params):
    b = feats.shape[0]
    bb = min(b, 8)                            # batch elements per grid step (amortize ~0.35us/step)
    b_pad = ((b + bb - 1) // bb) * bb
    if b_pad != b:
        feats = jnp.pad(feats, ((0, b_pad - b), (0, 0), (0, 0)))

    consts = [params["conv1_w"], params["conv2_w"], params["wqkv"], params["wo"],
              params["w1"], params["w2"], params["proj_w"], params["small"]]
    in_specs = [pl.BlockSpec((bb, N_FRAMES, N_MELS), lambda i: (i, 0, 0))]
    in_specs += [_const_spec(a) for a in consts]

    # TODO(synk): at real whisper-small scale, stream per-layer weights (layer grid axis
    # or manual double-buffered DMA from pl.ANY HBM refs) and single-buffer constants
    # instead of keeping full stacked weights resident -- v7x's 64 MiB VMEM breaks first.
    out = pl.pallas_call(
        functools.partial(_fused_encoder_kernel, n_layers=N_LAYERS, n_heads=N_HEADS, bb=bb),
        out_shape=jax.ShapeDtypeStruct((b_pad, OUT_DIM), jnp.float32),
        grid=(b_pad // bb,),
        in_specs=in_specs,
        out_specs=pl.BlockSpec((bb, OUT_DIM), lambda i: (i, 0)),
        scratch_shapes=[pltpu.VMEM((bb, N_FRAMES + 2, N_MELS), jnp.float32),
                        pltpu.VMEM((bb, N_FRAMES + 2, D_MODEL), jnp.float32)],
        compiler_params=pltpu.CompilerParams(dimension_semantics=("parallel",)),
    )(feats, *consts)
    return out[:b]


# ----------------------------- plain-JAX glue ---------------------------------
def _mel_filterbank(n_mels, n_fft, sr):
    n_freqs = n_fft // 2 + 1
    freqs = jnp.linspace(0.0, sr / 2.0, n_freqs)
    hz_to_mel = lambda hz: 2595.0 * jnp.log10(1.0 + hz / 700.0)
    mel_to_hz = lambda m: 700.0 * (10.0 ** (m / 2595.0) - 1.0)
    mel_pts = jnp.linspace(hz_to_mel(jnp.array(0.0)), hz_to_mel(jnp.array(sr / 2.0)), n_mels + 2)
    hz_pts = mel_to_hz(mel_pts)
    lo, ce, hi = hz_pts[:-2, None], hz_pts[1:-1, None], hz_pts[2:, None]
    up = (freqs[None, :] - lo) / (ce - lo)
    down = (hi - freqs[None, :]) / (hi - ce)
    return jnp.clip(jnp.minimum(up, down), 0.0, None)        # (n_mels, n_freqs)


def log_mel_spectrogram(wave, mel_fb):
    # TODO(synk): simplified stand-in for WhisperProcessor.feature_extractor
    # (no 30 s padding, tiny FFT); same log-mel -> clamp -> normalize pipeline.
    t = jnp.arange(N_FRAMES)[:, None] * HOP + jnp.arange(N_FFT)[None, :]
    window = 0.5 - 0.5 * jnp.cos(2.0 * jnp.pi * jnp.arange(N_FFT) / N_FFT)
    frames = wave[t] * window[None, :]                        # (T, n_fft)
    kf = jnp.arange(N_FFT // 2 + 1)[:, None].astype(jnp.float32)
    nn = jnp.arange(N_FFT)[None, :].astype(jnp.float32)
    ang = 2.0 * jnp.pi * kf * nn / N_FFT
    re = frames @ jnp.cos(ang).T
    im = frames @ (-jnp.sin(ang)).T
    power = re * re + im * im                                 # (T, n_freqs)
    mel = power @ mel_fb.T                                    # (T, n_mels)
    log_spec = jnp.log10(jnp.maximum(mel, 1e-10))
    log_spec = jnp.maximum(log_spec, log_spec.max() - 8.0)
    log_spec = (log_spec + 4.0) / 4.0
    return log_spec.T                                         # (n_mels, T) — Whisper feature layout


def sinusoids(length, channels):
    log_timescale = math.log(10000.0) / (channels // 2 - 1)
    inv = jnp.exp(-log_timescale * jnp.arange(channels // 2, dtype=jnp.float32))
    scaled = jnp.arange(length, dtype=jnp.float32)[:, None] * inv[None, :]
    return jnp.concatenate([jnp.sin(scaled), jnp.cos(scaled)], axis=1)


def init_params(key):
    keys = iter(jax.random.split(key, 32))
    rnd = lambda shape: jax.random.normal(next(keys), shape, jnp.float32) * 0.02
    L, D, F, H = N_LAYERS, D_MODEL, D_FF, N_HEADS
    hd = D // H
    scale = float(hd) ** -0.5

    # torch Conv1d weight is (out, in, k); stored tap-major (k, in, out) for in-kernel matmuls
    conv1_w = jnp.transpose(rnd((D, N_MELS, 3)), (2, 1, 0))
    conv2_w = jnp.transpose(rnd((D, D, 3)), (2, 1, 0))
    conv1_b, conv2_b = rnd((D,)), rnd((D,))
    pos = sinusoids(SEQ_LEN, D)

    wq = rnd((L, D, D)) * scale                # fold 1/sqrt(head_dim) into q weights/bias
    wk = rnd((L, D, D))
    wv = rnd((L, D, D))
    wqkv = jnp.stack([wq, wk, wv], axis=1)     # (L, 3, D, D)
    bq = rnd((L, D)) * scale
    bv = rnd((L, D))                           # whisper k_proj has no bias
    wo, bo = rnd((L, D, D)), rnd((L, D))
    w1, b1 = rnd((L, D, F)), rnd((L, F))
    w2, b2 = rnd((L, F, D)), rnd((L, D))
    ln1_w, ln1_b = jnp.ones((L, D), jnp.float32), jnp.zeros((L, D), jnp.float32)
    ln2_w, ln2_b = jnp.ones((L, D), jnp.float32), jnp.zeros((L, D), jnp.float32)
    lnf_w, lnf_b = jnp.ones((D,), jnp.float32), jnp.zeros((D,), jnp.float32)
    proj_w, proj_b = rnd((D, OUT_DIM)), rnd((OUT_DIM,))

    # pack all small fp32 params (biases / LN / pos-emb / proj-bias) into ONE lane-dense slab
    small = jnp.zeros((N_SMALL_ROWS, SMALL_LANES), jnp.float32)
    small = small.at[ROW_C1B, :D].set(conv1_b)
    small = small.at[ROW_C2B, :D].set(conv2_b)
    small = small.at[ROW_POS:ROW_POS + SEQ_LEN, :D].set(pos)
    for l in range(L):
        base = ROW_LAYER0 + l * PER_LAYER
        small = small.at[base + 0, :D].set(ln1_w[l])
        small = small.at[base + 1, :D].set(ln1_b[l])
        small = small.at[base + 2, :D].set(bq[l])
        small = small.at[base + 3, :D].set(bv[l])
        small = small.at[base + 4, :D].set(bo[l])
        small = small.at[base + 5, :D].set(ln2_w[l])
        small = small.at[base + 6, :D].set(ln2_b[l])
        small = small.at[base + 7, :F].set(b1[l])
        small = small.at[base + 8, :D].set(b2[l])
    small = small.at[ROW_LNF_W, :D].set(lnf_w)
    small = small.at[ROW_LNF_B, :D].set(lnf_b)
    small = small.at[ROW_PROJ_B, :OUT_DIM].set(proj_b)

    bf = lambda a: a.astype(_MXU_DTYPE)        # pre-cast MXU weights once (no per-call converts)
    return {"conv1_w": bf(conv1_w), "conv2_w": bf(conv2_w), "wqkv": bf(wqkv),
            "wo": bf(wo), "w1": bf(w1), "w2": bf(w2), "proj_w": bf(proj_w),
            "small": small}


def whisper_encoder_forward(x, params, mel_fb):
    b = x.shape[0]
    waves = x.reshape(b, -1)                                  # x[i].squeeze()
    feats = jax.vmap(lambda wv: log_mel_spectrogram(wv, mel_fb))(waves)   # (B, n_mels, T)
    feats = jnp.transpose(feats, (0, 2, 1))                   # (B, T, n_mels), time-major
    return pallas_whisper_encoder(feats, params)


if __name__ == "__main__":
    key = jax.random.PRNGKey(0)
    k_x, k_p = jax.random.split(key)
    # raw waveform batch: (batch, 1, samples), mimicking the torch module's input
    x = jax.random.normal(k_x, (2, 1, WAVE_LEN), jnp.float32)
    params = init_params(k_p)
    mel_fb = _mel_filterbank(N_MELS, N_FFT, SAMPLE_RATE)

    out = jax.jit(whisper_encoder_forward)(x, params, mel_fb)
    out = jax.block_until_ready(out)
    assert out.shape == (2, OUT_DIM) and out.dtype == jnp.float32
    print("KERNEL_OK")
</pallas_src>

<mosaic_0001>
module attributes {stable_mosaic.version = 11 : i64} {
  func.func @_fused_encoder_kernel(%arg0: i32, %arg1: memref<2x16x8xf32, #tpu.memory_space<vmem>>, %arg2: memref<3x8x32xbf16, #tpu.memory_space<vmem>>, %arg3: memref<3x32x32xbf16, #tpu.memory_space<vmem>>, %arg4: memref<2x3x32x32xbf16, #tpu.memory_space<vmem>>, %arg5: memref<2x32x32xbf16, #tpu.memory_space<vmem>>, %arg6: memref<2x32x64xbf16, #tpu.memory_space<vmem>>, %arg7: memref<2x64x32xbf16, #tpu.memory_space<vmem>>, %arg8: memref<32x16xbf16, #tpu.memory_space<vmem>>, %arg9: memref<32x128xf32, #tpu.memory_space<vmem>>, %arg10: memref<2x16xf32, #tpu.memory_space<vmem>>, %arg11: memref<2x18x8xf32, #tpu.memory_space<vmem>>, %arg12: memref<2x18x32xf32, #tpu.memory_space<vmem>>) attributes {dimension_semantics = [#tpu.dimension_semantics<parallel>], iteration_bounds = array<i64: 1>, scalar_prefetch = 0 : i64, scratch_operands = 2 : i64, tpu.core_type = #tpu.core_type<tc>, window_params = [{transform_indices = @transform_0, window_bounds = array<i64: 2, 16, 8>}, {pipeline_mode = #tpu.pipeline_mode<synchronous>, transform_indices = @transform_1, window_bounds = array<i64: 3, 8, 32>}, {pipeline_mode = #tpu.pipeline_mode<synchronous>, transform_indices = @transform_2, window_bounds = array<i64: 3, 32, 32>}, {pipeline_mode = #tpu.pipeline_mode<synchronous>, transform_indices = @transform_3, window_bounds = array<i64: 2, 3, 32, 32>}, {pipeline_mode = #tpu.pipeline_mode<synchronous>, transform_indices = @transform_4, window_bounds = array<i64: 2, 32, 32>}, {pipeline_mode = #tpu.pipeline_mode<synchronous>, transform_indices = @transform_5, window_bounds = array<i64: 2, 32, 64>}, {pipeline_mode = #tpu.pipeline_mode<synchronous>, transform_indices = @transform_6, window_bounds = array<i64: 2, 64, 32>}, {pipeline_mode = #tpu.pipeline_mode<synchronous>, transform_indices = @transform_7, window_bounds = array<i64: 32, 16>}, {pipeline_mode = #tpu.pipeline_mode<synchronous>, transform_indices = @transform_8, window_bounds = array<i64: 32, 128>}, {transform_indices = @transform_9, window_bounds = array<i64: 2, 16>}]} {
    %cst = arith.constant 0.000000e+00 : f32
    %0 = vector.broadcast %cst : f32 to vector<2x18x8xf32>
    %c0 = arith.constant 0 : index
    %c0_0 = arith.constant 0 : index
    %c0_1 = arith.constant 0 : index
    %1 = vector.load %arg11[%c0, %c0_0, %c0_1] : memref<2x18x8xf32, #tpu.memory_space<vmem>>, vector<2x18x8xf32>
    tpu.vector_store %arg11[%c0, %c0_0, %c0_1], %0 {strides = array<i32>} : memref<2x18x8xf32, #tpu.memory_space<vmem>>, vector<2x18x8xf32>,
    %c0_2 = arith.constant 0 : index
    %c0_3 = arith.constant 0 : index
    %c0_4 = arith.constant 0 : index
    %2 = vector.load %arg1[%c0_2, %c0_3, %c0_4] : memref<2x16x8xf32, #tpu.memory_space<vmem>>, vector<2x16x8xf32>
    %c0_5 = arith.constant 0 : index
    %c1 = arith.constant 1 : index
    %c0_6 = arith.constant 0 : index
    %3 = vector.load %arg11[%c0_5, %c1, %c0_6] : memref<2x18x8xf32, #tpu.memory_space<vmem>>, vector<2x16x8xf32>
    tpu.vector_store %arg11[%c0_5, %c1, %c0_6], %2 {strides = array<i32>} : memref<2x18x8xf32, #tpu.memory_space<vmem>>, vector<2x16x8xf32>,
    %c0_7 = arith.constant 0 : index
    %c0_8 = arith.constant 0 : index
    %4 = vector.load %arg9[%c0_7, %c0_8] : memref<32x128xf32, #tpu.memory_space<vmem>>, vector<1x32xf32>
    %c0_9 = arith.constant 0 : index
    %c0_10 = arith.constant 0 : index
    %c0_11 = arith.constant 0 : index
    %5 = vector.load %arg11[%c0_9, %c0_10, %c0_11] : memref<2x18x8xf32, #tpu.memory_space<vmem>>, vector<2x16x8xf32>
    %6 = vector.shape_cast %5 : vector<2x16x8xf32> to vector<32x8xf32>
    %c0_12 = arith.constant 0 : index
    %c0_13 = arith.constant 0 : index
    %c0_14 = arith.constant 0 : index
    %7 = vector.load %arg2[%c0_12, %c0_13, %c0_14] : memref<3x8x32xbf16, #tpu.memory_space<vmem>>, vector<1x8x32xbf16>
    %8 = vector.shape_cast %7 : vector<1x8x32xbf16> to vector<8x32xbf16>
    %9 = arith.truncf %6 : vector<32x8xf32> to vector<32x8xbf16>
    %cst_15 = arith.constant dense<0.000000e+00> : vector<32x32xf32>
    %10 = tpu.matmul %9, %8, %cst_15 {dimension_numbers = #tpu.dot_dimension_numbers<[1], [0], [0], [1], [0, 0, 1, 1], [], []>} : vector<32x8xbf16>, vector<8x32xbf16>, vector<32x32xf32> -> vector<32x32xf32>
    %11 = vector.broadcast %4 : vector<1x32xf32> to vector<32x32xf32>
    %12 = arith.addf %11, %10 : vector<32x32xf32>
    %c0_16 = arith.constant 0 : index
    %c1_17 = arith.constant 1 : index
    %c0_18 = arith.constant 0 : index
    %13 = vector.load %arg11[%c0_16, %c1_17, %c0_18] : memref<2x18x8xf32, #tpu.memory_space<vmem>>, vector<2x16x8xf32>
    %14 = vector.shape_cast %13 : vector<2x16x8xf32> to vector<32x8xf32>
    %c1_19 = arith.constant 1 : index
    %c0_20 = arith.constant 0 : index
    %c0_21 = arith.constant 0 : index
    %15 = vector.load %arg2[%c1_19, %c0_20, %c0_21] : memref<3x8x32xbf16, #tpu.memory_space<vmem>>, vector<1x8x32xbf16>
    %16 = vector.shape_cast %15 : vector<1x8x32xbf16> to vector<8x32xbf16>
    %17 = arith.truncf %14 : vector<32x8xf32> to vector<32x8xbf16>
    %cst_22 = arith.constant dense<0.000000e+00> : vector<32x32xf32>
    %18 = tpu.matmul %17, %16, %cst_22 {dimension_numbers = #tpu.dot_dimension_numbers<[1], [0], [0], [1], [0, 0, 1, 1], [], []>} : vector<32x8xbf16>, vector<8x32xbf16>, vector<32x32xf32> -> vector<32x32xf32>
    %19 = arith.addf %12, %18 : vector<32x32xf32>
    %c0_23 = arith.constant 0 : index
    %c2 = arith.constant 2 : index
    %c0_24 = arith.constant 0 : index
    %20 = vector.load %arg11[%c0_23, %c2, %c0_24] : memref<2x18x8xf32, #tpu.memory_space<vmem>>, vector<2x16x8xf32>
    %21 = vector.shape_cast %20 : vector<2x16x8xf32> to vector<32x8xf32>
    %c2_25 = arith.constant 2 : index
    %c0_26 = arith.constant 0 : index
    %c0_27 = arith.constant 0 : index
    %22 = vector.load %arg2[%c2_25, %c0_26, %c0_27] : memref<3x8x32xbf16, #tpu.memory_space<vmem>>, vector<1x8x32xbf16>
    %23 = vector.shape_cast %22 : vector<1x8x32xbf16> to vector<8x32xbf16>
    %24 = arith.truncf %21 : vector<32x8xf32> to vector<32x8xbf16>
    %cst_28 = arith.constant dense<0.000000e+00> : vector<32x32xf32>
    %25 = tpu.matmul %24, %23, %cst_28 {dimension_numbers = #tpu.dot_dimension_numbers<[1], [0], [0], [1], [0, 0, 1, 1], [], []>} : vector<32x8xbf16>, vector<8x32xbf16>, vector<32x32xf32> -> vector<32x32xf32>
    %26 = arith.addf %19, %25 : vector<32x32xf32>
    %cst_29 = arith.constant 5.000000e-01 : f32
    %27 = vector.broadcast %cst_29 : f32 to vector<32x32xf32>
    %28 = arith.mulf %27, %26 : vector<32x32xf32>
    %cst_30 = arith.constant 4.471500e-02 : f32
    %29 = vector.broadcast %cst_30 : f32 to vector<32x32xf32>
    %30 = arith.mulf %29, %26 : vector<32x32xf32>
    %31 = arith.mulf %30, %26 : vector<32x32xf32>
    %32 = arith.mulf %31, %26 : vector<32x32xf32>
    %33 = arith.addf %26, %32 : vector<32x32xf32>
    %cst_31 = arith.constant 0.797884583 : f32
    %34 = vector.broadcast %cst_31 : f32 to vector<32x32xf32>
    %35 = arith.mulf %34, %33 : vector<32x32xf32>
    %36 = math.tanh %35 : vector<32x32xf32>
    %cst_32 = arith.constant 1.000000e+00 : f32
    %37 = vector.broadcast %cst_32 : f32 to vector<32x32xf32>
    %38 = arith.addf %37, %36 : vector<32x32xf32>
    %39 = arith.mulf %28, %38 : vector<32x32xf32>
    %cst_33 = arith.constant 0.000000e+00 : f32
    %40 = vector.broadcast %cst_33 : f32 to vector<2x18x32xf32>
    %c0_34 = arith.constant 0 : index
    %c0_35 = arith.constant 0 : index
    %c0_36 = arith.constant 0 : index
    %41 = vector.load %arg12[%c0_34, %c0_35, %c0_36] : memref<2x18x32xf32, #tpu.memory_space<vmem>>, vector<2x18x32xf32>
    tpu.vector_store %arg12[%c0_34, %c0_35, %c0_36], %40 {strides = array<i32>} : memref<2x18x32xf32, #tpu.memory_space<vmem>>, vector<2x18x32xf32>,
    %42 = vector.shape_cast %39 : vector<32x32xf32> to vector<2x16x32xf32>
    %c0_37 = arith.constant 0 : index
    %c1_38 = arith.constant 1 : index
    %c0_39 = arith.constant 0 : index
    %43 = vector.load %arg12[%c0_37, %c1_38, %c0_39] : memref<2x18x32xf32, #tpu.memory_space<vmem>>, vector<2x16x32xf32>
    tpu.vector_store %arg12[%c0_37, %c1_38, %c0_39], %42 {strides = array<i32>} : memref<2x18x32xf32, #tpu.memory_space<vmem>>, vector<2x16x32xf32>,
    %c1_40 = arith.constant 1 : index
    %c0_41 = arith.constant 0 : index
    %44 = vector.load %arg9[%c1_40, %c0_41] : memref<32x128xf32, #tpu.memory_space<vmem>>, vector<1x32xf32>
    %c0_42 = arith.constant 0 : index
    %c0_43 = arith.constant 0 : index
    %c0_44 = arith.constant 0 : index
    %45 = tpu.strided_load %arg12[%c0_42, %c0_43, %c0_44] {strides = array<i32: 1, 2, 1>} : memref<2x18x32xf32, #tpu.memory_space<vmem>>, vector<2x8x32xf32>
    %46 = vector.shape_cast %45 : vector<2x8x32xf32> to vector<16x32xf32>
    %c0_45 = arith.constant 0 : index
    %c0_46 = arith.constant 0 : index
    %c0_47 = arith.constant 0 : index
    %47 = vector.load %arg3[%c0_45, %c0_46, %c0_47] : memref<3x32x32xbf16, #tpu.memory_space<vmem>>, vector<1x32x32xbf16>
    %48 = vector.shape_cast %47 : vector<1x32x32xbf16> to vector<32x32xbf16>
    %49 = arith.truncf %46 : vector<16x32xf32> to vector<16x32xbf16>
    %cst_48 = arith.constant dense<0.000000e+00> : vector<16x32xf32>
    %50 = tpu.matmul %49, %48, %cst_48 {dimension_numbers = #tpu.dot_dimension_numbers<[1], [0], [0], [1], [0, 0, 1, 1], [], []>} : vector<16x32xbf16>, vector<32x32xbf16>, vector<16x32xf32> -> vector<16x32xf32>
    %51 = vector.broadcast %44 : vector<1x32xf32> to vector<16x32xf32>
    %52 = arith.addf %51, %50 : vector<16x32xf32>
    %c0_49 = arith.constant 0 : index
    %c1_50 = arith.constant 1 : index
    %c0_51 = arith.constant 0 : index
    %53 = tpu.strided_load %arg12[%c0_49, %c1_50, %c0_51] {strides = array<i32: 1, 2, 1>} : memref<2x18x32xf32, #tpu.memory_space<vmem>>, vector<2x8x32xf32>
    %54 = vector.shape_cast %53 : vector<2x8x32xf32> to vector<16x32xf32>
    %c1_52 = arith.constant 1 : index
    %c0_53 = arith.constant 0 : index
    %c0_54 = arith.constant 0 : index
    %55 = vector.load %arg3[%c1_52, %c0_53, %c0_54] : memref<3x32x32xbf16, #tpu.memory_space<vmem>>, vector<1x32x32xbf16>
    %56 = vector.shape_cast %55 : vector<1x32x32xbf16> to vector<32x32xbf16>
    %57 = arith.truncf %54 : vector<16x32xf32> to vector<16x32xbf16>
    %cst_55 = arith.constant dense<0.000000e+00> : vector<16x32xf32>
    %58 = tpu.matmul %57, %56, %cst_55 {dimension_numbers = #tpu.dot_dimension_numbers<[1], [0], [0], [1], [0, 0, 1, 1], [], []>} : vector<16x32xbf16>, vector<32x32xbf16>, vector<16x32xf32> -> vector<16x32xf32>
    %59 = arith.addf %52, %58 : vector<16x32xf32>
    %c0_56 = arith.constant 0 : index
    %c2_57 = arith.constant 2 : index
    %c0_58 = arith.constant 0 : index
    %60 = tpu.strided_load %arg12[%c0_56, %c2_57, %c0_58] {strides = array<i32: 1, 2, 1>} : memref<2x18x32xf32, #tpu.memory_space<vmem>>, vector<2x8x32xf32>
    %61 = vector.shape_cast %60 : vector<2x8x32xf32> to vector<16x32xf32>
    %c2_59 = arith.constant 2 : index
    %c0_60 = arith.constant 0 : index
    %c0_61 = arith.constant 0 : index
    %62 = vector.load %arg3[%c2_59, %c0_60, %c0_61] : memref<3x32x32xbf16, #tpu.memory_space<vmem>>, vector<1x32x32xbf16>
    %63 = vector.shape_cast %62 : vector<1x32x32xbf16> to vector<32x32xbf16>
    %64 = arith.truncf %61 : vector<16x32xf32> to vector<16x32xbf16>
    %cst_62 = arith.constant dense<0.000000e+00> : vector<16x32xf32>
    %65 = tpu.matmul %64, %63, %cst_62 {dimension_numbers = #tpu.dot_dimension_numbers<[1], [0], [0], [1], [0, 0, 1, 1], [], []>} : vector<16x32xbf16>, vector<32x32xbf16>, vector<16x32xf32> -> vector<16x32xf32>
    %66 = arith.addf %59, %65 : vector<16x32xf32>
    %c2_63 = arith.constant 2 : index
    %c0_64 = arith.constant 0 : index
    %67 = vector.load %arg9[%c2_63, %c0_64] : memref<32x128xf32, #tpu.memory_space<vmem>>, vector<8x32xf32>
    %cst_65 = arith.constant 5.000000e-01 : f32
    %68 = vector.broadcast %cst_65 : f32 to vector<16x32xf32>
    %69 = arith.mulf %68, %66 : vector<16x32xf32>
    %cst_66 = arith.constant 4.471500e-02 : f32
    %70 = vector.broadcast %cst_66 : f32 to vector<16x32xf32>
    %71 = arith.mulf %70, %66 : vector<16x32xf32>
    %72 = arith.mulf %71, %66 : vector<16x32xf32>
    %73 = arith.mulf %72, %66 : vector<16x32xf32>
    %74 = arith.addf %66, %73 : vector<16x32xf32>
    %cst_67 = arith.constant 0.797884583 : f32
    %75 = vector.broadcast %cst_67 : f32 to vector<16x32xf32>
    %76 = arith.mulf %75, %74 : vector<16x32xf32>
    %77 = math.tanh %76 : vector<16x32xf32>
    %cst_68 = arith.constant 1.000000e+00 : f32
    %78 = vector.broadcast %cst_68 : f32 to vector<16x32xf32>
    %79 = arith.addf %78, %77 : vector<16x32xf32>
    %80 = arith.mulf %69, %79 : vector<16x32xf32>
    %81 = vector.shape_cast %80 : vector<16x32xf32> to vector<2x8x32xf32>
    %82 = vector.shape_cast %67 : vector<8x32xf32> to vector<1x8x32xf32>
    %83 = vector.broadcast %82 : vector<1x8x32xf32> to vector<2x8x32xf32>
    %84 = arith.addf %81, %83 : vector<2x8x32xf32>
    %85 = vector.shape_cast %84 : vector<2x8x32xf32> to vector<16x32xf32>
    %c10 = arith.constant 10 : index
    %c0_69 = arith.constant 0 : index
    %86 = vector.load %arg9[%c10, %c0_69] : memref<32x128xf32, #tpu.memory_space<vmem>>, vector<1x32xf32>
    %c11 = arith.constant 11 : index
    %c0_70 = arith.constant 0 : index
    %87 = vector.load %arg9[%c11, %c0_70] : memref<32x128xf32, #tpu.memory_space<vmem>>, vector<1x32xf32>
    %c12 = arith.constant 12 : index
    %c0_71 = arith.constant 0 : index
    %88 = vector.load %arg9[%c12, %c0_71] : memref<32x128xf32, #tpu.memory_space<vmem>>, vector<1x32xf32>
    %c13 = arith.constant 13 : index
    %c0_72 = arith.constant 0 : index
    %89 = vector.load %arg9[%c13, %c0_72] : memref<32x128xf32, #tpu.memory_space<vmem>>, vector<1x32xf32>
    %c14 = arith.constant 14 : index
    %c0_73 = arith.constant 0 : index
    %90 = vector.load %arg9[%c14, %c0_73] : memref<32x128xf32, #tpu.memory_space<vmem>>, vector<1x32xf32>
    %c15 = arith.constant 15 : index
    %c0_74 = arith.constant 0 : index
    %91 = vector.load %arg9[%c15, %c0_74] : memref<32x128xf32, #tpu.memory_space<vmem>>, vector<1x32xf32>
    %c16 = arith.constant 16 : index
    %c0_75 = arith.constant 0 : index
    %92 = vector.load %arg9[%c16, %c0_75] : memref<32x128xf32, #tpu.memory_space<vmem>>, vector<1x32xf32>
    %c17 = arith.constant 17 : index
    %c0_76 = arith.constant 0 : index
    %93 = vector.load %arg9[%c17, %c0_76] : memref<32x128xf32, #tpu.memory_space<vmem>>, vector<1x64xf32>
    %c18 = arith.constant 18 : index
    %c0_77 = arith.constant 0 : index
    %94 = vector.load %arg9[%c18, %c0_77] : memref<32x128xf32, #tpu.memory_space<vmem>>, vector<1x32xf32>
    %cst_78 = arith.constant dense<0.000000e+00> : vector<16xf32>
    %95 = vector.multi_reduction <add>, %85, %cst_78 [1] : vector<16x32xf32> to vector<16xf32>
    %96 = vector.shape_cast %95 : vector<16xf32> to vector<16x1xf32>
    %cst_79 = arith.constant 3.200000e+01 : f32
    %97 = vector.broadcast %cst_79 : f32 to vector<16x1xf32>
    %98 = arith.divf %96, %97 : vector<16x1xf32>
    %99 = vector.broadcast %98 : vector<16x1xf32> to vector<16x32xf32>
    %100 = arith.subf %85, %99 : vector<16x32xf32>
    %101 = arith.mulf %100, %100 : vector<16x32xf32>
    %cst_80 = arith.constant dense<0.000000e+00> : vector<16xf32>
    %102 = vector.multi_reduction <add>, %101, %cst_80 [1] : vector<16x32xf32> to vector<16xf32>
    %103 = vector.shape_cast %102 : vector<16xf32> to vector<16x1xf32>
    %cst_81 = arith.constant 3.200000e+01 : f32
    %104 = vector.broadcast %cst_81 : f32 to vector<16x1xf32>
    %105 = arith.divf %103, %104 : vector<16x1xf32>
    %cst_82 = arith.constant 9.99999974E-6 : f32
    %106 = vector.broadcast %cst_82 : f32 to vector<16x1xf32>
    %107 = arith.addf %105, %106 : vector<16x1xf32>
    %108 = math.rsqrt %107 : vector<16x1xf32>
    %109 = vector.broadcast %108 : vector<16x1xf32> to vector<16x32xf32>
    %110 = arith.mulf %100, %109 : vector<16x32xf32>
    %111 = vector.broadcast %86 : vector<1x32xf32> to vector<16x32xf32>
    %112 = arith.mulf %110, %111 : vector<16x32xf32>
    %113 = vector.broadcast %87 : vector<1x32xf32> to vector<16x32xf32>
    %114 = arith.addf %112, %113 : vector<16x32xf32>
    %115 = arith.truncf %114 : vector<16x32xf32> to vector<16x32xbf16>
    %c0_83 = arith.constant 0 : index
    %c0_84 = arith.constant 0 : index
    %c0_85 = arith.constant 0 : index
    %c0_86 = arith.constant 0 : index
    %116 = vector.load %arg4[%c0_83, %c0_84, %c0_85, %c0_86] : memref<2x3x32x32xbf16, #tpu.memory_space<vmem>>, vector<1x1x32x32xbf16>
    %117 = vector.shape_cast %116 : vector<1x1x32x32xbf16> to vector<32x32xbf16>
    %cst_87 = arith.constant dense<0.000000e+00> : vector<16x32xf32>
    %118 = tpu.matmul %115, %117, %cst_87 {dimension_numbers = #tpu.dot_dimension_numbers<[1], [0], [0], [1], [0, 0, 1, 1], [], []>} : vector<16x32xbf16>, vector<32x32xbf16>, vector<16x32xf32> -> vector<16x32xf32>
    %119 = vector.broadcast %88 : vector<1x32xf32> to vector<16x32xf32>
    %120 = arith.addf %118, %119 : vector<16x32xf32>
    %c0_88 = arith.constant 0 : index
    %c1_89 = arith.constant 1 : index
    %c0_90 = arith.constant 0 : index
    %c0_91 = arith.constant 0 : index
    %121 = vector.load %arg4[%c0_88, %c1_89, %c0_90, %c0_91] : memref<2x3x32x32xbf16, #tpu.memory_space<vmem>>, vector<1x1x32x32xbf16>
    %122 = vector.shape_cast %121 : vector<1x1x32x32xbf16> to vector<32x32xbf16>
    %cst_92 = arith.constant dense<0.000000e+00> : vector<16x32xf32>
    %123 = tpu.matmul %115, %122, %cst_92 {dimension_numbers = #tpu.dot_dimension_numbers<[1], [0], [0], [1], [0, 0, 1, 1], [], []>} : vector<16x32xbf16>, vector<32x32xbf16>, vector<16x32xf32> -> vector<16x32xf32>
    %c0_93 = arith.constant 0 : index
    %c2_94 = arith.constant 2 : index
    %c0_95 = arith.constant 0 : index
    %c0_96 = arith.constant 0 : index
    %124 = vector.load %arg4[%c0_93, %c2_94, %c0_95, %c0_96] : memref<2x3x32x32xbf16, #tpu.memory_space<vmem>>, vector<1x1x32x32xbf16>
    %125 = vector.shape_cast %124 : vector<1x1x32x32xbf16> to vector<32x32xbf16>
    %cst_97 = arith.constant dense<0.000000e+00> : vector<16x32xf32>
    %126 = tpu.matmul %115, %125, %cst_97 {dimension_numbers = #tpu.dot_dimension_numbers<[1], [0], [0], [1], [0, 0, 1, 1], [], []>} : vector<16x32xbf16>, vector<32x32xbf16>, vector<16x32xf32> -> vector<16x32xf32>
    %127 = vector.broadcast %89 : vector<1x32xf32> to vector<16x32xf32>
    %128 = arith.addf %126, %127 : vector<16x32xf32>
    %c0_98 = arith.constant 0 : index
    %c0_99 = arith.constant 0 : index
    %c0_100 = arith.constant 0 : index
    %129 = vector.load %arg5[%c0_98, %c0_99, %c0_100] : memref<2x32x32xbf16, #tpu.memory_space<vmem>>, vector<1x32x32xbf16>
    %130 = vector.shape_cast %129 : vector<1x32x32xbf16> to vector<32x32xbf16>
    %131 = vector.extract_strided_slice %120 {offsets = [0, 0], sizes = [16, 8], strides = [1, 1]} : vector<16x32xf32> to vector<16x8xf32>
    %132 = vector.shape_cast %131 : vector<16x8xf32> to vector<2x8x8xf32>
    %133 = arith.truncf %132 : vector<2x8x8xf32> to vector<2x8x8xbf16>
    %134 = vector.extract_strided_slice %123 {offsets = [0, 0], sizes = [16, 8], strides = [1, 1]} : vector<16x32xf32> to vector<16x8xf32>
    %135 = vector.shape_cast %134 : vector<16x8xf32> to vector<2x8x8xf32>
    %136 = arith.truncf %135 : vector<2x8x8xf32> to vector<2x8x8xbf16>
    %137 = vector.extract_strided_slice %128 {offsets = [0, 0], sizes = [16, 8], strides = [1, 1]} : vector<16x32xf32> to vector<16x8xf32>
    %138 = vector.shape_cast %137 : vector<16x8xf32> to vector<2x8x8xf32>
    %139 = arith.truncf %138 : vector<2x8x8xf32> to vector<2x8x8xbf16>
    "tpu.trace_start"() <{level = 10 : i32, message = "bqd,bkd->bqk"}> : () -> ()
    %cst_101 = arith.constant dense<0.000000e+00> : vector<2x8x8xf32>
    %140 = tpu.matmul %133, %136, %cst_101 {dimension_numbers = #tpu.dot_dimension_numbers<[2], [2], [1], [1], [0, 0, 0, 1, 1, 1], [0], [0]>} : vector<2x8x8xbf16>, vector<2x8x8xbf16>, vector<2x8x8xf32> -> vector<2x8x8xf32>
    "tpu.trace_stop"() : () -> ()
    %cst_102 = arith.constant dense<0xFF800000> : vector<2x8xf32>
    %141 = vector.multi_reduction <maximumf>, %140, %cst_102 [2] : vector<2x8x8xf32> to vector<2x8xf32>
    %142 = vector.shape_cast %141 : vector<2x8xf32> to vector<2x8x1xf32>
    %143 = vector.broadcast %142 : vector<2x8x1xf32> to vector<2x8x8xf32>
    %144 = arith.subf %140, %143 : vector<2x8x8xf32>
    %145 = math.exp %144 : vector<2x8x8xf32>
    %cst_103 = arith.constant dense<0.000000e+00> : vector<2x8xf32>
    %146 = vector.multi_reduction <add>, %145, %cst_103 [2] : vector<2x8x8xf32> to vector<2x8xf32>
    %147 = vector.shape_cast %146 : vector<2x8xf32> to vector<2x8x1xf32>
    %148 = tpu.reciprocal %147 {approx = true} : vector<2x8x1xf32> -> vector<2x8x1xf32>
    %149 = vector.broadcast %148 : vector<2x8x1xf32> to vector<2x8x8xf32>
    %150 = arith.mulf %145, %149 : vector<2x8x8xf32>
    %151 = arith.truncf %150 : vector<2x8x8xf32> to vector<2x8x8xbf16>
    "tpu.trace_start"() <{level = 10 : i32, message = "bqk,bkd->bqd"}> : () -> ()
    %cst_104 = arith.constant dense<0.000000e+00> : vector<2x8x8xf32>
    %152 = tpu.matmul %151, %139, %cst_104 {dimension_numbers = #tpu.dot_dimension_numbers<[2], [1], [1], [2], [0, 0, 0, 1, 1, 2], [0], [0]>} : vector<2x8x8xbf16>, vector<2x8x8xbf16>, vector<2x8x8xf32> -> vector<2x8x8xf32>
    "tpu.trace_stop"() : () -> ()
    %153 = vector.shape_cast %152 : vector<2x8x8xf32> to vector<16x8xf32>
    %154 = vector.extract_strided_slice %130 {offsets = [0, 0], sizes = [8, 32], strides = [1, 1]} : vector<32x32xbf16> to vector<8x32xbf16>
    %155 = arith.truncf %153 : vector<16x8xf32> to vector<16x8xbf16>
    %cst_105 = arith.constant dense<0.000000e+00> : vector<16x32xf32>
    %156 = tpu.matmul %155, %154, %cst_105 {dimension_numbers = #tpu.dot_dimension_numbers<[1], [0], [0], [1], [0, 0, 1, 1], [], []>} : vector<16x8xbf16>, vector<8x32xbf16>, vector<16x32xf32> -> vector<16x32xf32>
    %157 = vector.broadcast %90 : vector<1x32xf32> to vector<16x32xf32>
    %158 = arith.addf %157, %156 : vector<16x32xf32>
    %159 = vector.extract_strided_slice %120 {offsets = [0, 8], sizes = [16, 8], strides = [1, 1]} : vector<16x32xf32> to vector<16x8xf32>
    %160 = vector.shape_cast %159 : vector<16x8xf32> to vector<2x8x8xf32>
    %161 = arith.truncf %160 : vector<2x8x8xf32> to vector<2x8x8xbf16>
    %162 = vector.extract_strided_slice %123 {offsets = [0, 8], sizes = [16, 8], strides = [1, 1]} : vector<16x32xf32> to vector<16x8xf32>
    %163 = vector.shape_cast %162 : vector<16x8xf32> to vector<2x8x8xf32>
    %164 = arith.truncf %163 : vector<2x8x8xf32> to vector<2x8x8xbf16>
    %165 = vector.extract_strided_slice %128 {offsets = [0, 8], sizes = [16, 8], strides = [1, 1]} : vector<16x32xf32> to vector<16x8xf32>
    %166 = vector.shape_cast %165 : vector<16x8xf32> to vector<2x8x8xf32>
    %167 = arith.truncf %166 : vector<2x8x8xf32> to vector<2x8x8xbf16>
    "tpu.trace_start"() <{level = 10 : i32, message = "bqd,bkd->bqk"}> : () -> ()
    %cst_106 = arith.constant dense<0.000000e+00> : vector<2x8x8xf32>
    %168 = tpu.matmul %161, %164, %cst_106 {dimension_numbers = #tpu.dot_dimension_numbers<[2], [2], [1], [1], [0, 0, 0, 1, 1, 1], [0], [0]>} : vector<2x8x8xbf16>, vector<2x8x8xbf16>, vector<2x8x8xf32> -> vector<2x8x8xf32>
    "tpu.trace_stop"() : () -> ()
    %cst_107 = arith.constant dense<0xFF800000> : vector<2x8xf32>
    %169 = vector.multi_reduction <maximumf>, %168, %cst_107 [2] : vector<2x8x8xf32> to vector<2x8xf32>
    %170 = vector.shape_cast %169 : vector<2x8xf32> to vector<2x8x1xf32>
    %171 = vector.broadcast %170 : vector<2x8x1xf32> to vector<2x8x8xf32>
    %172 = arith.subf %168, %171 : vector<2x8x8xf32>
    %173 = math.exp %172 : vector<2x8x8xf32>
    %cst_108 = arith.constant dense<0.000000e+00> : vector<2x8xf32>
    %174 = vector.multi_reduction <add>, %173, %cst_108 [2] : vector<2x8x8xf32> to vector<2x8xf32>
    %175 = vector.shape_cast %174 : vector<2x8xf32> to vector<2x8x1xf32>
    %176 = tpu.reciprocal %175 {approx = true} : vector<2x8x1xf32> -> vector<2x8x1xf32>
    %177 = vector.broadcast %176 : vector<2x8x1xf32> to vector<2x8x8xf32>
    %178 = arith.mulf %173, %177 : vector<2x8x8xf32>
    %179 = arith.truncf %178 : vector<2x8x8xf32> to vector<2x8x8xbf16>
    "tpu.trace_start"() <{level = 10 : i32, message = "bqk,bkd->bqd"}> : () -> ()
    %cst_109 = arith.constant dense<0.000000e+00> : vector<2x8x8xf32>
    %180 = tpu.matmul %179, %167, %cst_109 {dimension_numbers = #tpu.dot_dimension_numbers<[2], [1], [1], [2], [0, 0, 0, 1, 1, 2], [0], [0]>} : vector<2x8x8xbf16>, vector<2x8x8xbf16>, vector<2x8x8xf32> -> vector<2x8x8xf32>
    "tpu.trace_stop"() : () -> ()
    %181 = vector.shape_cast %180 : vector<2x8x8xf32> to vector<16x8xf32>
    %182 = vector.extract_strided_slice %130 {offsets = [8, 0], sizes = [8, 32], strides = [1, 1]} : vector<32x32xbf16> to vector<8x32xbf16>
    %183 = arith.truncf %181 : vector<16x8xf32> to vector<16x8xbf16>
    %cst_110 = arith.constant dense<0.000000e+00> : vector<16x32xf32>
    %184 = tpu.matmul %183, %182, %cst_110 {dimension_numbers = #tpu.dot_dimension_numbers<[1], [0], [0], [1], [0, 0, 1, 1], [], []>} : vector<16x8xbf16>, vector<8x32xbf16>, vector<16x32xf32> -> vector<16x32xf32>
    %185 = arith.addf %158, %184 : vector<16x32xf32>
    %186 = vector.extract_strided_slice %120 {offsets = [0, 16], sizes = [16, 8], strides = [1, 1]} : vector<16x32xf32> to vector<16x8xf32>
    %187 = vector.shape_cast %186 : vector<16x8xf32> to vector<2x8x8xf32>
    %188 = arith.truncf %187 : vector<2x8x8xf32> to vector<2x8x8xbf16>
    %189 = vector.extract_strided_slice %123 {offsets = [0, 16], sizes = [16, 8], strides = [1, 1]} : vector<16x32xf32> to vector<16x8xf32>
    %190 = vector.shape_cast %189 : vector<16x8xf32> to vector<2x8x8xf32>
    %191 = arith.truncf %190 : vector<2x8x8xf32> to vector<2x8x8xbf16>
    %192 = vector.extract_strided_slice %128 {offsets = [0, 16], sizes = [16, 8], strides = [1, 1]} : vector<16x32xf32> to vector<16x8xf32>
    %193 = vector.shape_cast %192 : vector<16x8xf32> to vector<2x8x8xf32>
    %194 = arith.truncf %193 : vector<2x8x8xf32> to vector<2x8x8xbf16>
    "tpu.trace_start"() <{level = 10 : i32, message = "bqd,bkd->bqk"}> : () -> ()
    %cst_111 = arith.constant dense<0.000000e+00> : vector<2x8x8xf32>
    %195 = tpu.matmul %188, %191, %cst_111 {dimension_numbers = #tpu.dot_dimension_numbers<[2], [2], [1], [1], [0, 0, 0, 1, 1, 1], [0], [0]>} : vector<2x8x8xbf16>, vector<2x8x8xbf16>, vector<2x8x8xf32> -> vector<2x8x8xf32>
    "tpu.trace_stop"() : () -> ()
    %cst_112 = arith.constant dense<0xFF800000> : vector<2x8xf32>
    %196 = vector.multi_reduction <maximumf>, %195, %cst_112 [2] : vector<2x8x8xf32> to vector<2x8xf32>
    %197 = vector.shape_cast %196 : vector<2x8xf32> to vector<2x8x1xf32>
    %198 = vector.broadcast %197 : vector<2x8x1xf32> to vector<2x8x8xf32>
    %199 = arith.subf %195, %198 : vector<2x8x8xf32>
    %200 = math.exp %199 : vector<2x8x8xf32>
    %cst_113 = arith.constant dense<0.000000e+00> : vector<2x8xf32>
    %201 = vector.multi_reduction <add>, %200, %cst_113 [2] : vector<2x8x8xf32> to vector<2x8xf32>
    %202 = vector.shape_cast %201 : vector<2x8xf32> to vector<2x8x1xf32>
    %203 = tpu.reciprocal %202 {approx = true} : vector<2x8x1xf32> -> vector<2x8x1xf32>
    %204 = vector.broadcast %203 : vector<2x8x1xf32> to vector<2x8x8xf32>
    %205 = arith.mulf %200, %204 : vector<2x8x8xf32>
    %206 = arith.truncf %205 : vector<2x8x8xf32> to vector<2x8x8xbf16>
    "tpu.trace_start"() <{level = 10 : i32, message = "bqk,bkd->bqd"}> : () -> ()
    %cst_114 = arith.constant dense<0.000000e+00> : vector<2x8x8xf32>
    %207 = tpu.matmul %206, %194, %cst_114 {dimension_numbers = #tpu.dot_dimension_numbers<[2], [1], [1], [2], [0, 0, 0, 1, 1, 2], [0], [0]>} : vector<2x8x8xbf16>, vector<2x8x8xbf16>, vector<2x8x8xf32> -> vector<2x8x8xf32>
    "tpu.trace_stop"() : () -> ()
    %208 = vector.shape_cast %207 : vector<2x8x8xf32> to vector<16x8xf32>
    %209 = vector.extract_strided_slice %130 {offsets = [16, 0], sizes = [8, 32], strides = [1, 1]} : vector<32x32xbf16> to vector<8x32xbf16>
    %210 = arith.truncf %208 : vector<16x8xf32> to vector<16x8xbf16>
    %cst_115 = arith.constant dense<0.000000e+00> : vector<16x32xf32>
    %211 = tpu.matmul %210, %209, %cst_115 {dimension_numbers = #tpu.dot_dimension_numbers<[1], [0], [0], [1], [0, 0, 1, 1], [], []>} : vector<16x8xbf16>, vector<8x32xbf16>, vector<16x32xf32> -> vector<16x32xf32>
    %212 = arith.addf %185, %211 : vector<16x32xf32>
    %213 = vector.extract_strided_slice %120 {offsets = [0, 24], sizes = [16, 8], strides = [1, 1]} : vector<16x32xf32> to vector<16x8xf32>
    %214 = vector.shape_cast %213 : vector<16x8xf32> to vector<2x8x8xf32>
    %215 = arith.truncf %214 : vector<2x8x8xf32> to vector<2x8x8xbf16>
    %216 = vector.extract_strided_slice %123 {offsets = [0, 24], sizes = [16, 8], strides = [1, 1]} : vector<16x32xf32> to vector<16x8xf32>
    %217 = vector.shape_cast %216 : vector<16x8xf32> to vector<2x8x8xf32>
    %218 = arith.truncf %217 : vector<2x8x8xf32> to vector<2x8x8xbf16>
    %219 = vector.extract_strided_slice %128 {offsets = [0, 24], sizes = [16, 8], strides = [1, 1]} : vector<16x32xf32> to vector<16x8xf32>
    %220 = vector.shape_cast %219 : vector<16x8xf32> to vector<2x8x8xf32>
    %221 = arith.truncf %220 : vector<2x8x8xf32> to vector<2x8x8xbf16>
    "tpu.trace_start"() <{level = 10 : i32, message = "bqd,bkd->bqk"}> : () -> ()
    %cst_116 = arith.constant dense<0.000000e+00> : vector<2x8x8xf32>
    %222 = tpu.matmul %215, %218, %cst_116 {dimension_numbers = #tpu.dot_dimension_numbers<[2], [2], [1], [1], [0, 0, 0, 1, 1, 1], [0], [0]>} : vector<2x8x8xbf16>, vector<2x8x8xbf16>, vector<2x8x8xf32> -> vector<2x8x8xf32>
    "tpu.trace_stop"() : () -> ()
    %cst_117 = arith.constant dense<0xFF800000> : vector<2x8xf32>
    %223 = vector.multi_reduction <maximumf>, %222, %cst_117 [2] : vector<2x8x8xf32> to vector<2x8xf32>
    %224 = vector.shape_cast %223 : vector<2x8xf32> to vector<2x8x1xf32>
    %225 = vector.broadcast %224 : vector<2x8x1xf32> to vector<2x8x8xf32>
    %226 = arith.subf %222, %225 : vector<2x8x8xf32>
    %227 = math.exp %226 : vector<2x8x8xf32>
    %cst_118 = arith.constant dense<0.000000e+00> : vector<2x8xf32>
    %228 = vector.multi_reduction <add>, %227, %cst_118 [2] : vector<2x8x8xf32> to vector<2x8xf32>
    %229 = vector.shape_cast %228 : vector<2x8xf32> to vector<2x8x1xf32>
    %230 = tpu.reciprocal %229 {approx = true} : vector<2x8x1xf32> -> vector<2x8x1xf32>
    %231 = vector.broadcast %230 : vector<2x8x1xf32> to vector<2x8x8xf32>
    %232 = arith.mulf %227, %231 : vector<2x8x8xf32>
    %233 = arith.truncf %232 : vector<2x8x8xf32> to vector<2x8x8xbf16>
    "tpu.trace_start"() <{level = 10 : i32, message = "bqk,bkd->bqd"}> : () -> ()
    %cst_119 = arith.constant dense<0.000000e+00> : vector<2x8x8xf32>
    %234 = tpu.matmul %233, %221, %cst_119 {dimension_numbers = #tpu.dot_dimension_numbers<[2], [1], [1], [2], [0, 0, 0, 1, 1, 2], [0], [0]>} : vector<2x8x8xbf16>, vector<2x8x8xbf16>, vector<2x8x8xf32> -> vector<2x8x8xf32>
    "tpu.trace_stop"() : () -> ()
    %235 = vector.shape_cast %234 : vector<2x8x8xf32> to vector<16x8xf32>
    %236 = vector.extract_strided_slice %130 {offsets = [24, 0], sizes = [8, 32], strides = [1, 1]} : vector<32x32xbf16> to vector<8x32xbf16>
    %237 = arith.truncf %235 : vector<16x8xf32> to vector<16x8xbf16>
    %cst_120 = arith.constant dense<0.000000e+00> : vector<16x32xf32>
    %238 = tpu.matmul %237, %236, %cst_120 {dimension_numbers = #tpu.dot_dimension_numbers<[1], [0], [0], [1], [0, 0, 1, 1], [], []>} : vector<16x8xbf16>, vector<8x32xbf16>, vector<16x32xf32> -> vector<16x32xf32>
    %239 = arith.addf %212, %238 : vector<16x32xf32>
    %240 = arith.addf %85, %239 : vector<16x32xf32>
    %cst_121 = arith.constant dense<0.000000e+00> : vector<16xf32>
    %241 = vector.multi_reduction <add>, %240, %cst_121 [1] : vector<16x32xf32> to vector<16xf32>
    %242 = vector.shape_cast %241 : vector<16xf32> to vector<16x1xf32>
    %cst_122 = arith.constant 3.200000e+01 : f32
    %243 = vector.broadcast %cst_122 : f32 to vector<16x1xf32>
    %244 = arith.divf %242, %243 : vector<16x1xf32>
    %245 = vector.broadcast %244 : vector<16x1xf32> to vector<16x32xf32>
    %246 = arith.subf %240, %245 : vector<16x32xf32>
    %247 = arith.mulf %246, %246 : vector<16x32xf32>
    %cst_123 = arith.constant dense<0.000000e+00> : vector<16xf32>
    %248 = vector.multi_reduction <add>, %247, %cst_123 [1] : vector<16x32xf32> to vector<16xf32>
    %249 = vector.shape_cast %248 : vector<16xf32> to vector<16x1xf32>
    %cst_124 = arith.constant 3.200000e+01 : f32
    %250 = vector.broadcast %cst_124 : f32 to vector<16x1xf32>
    %251 = arith.divf %249, %250 : vector<16x1xf32>
    %cst_125 = arith.constant 9.99999974E-6 : f32
    %252 = vector.broadcast %cst_125 : f32 to vector<16x1xf32>
    %253 = arith.addf %251, %252 : vector<16x1xf32>
    %254 = math.rsqrt %253 : vector<16x1xf32>
    %255 = vector.broadcast %254 : vector<16x1xf32> to vector<16x32xf32>
    %256 = arith.mulf %246, %255 : vector<16x32xf32>
    %257 = vector.broadcast %91 : vector<1x32xf32> to vector<16x32xf32>
    %258 = arith.mulf %256, %257 : vector<16x32xf32>
    %259 = vector.broadcast %92 : vector<1x32xf32> to vector<16x32xf32>
    %260 = arith.addf %258, %259 : vector<16x32xf32>
    %261 = arith.truncf %260 : vector<16x32xf32> to vector<16x32xbf16>
    %c0_126 = arith.constant 0 : index
    %c0_127 = arith.constant 0 : index
    %c0_128 = arith.constant 0 : index
    %262 = vector.load %arg6[%c0_126, %c0_127, %c0_128] : memref<2x32x64xbf16, #tpu.memory_space<vmem>>, vector<1x32x64xbf16>
    %263 = vector.shape_cast %262 : vector<1x32x64xbf16> to vector<32x64xbf16>
    %cst_129 = arith.constant dense<0.000000e+00> : vector<16x64xf32>
    %264 = tpu.matmul %261, %263, %cst_129 {dimension_numbers = #tpu.dot_dimension_numbers<[1], [0], [0], [1], [0, 0, 1, 1], [], []>} : vector<16x32xbf16>, vector<32x64xbf16>, vector<16x64xf32> -> vector<16x64xf32>
    %265 = vector.broadcast %93 : vector<1x64xf32> to vector<16x64xf32>
    %266 = arith.addf %264, %265 : vector<16x64xf32>
    %cst_130 = arith.constant 5.000000e-01 : f32
    %267 = vector.broadcast %cst_130 : f32 to vector<16x64xf32>
    %268 = arith.mulf %267, %266 : vector<16x64xf32>
    %cst_131 = arith.constant 4.471500e-02 : f32
    %269 = vector.broadcast %cst_131 : f32 to vector<16x64xf32>
    %270 = arith.mulf %269, %266 : vector<16x64xf32>
    %271 = arith.mulf %270, %266 : vector<16x64xf32>
    %272 = arith.mulf %271, %266 : vector<16x64xf32>
    %273 = arith.addf %266, %272 : vector<16x64xf32>
    %cst_132 = arith.constant 0.797884583 : f32
    %274 = vector.broadcast %cst_132 : f32 to vector<16x64xf32>
    %275 = arith.mulf %274, %273 : vector<16x64xf32>
    %276 = math.tanh %275 : vector<16x64xf32>
    %cst_133 = arith.constant 1.000000e+00 : f32
    %277 = vector.broadcast %cst_133 : f32 to vector<16x64xf32>
    %278 = arith.addf %277, %276 : vector<16x64xf32>
    %279 = arith.mulf %268, %278 : vector<16x64xf32>
    %c0_134 = arith.constant 0 : index
    %c0_135 = arith.constant 0 : index
    %c0_136 = arith.constant 0 : index
    %280 = vector.load %arg7[%c0_134, %c0_135, %c0_136] : memref<2x64x32xbf16, #tpu.memory_space<vmem>>, vector<1x64x32xbf16>
    %281 = vector.shape_cast %280 : vector<1x64x32xbf16> to vector<64x32xbf16>
    %282 = arith.truncf %279 : vector<16x64xf32> to vector<16x64xbf16>
    %cst_137 = arith.constant dense<0.000000e+00> : vector<16x32xf32>
    %283 = tpu.matmul %282, %281, %cst_137 {dimension_numbers = #tpu.dot_dimension_numbers<[1], [0], [0], [1], [0, 0, 1, 1], [], []>} : vector<16x64xbf16>, vector<64x32xbf16>, vector<16x32xf32> -> vector<16x32xf32>
    %284 = arith.addf %240, %283 : vector<16x32xf32>
    %285 = vector.broadcast %94 : vector<1x32xf32> to vector<16x32xf32>
    %286 = arith.addf %284, %285 : vector<16x32xf32>
    %c19 = arith.constant 19 : index
    %c0_138 = arith.constant 0 : index
    %287 = vector.load %arg9[%c19, %c0_138] : memref<32x128xf32, #tpu.memory_space<vmem>>, vector<1x32xf32>
    %c20 = arith.constant 20 : index
    %c0_139 = arith.constant 0 : index
    %288 = vector.load %arg9[%c20, %c0_139] : memref<32x128xf32, #tpu.memory_space<vmem>>, vector<1x32xf32>
    %c21 = arith.constant 21 : index
    %c0_140 = arith.constant 0 : index
    %289 = vector.load %arg9[%c21, %c0_140] : memref<32x128xf32, #tpu.memory_space<vmem>>, vector<1x32xf32>
    %c22 = arith.constant 22 : index
    %c0_141 = arith.constant 0 : index
    %290 = vector.load %arg9[%c22, %c0_141] : memref<32x128xf32, #tpu.memory_space<vmem>>, vector<1x32xf32>
    %c23 = arith.constant 23 : index
    %c0_142 = arith.constant 0 : index
    %291 = vector.load %arg9[%c23, %c0_142] : memref<32x128xf32, #tpu.memory_space<vmem>>, vector<1x32xf32>
    %c24 = arith.constant 24 : index
    %c0_143 = arith.constant 0 : index
    %292 = vector.load %arg9[%c24, %c0_143] : memref<32x128xf32, #tpu.memory_space<vmem>>, vector<1x32xf32>
    %c25 = arith.constant 25 : index
    %c0_144 = arith.constant 0 : index
    %293 = vector.load %arg9[%c25, %c0_144] : memref<32x128xf32, #tpu.memory_space<vmem>>, vector<1x32xf32>
    %c26 = arith.constant 26 : index
    %c0_145 = arith.constant 0 : index
    %294 = vector.load %arg9[%c26, %c0_145] : memref<32x128xf32, #tpu.memory_space<vmem>>, vector<1x64xf32>
    %c27 = arith.constant 27 : index
    %c0_146 = arith.constant 0 : index
    %295 = vector.load %arg9[%c27, %c0_146] : memref<32x128xf32, #tpu.memory_space<vmem>>, vector<1x32xf32>
    %cst_147 = arith.constant dense<0.000000e+00> : vector<16xf32>
    %296 = vector.multi_reduction <add>, %286, %cst_147 [1] : vector<16x32xf32> to vector<16xf32>
    %297 = vector.shape_cast %296 : vector<16xf32> to vector<16x1xf32>
    %cst_148 = arith.constant 3.200000e+01 : f32
    %298 = vector.broadcast %cst_148 : f32 to vector<16x1xf32>
    %299 = arith.divf %297, %298 : vector<16x1xf32>
    %300 = vector.broadcast %299 : vector<16x1xf32> to vector<16x32xf32>
    %301 = arith.subf %286, %300 : vector<16x32xf32>
    %302 = arith.mulf %301, %301 : vector<16x32xf32>
    %cst_149 = arith.constant dense<0.000000e+00> : vector<16xf32>
    %303 = vector.multi_reduction <add>, %302, %cst_149 [1] : vector<16x32xf32> to vector<16xf32>
    %304 = vector.shape_cast %303 : vector<16xf32> to vector<16x1xf32>
    %cst_150 = arith.constant 3.200000e+01 : f32
    %305 = vector.broadcast %cst_150 : f32 to vector<16x1xf32>
    %306 = arith.divf %304, %305 : vector<16x1xf32>
    %cst_151 = arith.constant 9.99999974E-6 : f32
    %307 = vector.broadcast %cst_151 : f32 to vector<16x1xf32>
    %308 = arith.addf %306, %307 : vector<16x1xf32>
    %309 = math.rsqrt %308 : vector<16x1xf32>
    %310 = vector.broadcast %309 : vector<16x1xf32> to vector<16x32xf32>
    %311 = arith.mulf %301, %310 : vector<16x32xf32>
    %312 = vector.broadcast %287 : vector<1x32xf32> to vector<16x32xf32>
    %313 = arith.mulf %311, %312 : vector<16x32xf32>
    %314 = vector.broadcast %288 : vector<1x32xf32> to vector<16x32xf32>
    %315 = arith.addf %313, %314 : vector<16x32xf32>
    %316 = arith.truncf %315 : vector<16x32xf32> to vector<16x32xbf16>
    %c1_152 = arith.constant 1 : index
    %c0_153 = arith.constant 0 : index
    %c0_154 = arith.constant 0 : index
    %c0_155 = arith.constant 0 : index
    %317 = vector.load %arg4[%c1_152, %c0_153, %c0_154, %c0_155] : memref<2x3x32x32xbf16, #tpu.memory_space<vmem>>, vector<1x1x32x32xbf16>
    %318 = vector.shape_cast %317 : vector<1x1x32x32xbf16> to vector<32x32xbf16>
    %cst_156 = arith.constant dense<0.000000e+00> : vector<16x32xf32>
    %319 = tpu.matmul %316, %318, %cst_156 {dimension_numbers = #tpu.dot_dimension_numbers<[1], [0], [0], [1], [0, 0, 1, 1], [], []>} : vector<16x32xbf16>, vector<32x32xbf16>, vector<16x32xf32> -> vector<16x32xf32>
    %320 = vector.broadcast %289 : vector<1x32xf32> to vector<16x32xf32>
    %321 = arith.addf %319, %320 : vector<16x32xf32>
    %c1_157 = arith.constant 1 : index
    %c1_158 = arith.constant 1 : index
    %c0_159 = arith.constant 0 : index
    %c0_160 = arith.constant 0 : index
    %322 = vector.load %arg4[%c1_157, %c1_158, %c0_159, %c0_160] : memref<2x3x32x32xbf16, #tpu.memory_space<vmem>>, vector<1x1x32x32xbf16>
    %323 = vector.shape_cast %322 : vector<1x1x32x32xbf16> to vector<32x32xbf16>
    %cst_161 = arith.constant dense<0.000000e+00> : vector<16x32xf32>
    %324 = tpu.matmul %316, %323, %cst_161 {dimension_numbers = #tpu.dot_dimension_numbers<[1], [0], [0], [1], [0, 0, 1, 1], [], []>} : vector<16x32xbf16>, vector<32x32xbf16>, vector<16x32xf32> -> vector<16x32xf32>
    %c1_162 = arith.constant 1 : index
    %c2_163 = arith.constant 2 : index
    %c0_164 = arith.constant 0 : index
    %c0_165 = arith.constant 0 : index
    %325 = vector.load %arg4[%c1_162, %c2_163, %c0_164, %c0_165] : memref<2x3x32x32xbf16, #tpu.memory_space<vmem>>, vector<1x1x32x32xbf16>
    %326 = vector.shape_cast %325 : vector<1x1x32x32xbf16> to vector<32x32xbf16>
    %cst_166 = arith.constant dense<0.000000e+00> : vector<16x32xf32>
    %327 = tpu.matmul %316, %326, %cst_166 {dimension_numbers = #tpu.dot_dimension_numbers<[1], [0], [0], [1], [0, 0, 1, 1], [], []>} : vector<16x32xbf16>, vector<32x32xbf16>, vector<16x32xf32> -> vector<16x32xf32>
    %328 = vector.broadcast %290 : vector<1x32xf32> to vector<16x32xf32>
    %329 = arith.addf %327, %328 : vector<16x32xf32>
    %c1_167 = arith.constant 1 : index
    %c0_168 = arith.constant 0 : index
    %c0_169 = arith.constant 0 : index
    %330 = vector.load %arg5[%c1_167, %c0_168, %c0_169] : memref<2x32x32xbf16, #tpu.memory_space<vmem>>, vector<1x32x32xbf16>
    %331 = vector.shape_cast %330 : vector<1x32x32xbf16> to vector<32x32xbf16>
    %332 = vector.extract_strided_slice %321 {offsets = [0, 0], sizes = [16, 8], strides = [1, 1]} : vector<16x32xf32> to vector<16x8xf32>
    %333 = vector.shape_cast %332 : vector<16x8xf32> to vector<2x8x8xf32>
    %334 = arith.truncf %333 : vector<2x8x8xf32> to vector<2x8x8xbf16>
    %335 = vector.extract_strided_slice %324 {offsets = [0, 0], sizes = [16, 8], strides = [1, 1]} : vector<16x32xf32> to vector<16x8xf32>
    %336 = vector.shape_cast %335 : vector<16x8xf32> to vector<2x8x8xf32>
    %337 = arith.truncf %336 : vector<2x8x8xf32> to vector<2x8x8xbf16>
    %338 = vector.extract_strided_slice %329 {offsets = [0, 0], sizes = [16, 8], strides = [1, 1]} : vector<16x32xf32> to vector<16x8xf32>
    %339 = vector.shape_cast %338 : vector<16x8xf32> to vector<2x8x8xf32>
    %340 = arith.truncf %339 : vector<2x8x8xf32> to vector<2x8x8xbf16>
    "tpu.trace_start"() <{level = 10 : i32, message = "bqd,bkd->bqk"}> : () -> ()
    %cst_170 = arith.constant dense<0.000000e+00> : vector<2x8x8xf32>
    %341 = tpu.matmul %334, %337, %cst_170 {dimension_numbers = #tpu.dot_dimension_numbers<[2], [2], [1], [1], [0, 0, 0, 1, 1, 1], [0], [0]>} : vector<2x8x8xbf16>, vector<2x8x8xbf16>, vector<2x8x8xf32> -> vector<2x8x8xf32>
    "tpu.trace_stop"() : () -> ()
    %cst_171 = arith.constant dense<0xFF800000> : vector<2x8xf32>
    %342 = vector.multi_reduction <maximumf>, %341, %cst_171 [2] : vector<2x8x8xf32> to vector<2x8xf32>
    %343 = vector.shape_cast %342 : vector<2x8xf32> to vector<2x8x1xf32>
    %344 = vector.broadcast %343 : vector<2x8x1xf32> to vector<2x8x8xf32>
    %345 = arith.subf %341, %344 : vector<2x8x8xf32>
    %346 = math.exp %345 : vector<2x8x8xf32>
    %cst_172 = arith.constant dense<0.000000e+00> : vector<2x8xf32>
    %347 = vector.multi_reduction <add>, %346, %cst_172 [2] : vector<2x8x8xf32> to vector<2x8xf32>
    %348 = vector.shape_cast %347 : vector<2x8xf32> to vector<2x8x1xf32>
    %349 = tpu.reciprocal %348 {approx = true} : vector<2x8x1xf32> -> vector<2x8x1xf32>
    %350 = vector.broadcast %349 : vector<2x8x1xf32> to vector<2x8x8xf32>
    %351 = arith.mulf %346, %350 : vector<2x8x8xf32>
    %352 = arith.truncf %351 : vector<2x8x8xf32> to vector<2x8x8xbf16>
    "tpu.trace_start"() <{level = 10 : i32, message = "bqk,bkd->bqd"}> : () -> ()
    %cst_173 = arith.constant dense<0.000000e+00> : vector<2x8x8xf32>
    %353 = tpu.matmul %352, %340, %cst_173 {dimension_numbers = #tpu.dot_dimension_numbers<[2], [1], [1], [2], [0, 0, 0, 1, 1, 2], [0], [0]>} : vector<2x8x8xbf16>, vector<2x8x8xbf16>, vector<2x8x8xf32> -> vector<2x8x8xf32>
    "tpu.trace_stop"() : () -> ()
    %354 = vector.shape_cast %353 : vector<2x8x8xf32> to vector<16x8xf32>
    %355 = vector.extract_strided_slice %331 {offsets = [0, 0], sizes = [8, 32], strides = [1, 1]} : vector<32x32xbf16> to vector<8x32xbf16>
    %356 = arith.truncf %354 : vector<16x8xf32> to vector<16x8xbf16>
    %cst_174 = arith.constant dense<0.000000e+00> : vector<16x32xf32>
    %357 = tpu.matmul %356, %355, %cst_174 {dimension_numbers = #tpu.dot_dimension_numbers<[1], [0], [0], [1], [0, 0, 1, 1], [], []>} : vector<16x8xbf16>, vector<8x32xbf16>, vector<16x32xf32> -> vector<16x32xf32>
    %358 = vector.broadcast %291 : vector<1x32xf32> to vector<16x32xf32>
    %359 = arith.addf %358, %357 : vector<16x32xf32>
    %360 = vector.extract_strided_slice %321 {offsets = [0, 8], sizes = [16, 8], strides = [1, 1]} : vector<16x32xf32> to vector<16x8xf32>
    %361 = vector.shape_cast %360 : vector<16x8xf32> to vector<2x8x8xf32>
    %362 = arith.truncf %361 : vector<2x8x8xf32> to vector<2x8x8xbf16>
    %363 = vector.extract_strided_slice %324 {offsets = [0, 8], sizes = [16, 8], strides = [1, 1]} : vector<16x32xf32> to vector<16x8xf32>
    %364 = vector.shape_cast %363 : vector<16x8xf32> to vector<2x8x8xf32>
    %365 = arith.truncf %364 : vector<2x8x8xf32> to vector<2x8x8xbf16>
    %366 = vector.extract_strided_slice %329 {offsets = [0, 8], sizes = [16, 8], strides = [1, 1]} : vector<16x32xf32> to vector<16x8xf32>
    %367 = vector.shape_cast %366 : vector<16x8xf32> to vector<2x8x8xf32>
    %368 = arith.truncf %367 : vector<2x8x8xf32> to vector<2x8x8xbf16>
    "tpu.trace_start"() <{level = 10 : i32, message = "bqd,bkd->bqk"}> : () -> ()
    %cst_175 = arith.constant dense<0.000000e+00> : vector<2x8x8xf32>
    %369 = tpu.matmul %362, %365, %cst_175 {dimension_numbers = #tpu.dot_dimension_numbers<[2], [2], [1], [1], [0, 0, 0, 1, 1, 1], [0], [0]>} : vector<2x8x8xbf16>, vector<2x8x8xbf16>, vector<2x8x8xf32> -> vector<2x8x8xf32>
    "tpu.trace_stop"() : () -> ()
    %cst_176 = arith.constant dense<0xFF800000> : vector<2x8xf32>
    %370 = vector.multi_reduction <maximumf>, %369, %cst_176 [2] : vector<2x8x8xf32> to vector<2x8xf32>
    %371 = vector.shape_cast %370 : vector<2x8xf32> to vector<2x8x1xf32>
    %372 = vector.broadcast %371 : vector<2x8x1xf32> to vector<2x8x8xf32>
    %373 = arith.subf %369, %372 : vector<2x8x8xf32>
    %374 = math.exp %373 : vector<2x8x8xf32>
    %cst_177 = arith.constant dense<0.000000e+00> : vector<2x8xf32>
    %375 = vector.multi_reduction <add>, %374, %cst_177 [2] : vector<2x8x8xf32> to vector<2x8xf32>
    %376 = vector.shape_cast %375 : vector<2x8xf32> to vector<2x8x1xf32>
    %377 = tpu.reciprocal %376 {approx = true} : vector<2x8x1xf32> -> vector<2x8x1xf32>
    %378 = vector.broadcast %377 : vector<2x8x1xf32> to vector<2x8x8xf32>
    %379 = arith.mulf %374, %378 : vector<2x8x8xf32>
    %380 = arith.truncf %379 : vector<2x8x8xf32> to vector<2x8x8xbf16>
    "tpu.trace_start"() <{level = 10 : i32, message = "bqk,bkd->bqd"}> : () -> ()
    %cst_178 = arith.constant dense<0.000000e+00> : vector<2x8x8xf32>
    %381 = tpu.matmul %380, %368, %cst_178 {dimension_numbers = #tpu.dot_dimension_numbers<[2], [1], [1], [2], [0, 0, 0, 1, 1, 2], [0], [0]>} : vector<2x8x8xbf16>, vector<2x8x8xbf16>, vector<2x8x8xf32> -> vector<2x8x8xf32>
    "tpu.trace_stop"() : () -> ()
    %382 = vector.shape_cast %381 : vector<2x8x8xf32> to vector<16x8xf32>
    %383 = vector.extract_strided_slice %331 {offsets = [8, 0], sizes = [8, 32], strides = [1, 1]} : vector<32x32xbf16> to vector<8x32xbf16>
    %384 = arith.truncf %382 : vector<16x8xf32> to vector<16x8xbf16>
    %cst_179 = arith.constant dense<0.000000e+00> : vector<16x32xf32>
    %385 = tpu.matmul %384, %383, %cst_179 {dimension_numbers = #tpu.dot_dimension_numbers<[1], [0], [0], [1], [0, 0, 1, 1], [], []>} : vector<16x8xbf16>, vector<8x32xbf16>, vector<16x32xf32> -> vector<16x32xf32>
    %386 = arith.addf %359, %385 : vector<16x32xf32>
    %387 = vector.extract_strided_slice %321 {offsets = [0, 16], sizes = [16, 8], strides = [1, 1]} : vector<16x32xf32> to vector<16x8xf32>
    %388 = vector.shape_cast %387 : vector<16x8xf32> to vector<2x8x8xf32>
    %389 = arith.truncf %388 : vector<2x8x8xf32> to vector<2x8x8xbf16>
    %390 = vector.extract_strided_slice %324 {offsets = [0, 16], sizes = [16, 8], strides = [1, 1]} : vector<16x32xf32> to vector<16x8xf32>
    %391 = vector.shape_cast %390 : vector<16x8xf32> to vector<2x8x8xf32>
    %392 = arith.truncf %391 : vector<2x8x8xf32> to vector<2x8x8xbf16>
    %393 = vector.extract_strided_slice %329 {offsets = [0, 16], sizes = [16, 8], strides = [1, 1]} : vector<16x32xf32> to vector<16x8xf32>
    %394 = vector.shape_cast %393 : vector<16x8xf32> to vector<2x8x8xf32>
    %395 = arith.truncf %394 : vector<2x8x8xf32> to vector<2x8x8xbf16>
    "tpu.trace_start"() <{level = 10 : i32, message = "bqd,bkd->bqk"}> : () -> ()
    %cst_180 = arith.constant dense<0.000000e+00> : vector<2x8x8xf32>
    %396 = tpu.matmul %389, %392, %cst_180 {dimension_numbers = #tpu.dot_dimension_numbers<[2], [2], [1], [1], [0, 0, 0, 1, 1, 1], [0], [0]>} : vector<2x8x8xbf16>, vector<2x8x8xbf16>, vector<2x8x8xf32> -> vector<2x8x8xf32>
    "tpu.trace_stop"() : () -> ()
    %cst_181 = arith.constant dense<0xFF800000> : vector<2x8xf32>
    %397 = vector.multi_reduction <maximumf>, %396, %cst_181 [2] : vector<2x8x8xf32> to vector<2x8xf32>
    %398 = vector.shape_cast %397 : vector<2x8xf32> to vector<2x8x1xf32>
    %399 = vector.broadcast %398 : vector<2x8x1xf32> to vector<2x8x8xf32>
    %400 = arith.subf %396, %399 : vector<2x8x8xf32>
    %401 = math.exp %400 : vector<2x8x8xf32>
    %cst_182 = arith.constant dense<0.000000e+00> : vector<2x8xf32>
    %402 = vector.multi_reduction <add>, %401, %cst_182 [2] : vector<2x8x8xf32> to vector<2x8xf32>
    %403 = vector.shape_cast %402 : vector<2x8xf32> to vector<2x8x1xf32>
    %404 = tpu.reciprocal %403 {approx = true} : vector<2x8x1xf32> -> vector<2x8x1xf32>
    %405 = vector.broadcast %404 : vector<2x8x1xf32> to vector<2x8x8xf32>
    %406 = arith.mulf %401, %405 : vector<2x8x8xf32>
    %407 = arith.truncf %406 : vector<2x8x8xf32> to vector<2x8x8xbf16>
    "tpu.trace_start"() <{level = 10 : i32, message = "bqk,bkd->bqd"}> : () -> ()
    %cst_183 = arith.constant dense<0.000000e+00> : vector<2x8x8xf32>
    %408 = tpu.matmul %407, %395, %cst_183 {dimension_numbers = #tpu.dot_dimension_numbers<[2], [1], [1], [2], [0, 0, 0, 1, 1, 2], [0], [0]>} : vector<2x8x8xbf16>, vector<2x8x8xbf16>, vector<2x8x8xf32> -> vector<2x8x8xf32>
    "tpu.trace_stop"() : () -> ()
    %409 = vector.shape_cast %408 : vector<2x8x8xf32> to vector<16x8xf32>
    %410 = vector.extract_strided_slice %331 {offsets = [16, 0], sizes = [8, 32], strides = [1, 1]} : vector<32x32xbf16> to vector<8x32xbf16>
    %411 = arith.truncf %409 : vector<16x8xf32> to vector<16x8xbf16>
    %cst_184 = arith.constant dense<0.000000e+00> : vector<16x32xf32>
    %412 = tpu.matmul %411, %410, %cst_184 {dimension_numbers = #tpu.dot_dimension_numbers<[1], [0], [0], [1], [0, 0, 1, 1], [], []>} : vector<16x8xbf16>, vector<8x32xbf16>, vector<16x32xf32> -> vector<16x32xf32>
    %413 = arith.addf %386, %412 : vector<16x32xf32>
    %414 = vector.extract_strided_slice %321 {offsets = [0, 24], sizes = [16, 8], strides = [1, 1]} : vector<16x32xf32> to vector<16x8xf32>
    %415 = vector.shape_cast %414 : vector<16x8xf32> to vector<2x8x8xf32>
    %416 = arith.truncf %415 : vector<2x8x8xf32> to vector<2x8x8xbf16>
    %417 = vector.extract_strided_slice %324 {offsets = [0, 24], sizes = [16, 8], strides = [1, 1]} : vector<16x32xf32> to vector<16x8xf32>
    %418 = vector.shape_cast %417 : vector<16x8xf32> to vector<2x8x8xf32>
    %419 = arith.truncf %418 : vector<2x8x8xf32> to vector<2x8x8xbf16>
    %420 = vector.extract_strided_slice %329 {offsets = [0, 24], sizes = [16, 8], strides = [1, 1]} : vector<16x32xf32> to vector<16x8xf32>
    %421 = vector.shape_cast %420 : vector<16x8xf32> to vector<2x8x8xf32>
    %422 = arith.truncf %421 : vector<2x8x8xf32> to vector<2x8x8xbf16>
    "tpu.trace_start"() <{level = 10 : i32, message = "bqd,bkd->bqk"}> : () -> ()
    %cst_185 = arith.constant dense<0.000000e+00> : vector<2x8x8xf32>
    %423 = tpu.matmul %416, %419, %cst_185 {dimension_numbers = #tpu.dot_dimension_numbers<[2], [2], [1], [1], [0, 0, 0, 1, 1, 1], [0], [0]>} : vector<2x8x8xbf16>, vector<2x8x8xbf16>, vector<2x8x8xf32> -> vector<2x8x8xf32>
    "tpu.trace_stop"() : () -> ()
    %cst_186 = arith.constant dense<0xFF800000> : vector<2x8xf32>
    %424 = vector.multi_reduction <maximumf>, %423, %cst_186 [2] : vector<2x8x8xf32> to vector<2x8xf32>
    %425 = vector.shape_cast %424 : vector<2x8xf32> to vector<2x8x1xf32>
    %426 = vector.broadcast %425 : vector<2x8x1xf32> to vector<2x8x8xf32>
    %427 = arith.subf %423, %426 : vector<2x8x8xf32>
    %428 = math.exp %427 : vector<2x8x8xf32>
    %cst_187 = arith.constant dense<0.000000e+00> : vector<2x8xf32>
    %429 = vector.multi_reduction <add>, %428, %cst_187 [2] : vector<2x8x8xf32> to vector<2x8xf32>
    %430 = vector.shape_cast %429 : vector<2x8xf32> to vector<2x8x1xf32>
    %431 = tpu.reciprocal %430 {approx = true} : vector<2x8x1xf32> -> vector<2x8x1xf32>
    %432 = vector.broadcast %431 : vector<2x8x1xf32> to vector<2x8x8xf32>
    %433 = arith.mulf %428, %432 : vector<2x8x8xf32>
    %434 = arith.truncf %433 : vector<2x8x8xf32> to vector<2x8x8xbf16>
    "tpu.trace_start"() <{level = 10 : i32, message = "bqk,bkd->bqd"}> : () -> ()
    %cst_188 = arith.constant dense<0.000000e+00> : vector<2x8x8xf32>
    %435 = tpu.matmul %434, %422, %cst_188 {dimension_numbers = #tpu.dot_dimension_numbers<[2], [1], [1], [2], [0, 0, 0, 1, 1, 2], [0], [0]>} : vector<2x8x8xbf16>, vector<2x8x8xbf16>, vector<2x8x8xf32> -> vector<2x8x8xf32>
    "tpu.trace_stop"() : () -> ()
    %436 = vector.shape_cast %435 : vector<2x8x8xf32> to vector<16x8xf32>
    %437 = vector.extract_strided_slice %331 {offsets = [24, 0], sizes = [8, 32], strides = [1, 1]} : vector<32x32xbf16> to vector<8x32xbf16>
    %438 = arith.truncf %436 : vector<16x8xf32> to vector<16x8xbf16>
    %cst_189 = arith.constant dense<0.000000e+00> : vector<16x32xf32>
    %439 = tpu.matmul %438, %437, %cst_189 {dimension_numbers = #tpu.dot_dimension_numbers<[1], [0], [0], [1], [0, 0, 1, 1], [], []>} : vector<16x8xbf16>, vector<8x32xbf16>, vector<16x32xf32> -> vector<16x32xf32>
    %440 = arith.addf %413, %439 : vector<16x32xf32>
    %441 = arith.addf %286, %440 : vector<16x32xf32>
    %cst_190 = arith.constant dense<0.000000e+00> : vector<16xf32>
    %442 = vector.multi_reduction <add>, %441, %cst_190 [1] : vector<16x32xf32> to vector<16xf32>
    %443 = vector.shape_cast %442 : vector<16xf32> to vector<16x1xf32>
    %cst_191 = arith.constant 3.200000e+01 : f32
    %444 = vector.broadcast %cst_191 : f32 to vector<16x1xf32>
    %445 = arith.divf %443, %444 : vector<16x1xf32>
    %446 = vector.broadcast %445 : vector<16x1xf32> to vector<16x32xf32>
    %447 = arith.subf %441, %446 : vector<16x32xf32>
    %448 = arith.mulf %447, %447 : vector<16x32xf32>
    %cst_192 = arith.constant dense<0.000000e+00> : vector<16xf32>
    %449 = vector.multi_reduction <add>, %448, %cst_192 [1] : vector<16x32xf32> to vector<16xf32>
    %450 = vector.shape_cast %449 : vector<16xf32> to vector<16x1xf32>
    %cst_193 = arith.constant 3.200000e+01 : f32
    %451 = vector.broadcast %cst_193 : f32 to vector<16x1xf32>
    %452 = arith.divf %450, %451 : vector<16x1xf32>
    %cst_194 = arith.constant 9.99999974E-6 : f32
    %453 = vector.broadcast %cst_194 : f32 to vector<16x1xf32>
    %454 = arith.addf %452, %453 : vector<16x1xf32>
    %455 = math.rsqrt %454 : vector<16x1xf32>
    %456 = vector.broadcast %455 : vector<16x1xf32> to vector<16x32xf32>
    %457 = arith.mulf %447, %456 : vector<16x32xf32>
    %458 = vector.broadcast %292 : vector<1x32xf32> to vector<16x32xf32>
    %459 = arith.mulf %457, %458 : vector<16x32xf32>
    %460 = vector.broadcast %293 : vector<1x32xf32> to vector<16x32xf32>
    %461 = arith.addf %459, %460 : vector<16x32xf32>
    %462 = arith.truncf %461 : vector<16x32xf32> to vector<16x32xbf16>
    %c1_195 = arith.constant 1 : index
    %c0_196 = arith.constant 0 : index
    %c0_197 = arith.constant 0 : index
    %463 = vector.load %arg6[%c1_195, %c0_196, %c0_197] : memref<2x32x64xbf16, #tpu.memory_space<vmem>>, vector<1x32x64xbf16>
    %464 = vector.shape_cast %463 : vector<1x32x64xbf16> to vector<32x64xbf16>
    %cst_198 = arith.constant dense<0.000000e+00> : vector<16x64xf32>
    %465 = tpu.matmul %462, %464, %cst_198 {dimension_numbers = #tpu.dot_dimension_numbers<[1], [0], [0], [1], [0, 0, 1, 1], [], []>} : vector<16x32xbf16>, vector<32x64xbf16>, vector<16x64xf32> -> vector<16x64xf32>
    %466 = vector.broadcast %294 : vector<1x64xf32> to vector<16x64xf32>
    %467 = arith.addf %465, %466 : vector<16x64xf32>
    %cst_199 = arith.constant 5.000000e-01 : f32
    %468 = vector.broadcast %cst_199 : f32 to vector<16x64xf32>
    %469 = arith.mulf %468, %467 : vector<16x64xf32>
    %cst_200 = arith.constant 4.471500e-02 : f32
    %470 = vector.broadcast %cst_200 : f32 to vector<16x64xf32>
    %471 = arith.mulf %470, %467 : vector<16x64xf32>
    %472 = arith.mulf %471, %467 : vector<16x64xf32>
    %473 = arith.mulf %472, %467 : vector<16x64xf32>
    %474 = arith.addf %467, %473 : vector<16x64xf32>
    %cst_201 = arith.constant 0.797884583 : f32
    %475 = vector.broadcast %cst_201 : f32 to vector<16x64xf32>
    %476 = arith.mulf %475, %474 : vector<16x64xf32>
    %477 = math.tanh %476 : vector<16x64xf32>
    %cst_202 = arith.constant 1.000000e+00 : f32
    %478 = vector.broadcast %cst_202 : f32 to vector<16x64xf32>
    %479 = arith.addf %478, %477 : vector<16x64xf32>
    %480 = arith.mulf %469, %479 : vector<16x64xf32>
    %c1_203 = arith.constant 1 : index
    %c0_204 = arith.constant 0 : index
    %c0_205 = arith.constant 0 : index
    %481 = vector.load %arg7[%c1_203, %c0_204, %c0_205] : memref<2x64x32xbf16, #tpu.memory_space<vmem>>, vector<1x64x32xbf16>
    %482 = vector.shape_cast %481 : vector<1x64x32xbf16> to vector<64x32xbf16>
    %483 = arith.truncf %480 : vector<16x64xf32> to vector<16x64xbf16>
    %cst_206 = arith.constant dense<0.000000e+00> : vector<16x32xf32>
    %484 = tpu.matmul %483, %482, %cst_206 {dimension_numbers = #tpu.dot_dimension_numbers<[1], [0], [0], [1], [0, 0, 1, 1], [], []>} : vector<16x64xbf16>, vector<64x32xbf16>, vector<16x32xf32> -> vector<16x32xf32>
    %485 = arith.addf %441, %484 : vector<16x32xf32>
    %486 = vector.broadcast %295 : vector<1x32xf32> to vector<16x32xf32>
    %487 = arith.addf %485, %486 : vector<16x32xf32>
    %c28 = arith.constant 28 : index
    %c0_207 = arith.constant 0 : index
    %488 = vector.load %arg9[%c28, %c0_207] : memref<32x128xf32, #tpu.memory_space<vmem>>, vector<1x32xf32>
    %c29 = arith.constant 29 : index
    %c0_208 = arith.constant 0 : index
    %489 = vector.load %arg9[%c29, %c0_208] : memref<32x128xf32, #tpu.memory_space<vmem>>, vector<1x32xf32>
    %cst_209 = arith.constant dense<0.000000e+00> : vector<16xf32>
    %490 = vector.multi_reduction <add>, %487, %cst_209 [1] : vector<16x32xf32> to vector<16xf32>
    %491 = vector.shape_cast %490 : vector<16xf32> to vector<16x1xf32>
    %cst_210 = arith.constant 3.200000e+01 : f32
    %492 = vector.broadcast %cst_210 : f32 to vector<16x1xf32>
    %493 = arith.divf %491, %492 : vector<16x1xf32>
    %494 = vector.broadcast %493 : vector<16x1xf32> to vector<16x32xf32>
    %495 = arith.subf %487, %494 : vector<16x32xf32>
    %496 = arith.mulf %495, %495 : vector<16x32xf32>
    %cst_211 = arith.constant dense<0.000000e+00> : vector<16xf32>
    %497 = vector.multi_reduction <add>, %496, %cst_211 [1] : vector<16x32xf32> to vector<16xf32>
    %498 = vector.shape_cast %497 : vector<16xf32> to vector<16x1xf32>
    %cst_212 = arith.constant 3.200000e+01 : f32
    %499 = vector.broadcast %cst_212 : f32 to vector<16x1xf32>
    %500 = arith.divf %498, %499 : vector<16x1xf32>
    %cst_213 = arith.constant 9.99999974E-6 : f32
    %501 = vector.broadcast %cst_213 : f32 to vector<16x1xf32>
    %502 = arith.addf %500, %501 : vector<16x1xf32>
    %503 = math.rsqrt %502 : vector<16x1xf32>
    %504 = vector.broadcast %503 : vector<16x1xf32> to vector<16x32xf32>
    %505 = arith.mulf %495, %504 : vector<16x32xf32>
    %506 = vector.broadcast %488 : vector<1x32xf32> to vector<16x32xf32>
    %507 = arith.mulf %505, %506 : vector<16x32xf32>
    %508 = vector.broadcast %489 : vector<1x32xf32> to vector<16x32xf32>
    %509 = arith.addf %507, %508 : vector<16x32xf32>
    %510 = vector.extract_strided_slice %509 {offsets = [0, 0], sizes = [8, 32], strides = [1, 1]} : vector<16x32xf32> to vector<8x32xf32>
    %cst_214 = arith.constant dense<0.000000e+00> : vector<32xf32>
    %511 = vector.multi_reduction <add>, %510, %cst_214 [0] : vector<8x32xf32> to vector<32xf32>
    %512 = vector.shape_cast %511 : vector<32xf32> to vector<1x32xf32>
    %cst_215 = arith.constant 8.000000e+00 : f32
    %513 = vector.broadcast %cst_215 : f32 to vector<1x32xf32>
    %514 = arith.divf %512, %513 : vector<1x32xf32>
    %515 = vector.extract_strided_slice %509 {offsets = [8, 0], sizes = [8, 32], strides = [1, 1]} : vector<16x32xf32> to vector<8x32xf32>
    %cst_216 = arith.constant dense<0.000000e+00> : vector<32xf32>
    %516 = vector.multi_reduction <add>, %515, %cst_216 [0] : vector<8x32xf32> to vector<32xf32>
    %517 = vector.shape_cast %516 : vector<32xf32> to vector<1x32xf32>
    %cst_217 = arith.constant 8.000000e+00 : f32
    %518 = vector.broadcast %cst_217 : f32 to vector<1x32xf32>
    %519 = arith.divf %517, %518 : vector<1x32xf32>
    %520 = tpu.concatenate %514, %519 in 0 : vector<1x32xf32>, vector<1x32xf32> -> vector<2x32xf32>
    %c0_218 = arith.constant 0 : index
    %c0_219 = arith.constant 0 : index
    %521 = vector.load %arg8[%c0_218, %c0_219] : memref<32x16xbf16, #tpu.memory_space<vmem>>, vector<32x16xbf16>
    %522 = arith.truncf %520 : vector<2x32xf32> to vector<2x32xbf16>
    %cst_220 = arith.constant dense<0.000000e+00> : vector<2x16xf32>
    %523 = tpu.matmul %522, %521, %cst_220 {dimension_numbers = #tpu.dot_dimension_numbers<[1], [0], [0], [1], [0, 0, 1, 1], [], []>} : vector<2x32xbf16>, vector<32x16xbf16>, vector<2x16xf32> -> vector<2x16xf32>
    %c30 = arith.constant 30 : index
    %c0_221 = arith.constant 0 : index
    %524 = vector.load %arg9[%c30, %c0_221] : memref<32x128xf32, #tpu.memory_space<vmem>>, vector<1x16xf32>
    %525 = vector.broadcast %524 : vector<1x16xf32> to vector<2x16xf32>
    %526 = arith.addf %523, %525 : vector<2x16xf32>
    %c0_222 = arith.constant 0 : index
    %c0_223 = arith.constant 0 : index
    %527 = vector.load %arg10[%c0_222, %c0_223] : memref<2x16xf32, #tpu.memory_space<vmem>>, vector<2x16xf32>
    tpu.vector_store %arg10[%c0_222, %c0_223], %526 {strides = array<i32>} : memref<2x16xf32, #tpu.memory_space<vmem>>, vector<2x16xf32>,
    return
  }
  func.func @transform_0(%arg0: i32) -> (i32, i32, i32) {
    %c0_i32 = arith.constant 0 : i32
    %c0_i32_0 = arith.constant 0 : i32
    %c0_i32_1 = arith.constant 0 : i32
    return %arg0, %c0_i32, %c0_i32_0 : i32, i32, i32
  }
  func.func @transform_1(%arg0: i32) -> (i32, i32, i32) {
    %c0_i32 = arith.constant 0 : i32
    %c0_i32_0 = arith.constant 0 : i32
    %c0_i32_1 = arith.constant 0 : i32
    %c0_i32_2 = arith.constant 0 : i32
    return %c0_i32, %c0_i32_0, %c0_i32_1 : i32, i32, i32
  }
  func.func @transform_2(%arg0: i32) -> (i32, i32, i32) {
    %c0_i32 = arith.constant 0 : i32
    %c0_i32_0 = arith.constant 0 : i32
    %c0_i32_1 = arith.constant 0 : i32
    %c0_i32_2 = arith.constant 0 : i32
    return %c0_i32, %c0_i32_0, %c0_i32_1 : i32, i32, i32
  }
  func.func @transform_3(%arg0: i32) -> (i32, i32, i32, i32) {
    %c0_i32 = arith.constant 0 : i32
    %c0_i32_0 = arith.constant 0 : i32
    %c0_i32_1 = arith.constant 0 : i32
    %c0_i32_2 = arith.constant 0 : i32
    %c0_i32_3 = arith.constant 0 : i32
    return %c0_i32, %c0_i32_0, %c0_i32_1, %c0_i32_2 : i32, i32, i32, i32
  }
  func.func @transform_4(%arg0: i32) -> (i32, i32, i32) {
    %c0_i32 = arith.constant 0 : i32
    %c0_i32_0 = arith.constant 0 : i32
    %c0_i32_1 = arith.constant 0 : i32
    %c0_i32_2 = arith.constant 0 : i32
    return %c0_i32, %c0_i32_0, %c0_i32_1 : i32, i32, i32
  }
  func.func @transform_5(%arg0: i32) -> (i32, i32, i32) {
    %c0_i32 = arith.constant 0 : i32
    %c0_i32_0 = arith.constant 0 : i32
    %c0_i32_1 = arith.constant 0 : i32
    %c0_i32_2 = arith.constant 0 : i32
    return %c0_i32, %c0_i32_0, %c0_i32_1 : i32, i32, i32
  }
  func.func @transform_6(%arg0: i32) -> (i32, i32, i32) {
    %c0_i32 = arith.constant 0 : i32
    %c0_i32_0 = arith.constant 0 : i32
    %c0_i32_1 = arith.constant 0 : i32
    %c0_i32_2 = arith.constant 0 : i32
    return %c0_i32, %c0_i32_0, %c0_i32_1 : i32, i32, i32
  }
  func.func @transform_7(%arg0: i32) -> (i32, i32) {
    %c0_i32 = arith.constant 0 : i32
    %c0_i32_0 = arith.constant 0 : i32
    %c0_i32_1 = arith.constant 0 : i32
    return %c0_i32, %c0_i32_0 : i32, i32
  }
  func.func @transform_8(%arg0: i32) -> (i32, i32) {
    %c0_i32 = arith.constant 0 : i32
    %c0_i32_0 = arith.constant 0 : i32
    %c0_i32_1 = arith.constant 0 : i32
    return %c0_i32, %c0_i32_0 : i32, i32
  }
  func.func @transform_9(%arg0: i32) -> (i32, i32) {
    %c0_i32 = arith.constant 0 : i32
    %c0_i32_0 = arith.constant 0 : i32
    return %arg0, %c0_i32 : i32, i32
  }
}

</mosaic_0001>

<bundles_post_ra>
// kernel: whisper_encoder_forward.1
= control target key start
LH: loop header
LB: loop body
LE: loop exit
PB: predicated region body
PF: predicated region fallthrough
CT: control target
= control target key end

     0   :  { %vm64_vm0 = vcmask 1043456   ;;  %vm34_vm1 = vcmask 64512   ;;  %vm37_vm2 = vcmask 58368   ;;  %v4608_v2 = vmov 0.0   ;;  %s5429_s0 = inlined_call_operand.vmem [shape: f32[2,16,8], index: 0, kind: input, shape index: {}]   ;;  %s5430_s1 = inlined_call_operand.vmem [shape: bf16[3,8,32], index: 1, kind: input, shape index: {}]   ;;  %s5431_s2 = inlined_call_operand.vmem [shape: bf16[3,32,32], index: 2, kind: input, shape index: {}]   ;;  %s5432_s3 = inlined_call_operand.vmem [shape: bf16[2,3,32,32], index: 3, kind: input, shape index: {}]   ;;  %s5433_s4 = inlined_call_operand.vmem [shape: bf16[2,32,32], index: 4, kind: input, shape index: {}]   ;;  %s5434_s5 = inlined_call_operand.vmem [shape: bf16[2,32,64], index: 5, kind: input, shape index: {}]   ;;  %s5435_s6 = inlined_call_operand.vmem [shape: bf16[2,64,32], index: 6, kind: input, shape index: {}]   ;;  %s5436_s7 = inlined_call_operand.vmem [shape: bf16[32,16], index: 7, kind: input, shape index: {}]   ;;  %s5437_s8 = inlined_call_operand.vmem [shape: f32[32,128], index: 8, kind: input, shape index: {}]   ;;  %s5438_s9 = inlined_call_operand.hbm [shape: f32[2,16], index: 9, kind: output, shape index: {}]  }
   0x1   :  { %v55_v0 = vld [vmem:[%s5430_s1] sm:$0xf]  ;;  %35 = vst.msk [vmem:[#allocation2] sm:$0xff] %vm34_vm1, %v4608_v2  ;;  %36 = vst.msk [vmem:[#allocation2 + $0x8] sm:$0xff] %vm34_vm1, %v4608_v2  ;;  %v43_v4 = vld [vmem:[%s5429_s0 + $0x8] sm:$0xff]  ;;  %4057 = vmatprep.subr.bf16.mxu1 %v4608_v2 }
   0x2   :  { %4439 = vmatprep.subr.msk.bf16.mxu0 %vm64_vm0, %v55_v0  ;;  %v66_v1 = vsel %vm64_vm0, %v55_v0, 0  ;;  %38 = vst.msk [vmem:[#allocation2 + $0x10] sm:$0x3] %vm37_vm2, %v4608_v2  ;;  %41 = vst.msk [vmem:[#allocation2 + $0x28] sm:$0x3] %vm37_vm2, %v4608_v2  ;;  %v42_v3 = vld [vmem:[%s5429_s0] sm:$0xff] }
   0x3   :  { %39 = vst.msk [vmem:[#allocation2 + $0x18] sm:$0xff] %vm34_vm1, %v4608_v2  ;;  %40 = vst.msk [vmem:[#allocation2 + $0x20] sm:$0xff] %vm34_vm1, %v4608_v2  ;;  %v44_v5 = vld [vmem:[%s5429_s0 + $0x10] sm:$0xff]  ;;  %4040 = vmatpush3.bf16.msra.mxu0 %v66_v1  ;;  %v45_v6 = vld [vmem:[%s5429_s0 + $0x18] sm:$0xff] }
   0x4   :  { %46 = vst.msk [vmem:[#allocation2 + $0x1] sm:$0xff] %vm34_vm1, %v42_v3  ;;  %47 = vst.msk [vmem:[#allocation2 + $0x9] sm:$0xff] %vm34_vm1, %v43_v4  ;;  %v3746_v7 = vld [vmem:[%s5430_s1 + $0x4] sm:$0xf]  ;;  %v3749_v8 = vld [vmem:[%s5430_s1 + $0x8] sm:$0xf] }
   0x5   :  { %48 = vst.msk [vmem:[#allocation2 + $0x19] sm:$0xff] %vm34_vm1, %v44_v5  ;;  %49 = vst.msk [vmem:[#allocation2 + $0x21] sm:$0xff] %vm34_vm1, %v45_v6  ;;  %4440 = vmatprep.subr.msk.bf16.mxu0 %vm64_vm0, %v3746_v7  ;;  %v140_v17 = vsel %vm64_vm0, %v3746_v7, 0  ;;  %v210_v19 = vsel %vm64_vm0, %v3749_v8, 0 }
   0xb   :  { %v51_v9 = vld [vmem:[#allocation2] sm:$0xff]  ;;  %v52_v10 = vld [vmem:[#allocation2 + $0x8] sm:$0xff] }
   0xc   :  { %v53_v11 = vld [vmem:[#allocation2 + $0x18] sm:$0xff]  ;;  %v56_v12 = vpack.c.bf16 %v52_v10, %v51_v9  ;;  %v54_v13 = vld [vmem:[#allocation2 + $0x20] sm:$0xff]  ;;  %v126_v15 = vld [vmem:[#allocation2 + $0x9] sm:$0xff] }
   0xd   :  { %v125_v14 = vld [vmem:[#allocation2 + $0x1] sm:$0xff]  ;;  %v57_v16 = vpack.c.bf16 %v54_v13, %v53_v11  ;;  %v127_v20 = vld [vmem:[#allocation2 + $0x19] sm:$0xff]  ;;  %v196_v23 = vld [vmem:[#allocation2 + $0xa] sm:$0xff] }
   0xe   :  { %v131_v18 = vpack.c.bf16 %v126_v15, %v125_v14  ;;  %4041 = vmatprep.mubr.msk.bf16.mxu0 %vm34_vm1, %v56_v12  ;;  %v128_v21 = vld [vmem:[#allocation2 + $0x21] sm:$0xff] }
   0xf   :  { %4042 = vmatmul.mubr.msk.bf16.vlgmr.msra.gmra.mrb[0].mxu0 %vm34_vm1, %v57_v16  ;;  %v195_v22 = vld [vmem:[#allocation2 + $0x2] sm:$0xff]  ;;  %v132_v24 = vpack.c.bf16 %v128_v21, %v127_v20 }
  0x10   :  { %4046 = vmatpush3.bf16.msra.mxu0 %v140_v17  ;;  %4047 = vmatprep.mubr.msk.bf16.mxu0 %vm34_vm1, %v131_v18  ;;  %v201_v25 = vpack.c.bf16 %v196_v23, %v195_v22 }
  0x11   :  { %4441 = vmatprep.subr.msk.bf16.mxu0 %vm64_vm0, %v3749_v8 }
  0x1b   :  { %4048 = vmatmul.mubr.msk.bf16.vlgmr.msra.gmra.mrb[0].mxu0 %vm34_vm1, %v132_v24 }
  0x1c   :  { %4052 = vmatpush3.bf16.msra.mxu0 %v210_v19  ;;  %4053 = vmatprep.mubr.msk.bf16.mxu0 %vm34_vm1, %v201_v25 }
  0x1d   :  { %4081 = vmatprep.subr.bf16.mxu0 %v4608_v2 }
  0x1e   :  { %14 = vsyncpa [#allocation5], 0  ;;  %v197_v26 = vld [vmem:[#allocation2 + $0x1a] sm:$0xff]  ;;  %v198_v27 = vld [vmem:[#allocation2 + $0x22] sm:$0xff]  ;;  %vm301_vm3 = vcmask 261120   ;;  %vm304_vm4 = vcmask 254976  }
  0x1f   :  { %v202_v28 = vpack.c.bf16 %v198_v27, %v197_v26  ;;  %306 = vst.msk [vmem:[#allocation3 + $0x18] sm:$0xff] %vm301_vm3, %v4608_v2  ;;  %307 = vst.msk [vmem:[#allocation3 + $0x20] sm:$0xff] %vm301_vm3, %v4608_v2  ;;  %v4448_v29 = vld [vmem:[%s5431_s2] sm:$0xff]   ;;  %vm4609_vm5 = vmmov 0   ;;  %v4449_v30 = vld [vmem:[%s5431_s2 + $0x8] sm:$0xff]   ;;  %s4610_s14 = smov 120  }
  0x20   :  { %302 = vst.msk [vmem:[#allocation3] sm:$0xff] %vm301_vm3, %v4608_v2  ;;  %303 = vst.msk [vmem:[#allocation3 + $0x8] sm:$0xff] %vm301_vm3, %v4608_v2  ;;  %4061 = vmatprep.mubr.msk.bf16.mxu1 %vm4609_vm5, %v4608_v2  ;;  %4058 = vmatpush3.bf16.msra.mxu1 %v4448_v29  ;;  %v3745_v31 = vld [vmem:[%s5437_s8] ss:$0 sm:$0xff]  ;;  %v4450_v15 = vld [vmem:[%s5431_s2 + $0x10] sm:$0xff]   ;;  %s4611_s16 = smov 112  }
  0x21   :  { %308 = vst.msk [vmem:[#allocation3 + $0x28] sm:$0x3] %vm304_vm4, %v4608_v2  ;;  %305 = vst.msk [vmem:[#allocation3 + $0x10] sm:$0x3] %vm304_vm4, %v4608_v2  ;;  %4059 = vmatprep.subr.bf16.mxu1 %v4608_v2  ;;  %v4451_v17 = vld [vmem:[%s5431_s2 + $0x18] sm:$0xff]   ;;  %v4452_v20 = vld [vmem:[%s5431_s2 + $0x20] sm:$0xff]  }
  0x22   :  { %v4453_v22 = vld [vmem:[%s5431_s2 + $0x28] sm:$0xff]   ;;  %v3755_v26 = vld [vmem:[%s5437_s8 + $0x1] ss:$0 sm:$0xff]  ;;  %s4612_s21 = smov 104   ;;  %vm2018_vm6 = vcmask 523264   ;;  %vm3660_vm7 = vcmask 1040384  }
  0x23   :  { %s4613_s28 = smov [#allocation4]   ;;  %vm3727_vm8 = vcmask 123904  }
  0x24   :  { %4060 = vmatpush3.bf16.msra.mxu1 %v4449_v30  ;;  %s3735_s29 = sshll.u32 %s4613_s28, 4  ;;  %s3736_s29 = int_to_ptr.vmem [resolvable:$true] %s3735_s29 }
  0x25   :  { %4065 = vmatprep.subr.bf16.mxu1 %v4608_v2  ;;  %s4584_s30 = scalar_lea.vmem %s3736_s29, 32  ;;  %p4589_p1 = scmp.lt.s32.totalorder %s3736_s29, %s3736_s29 }
  0x26   :  { %p4585_p0 = scmp.ne.s32.totalorder %s3736_s29, %s4584_s30  ;;  %p4590_p2 = scmp.lt.s32.totalorder %s4584_s30, %s4584_s30 }
  0x27   :  { %4054 = vmatmul.mubr.msk.bf16.vlgmr.msra.gmra.mrb[0].mxu0 %vm34_vm1, %v202_v28 }
  0x28   :  { %4085 = vmatprep.mubr.msk.bf16.mxu0 %vm4609_vm5, %v4608_v2  ;;  %p4591_p3 = por %p4590_p2, %p4589_p1 }
  0x2a   :  { %p4592_p4 = pnand %p4591_p3, %p4585_p0 }
  0xfa   :  { %v4055_v32 = vpop.f32.mrb[0].mxu0 }
  0xfb   :  { %v4417_v33 = vadd.f32 %v4055_v32, %v3745_v31  ;;  %v246_v34 = vpop.f32.mrb[1].mxu0 }
  0xfc   :  { %v4418_v35 = vadd.f32 %v3745_v31, %v246_v34  ;;  %v4056_v36 = vpop.f32.mrb[2].mxu0 }
  0xfd   :  { %v271_v37 = vmul.f32 0.044715, %v4417_v33  ;;  %v4419_v38 = vadd.f32 %v4056_v36, %v3745_v31  ;;  %v249_v39 = vpop.f32.mrb[3].mxu0  ;;  %v267_v62 = vmul.f32 0.5, %v4417_v33 }
  0xfe   :  { %v269_v40 = vmul.f32 0.044715, %v4418_v35  ;;  %v4420_v41 = vadd.f32 %v3745_v31, %v249_v39  ;;  %v265_v1 = vmul.f32 0.5, %v4418_v35 }
  0xff   :  { %v275_v42 = vmul.f32 %v4417_v33, %v271_v37  ;;  %v272_v43 = vmul.f32 0.044715, %v4419_v38  ;;  %v268_v6 = vmul.f32 0.5, %v4419_v38 }
 0x100   :  { %v273_v44 = vmul.f32 %v4418_v35, %v269_v40  ;;  %v270_v45 = vmul.f32 0.044715, %v4420_v41  ;;  %v266_v9 = vmul.f32 0.5, %v4420_v41 }
 0x101   :  { %v279_v46 = vmul.f32 %v4417_v33, %v275_v42  ;;  %v276_v47 = vmul.f32 %v4419_v38, %v272_v43 }
 0x102   :  { %v277_v48 = vmul.f32 %v4418_v35, %v273_v44  ;;  %v274_v49 = vmul.f32 %v4420_v41, %v270_v45 }
 0x103   :  { %v283_v50 = vadd.f32 %v4417_v33, %v279_v46  ;;  %v280_v51 = vmul.f32 %v4419_v38, %v276_v47  ;;  %v520_v47 = vld [vmem:[%s5437_s8 + $0x2] sm:$0xff] }
 0x104   :  { %v281_v52 = vadd.f32 %v4418_v35, %v277_v48  ;;  %v278_v53 = vmul.f32 %v4420_v41, %v274_v49 }
 0x105   :  { %v287_v54 = vmul.f32 0.7978846, %v283_v50  ;;  %v284_v55 = vadd.f32 %v4419_v38, %v280_v51 }
 0x106   :  { %v285_v56 = vmul.f32 0.7978846, %v281_v52  ;;  %v282_v57 = vadd.f32 %v4420_v41, %v278_v53 }
 0x107   :  { %4480 = vtanh.f32 %v287_v54  ;;  %v288_v58 = vmul.f32 0.7978846, %v284_v55 }
 0x108   :  { %4482 = vtanh.f32 %v285_v56  ;;  %v286_v59 = vmul.f32 0.7978846, %v282_v57 }
 0x109   :  { %4484 = vtanh.f32 %v288_v58 }
 0x10a   :  { %4486 = vtanh.f32 %v286_v59 }
 0x111   :  { %v4481_v60 = vpop.eup %4480 }
 0x112   :  { %v4483_v61 = vpop.eup %4482  ;;  %v295_v63 = vadd.f32 1.0, %v4481_v60 }
 0x113   :  { %v4485_v0 = vpop.eup %4484  ;;  %v293_v3 = vadd.f32 1.0, %v4483_v61 }
 0x114   :  { %v4487_v4 = vpop.eup %4486  ;;  %v299_v5 = vmul.f32 %v295_v63, %v267_v62  ;;  %v296_v7 = vadd.f32 1.0, %v4485_v0 }
 0x115   :  { %v297_v8 = vmul.f32 %v293_v3, %v265_v1  ;;  %v294_v10 = vadd.f32 1.0, %v4487_v4  ;;  %v4454_v3 = vld [vmem:[%s5432_s3] sm:$0xff]   ;;  %v4455_v4 = vld [vmem:[%s5432_s3 + $0x10] sm:$0xff]  }
 0x116   :  { %311 = vst.msk [vmem:[#allocation3 + $0x19] sm:$0xff] %vm301_vm3, %v299_v5  ;;  %v300_v11 = vmul.f32 %v296_v7, %v268_v6  ;;  %4082 = vmatpush3.bf16.msra.mxu0 %v4454_v3  ;;  %v4456_v5 = vld [vmem:[%s5432_s3 + $0x8] sm:$0xff]   ;;  %v4457_v6 = vld [vmem:[%s5432_s3 + $0x18] sm:$0xff]  }
 0x117   :  { %309 = vst.msk [vmem:[#allocation3 + $0x1] sm:$0xff] %vm301_vm3, %v297_v8  ;;  %v298_v12 = vmul.f32 %v294_v10, %v266_v9  ;;  %4083 = vmatprep.subr.bf16.mxu0 %v4608_v2 }
 0x118   :  { %312 = vst.msk [vmem:[#allocation3 + $0x21] sm:$0xff] %vm301_vm3, %v300_v11 }
 0x119   :  { %310 = vst.msk [vmem:[#allocation3 + $0x9] sm:$0xff] %vm301_vm3, %v298_v12 }
 0x11a   :  { %4084 = vmatpush3.bf16.msra.mxu0 %v4456_v5 }
 0x11b   :  { %4097 = vmatprep.subr.bf16.mxu0 %v4608_v2 }
 0x11f   :  { %v316_v13 = vld [vmem:[#allocation3 + $0x18] ss:$2 sm:$0xff]  ;;  %v387_v19 = vld [vmem:[#allocation3 + $0x19] ss:$2 sm:$0xff] }
 0x120   :  { %v314_v14 = vld [vmem:[#allocation3] ss:$2 sm:$0xff]  ;;  %v385_v18 = vld [vmem:[#allocation3 + $0x1] ss:$2 sm:$0xff] }
 0x121   :  { %v321_v16 = vpack.c.bf16 %v316_v13, %v314_v14  ;;  %v393_v21 = vpack.c.bf16 %v387_v19, %v385_v18  ;;  %v453_v23 = vld [vmem:[#allocation3 + $0x2] ss:$2 sm:$0xff]  ;;  %v3771_v19 = vld [vmem:[%s5437_s8 + $0xb] ss:$0 sm:$0xff] }
 0x122   :  { %v455_v24 = vld [vmem:[#allocation3 + $0x1a] ss:$2 sm:$0xff] }
 0x123   :  { %4062 = vmatmul.mubr.msk.bf16.vlgmr.msra.gmra.mrb[0].mxu1 %vm301_vm3, %v321_v16  ;;  %v461_v25 = vpack.c.bf16 %v455_v24, %v453_v23  ;;  %v4458_v23 = vld [vmem:[%s5432_s3 + $0x20] sm:$0xff]  }
 0x124   :  { %4066 = vmatpush3.bf16.msra.mxu1 %v4450_v15  ;;  %4069 = vmatprep.mubr.msk.bf16.mxu1 %vm4609_vm5, %v4608_v2  ;;  %v3770_v15 = vld [vmem:[%s5437_s8 + $0xa] ss:$0 sm:$0xff] }
 0x125   :  { %4067 = vmatprep.subr.bf16.mxu1 %v4608_v2 }
 0x128   :  { %4068 = vmatpush3.bf16.msra.mxu1 %v4451_v17 }
 0x129   :  { %4073 = vmatprep.subr.bf16.mxu1 %v4608_v2 }
 0x12f   :  { %4070 = vmatmul.mubr.msk.bf16.vlgmr.msra.gmra.mrb[0].mxu1 %vm301_vm3, %v393_v21 }
 0x130   :  { %4074 = vmatpush3.bf16.msra.mxu1 %v4452_v20  ;;  %4077 = vmatprep.mubr.msk.bf16.mxu1 %vm4609_vm5, %v4608_v2 }
 0x131   :  { %4075 = vmatprep.subr.bf16.mxu1 %v4608_v2 }
 0x134   :  { %4076 = vmatpush3.bf16.msra.mxu1 %v4453_v22 }
 0x135   :  { %4089 = vmatprep.subr.bf16.mxu1 %v4608_v2 }
 0x13b   :  { %4078 = vmatmul.mubr.msk.bf16.vlgmr.msra.gmra.mrb[0].mxu1 %vm301_vm3, %v461_v25  ;;  %v4459_v25 = vld [vmem:[%s5432_s3 + $0x28] sm:$0xff]  }
 0x13c   :  { %4093 = vmatprep.mubr.msk.bf16.mxu1 %vm4609_vm5, %v4608_v2  ;;  %4090 = vmatpush3.bf16.msra.mxu1 %v4455_v4 }
 0x13d   :  { %4091 = vmatprep.subr.bf16.mxu1 %v4608_v2 }
 0x140   :  { %4092 = vmatpush3.bf16.msra.mxu1 %v4457_v6 }
 0x141   :  { %4105 = vmatprep.subr.bf16.mxu1 %v4608_v2 }
 0x20e   :  { %v511_v27 = vpop.f32.mrb[0].mxu1 }
 0x20f   :  { %v4421_v28 = vadd.f32 %v3755_v26, %v511_v27  ;;  %v4079_v29 = vpop.f32.mrb[1].mxu1 }
 0x210   :  { %v514_v30 = vpop.f32.mrb[2].mxu1 }
 0x211   :  { %v523_v31 = vmul.f32 0.044715, %v4421_v28  ;;  %v4422_v32 = vadd.f32 %v3755_v26, %v514_v30  ;;  %v4080_v33 = vpop.f32.mrb[3].mxu1  ;;  %v521_v44 = vmul.f32 0.5, %v4421_v28 }
 0x213   :  { %v525_v34 = vmul.f32 %v4421_v28, %v523_v31  ;;  %v524_v35 = vmul.f32 0.044715, %v4422_v32  ;;  %v522_v49 = vmul.f32 0.5, %v4422_v32  ;;  %v3772_v31 = vld [vmem:[%s5437_s8 + $0xc] ss:$0 sm:$0xff] }
 0x215   :  { %v527_v36 = vmul.f32 %v4421_v28, %v525_v34  ;;  %v526_v37 = vmul.f32 %v4422_v32, %v524_v35 }
 0x217   :  { %v528_v38 = vmul.f32 %v4422_v32, %v526_v37  ;;  %v529_v39 = vadd.f32 %v4421_v28, %v527_v36 }
 0x219   :  { %v531_v40 = vmul.f32 0.7978846, %v529_v39  ;;  %v530_v41 = vadd.f32 %v4422_v32, %v528_v38 }
 0x21b   :  { %4488 = vtanh.f32 %v531_v40  ;;  %v532_v42 = vmul.f32 0.7978846, %v530_v41  ;;  %v3787_v40 = vld [vmem:[%s5437_s8 + $0xd] ss:$0 sm:$0xff] }
 0x21d   :  { %4490 = vtanh.f32 %v532_v42 }
 0x225   :  { %v4489_v43 = vpop.eup %4488 }
 0x226   :  { %v535_v45 = vadd.f32 1.0, %v4489_v43 }
 0x227   :  { %v4491_v46 = vpop.eup %4490 }
 0x228   :  { %v537_v48 = vmul.f32 %v535_v45, %v521_v44  ;;  %v536_v50 = vadd.f32 1.0, %v4491_v46 }
 0x22a   :  { %v4773_v51 = vadd.f32 %v537_v48, %v520_v47  ;;  %v538_v52 = vmul.f32 %v536_v50, %v522_v49 }
 0x22c   :  { %v550_v53 = vsel %vm301_vm3, %v4773_v51, 0.0  ;;  %v4777_v54 = vadd.f32 %v538_v52, %v520_v47 }
 0x22d   :  { %551 = vadd.xlane.f32.xlu0 %v550_v53 }
 0x22e   :  { %v553_v55 = vsel %vm301_vm3, %v4777_v54, 0.0 }
 0x231   :  { %554 = vadd.xlane.f32.xlu0 %v553_v55 }
 0x2ba   :  { %v552_v56 = vpop.xlane.xlu0 %551 }
 0x2bb   :  { %v557_v57 = vmul.f32 0.03125, %v552_v56 }
 0x2bd   :  { %v559_v58 = vsub.f32 %v4773_v51, %v557_v57 }
 0x2be   :  { %v555_v59 = vpop.xlane.xlu0 %554 }
 0x2bf   :  { %v558_v60 = vmul.f32 0.03125, %v555_v59  ;;  %v561_v61 = vmul.f32 %v559_v58, %v559_v58 }
 0x2c1   :  { %v560_v62 = vsub.f32 %v4777_v54, %v558_v60  ;;  %v563_v63 = vsel %vm301_vm3, %v561_v61, 0.0 }
 0x2c2   :  { %564 = vadd.xlane.f32.xlu1 %v563_v63 }
 0x2c3   :  { %v562_v0 = vmul.f32 %v560_v62, %v560_v62 }
 0x2c5   :  { %v566_v1 = vsel %vm301_vm3, %v562_v0, 0.0 }
 0x2c6   :  { %567 = vadd.xlane.f32.xlu1 %v566_v1 }
 0x34f   :  { %v565_v7 = vpop.xlane.xlu1 %564 }
 0x350   :  { %v569_v8 = vmul.f32 0.03125, %v565_v7 }
 0x352   :  { %v571_v9 = vadd.f32 1e-05, %v569_v8 }
 0x353   :  { %v568_v10 = vpop.xlane.xlu1 %567 }
 0x354   :  { %4492 = vrsqrt.f32 %v571_v9  ;;  %v570_v11 = vmul.f32 0.03125, %v568_v10 }
 0x356   :  { %v572_v12 = vadd.f32 1e-05, %v570_v11 }
 0x358   :  { %4494 = vrsqrt.f32 %v572_v12 }
 0x35e   :  { %v4493_v13 = vpop.eup %4492 }
 0x35f   :  { %v575_v14 = vmul.f32 %v4493_v13, %v559_v58 }
 0x361   :  { %v581_v17 = vmul.f32 %v3770_v15, %v575_v14 }
 0x362   :  { %v4495_v16 = vpop.eup %4494 }
 0x363   :  { %v576_v18 = vmul.f32 %v4495_v16, %v560_v62  ;;  %v587_v21 = vadd.f32 %v3771_v19, %v581_v17  ;;  %v774_v16 = vld [vmem:[%s5433_s4] sm:$0xf] }
 0x365   :  { %v582_v20 = vmul.f32 %v3770_v15, %v576_v18 }
 0x367   :  { %v588_v22 = vadd.f32 %v3771_v19, %v582_v20 }
 0x369   :  { %v589_v24 = vpack.c.bf16 %v588_v22, %v587_v21  ;;  %v997_v21 = vsel %vm64_vm0, %v774_v16, 0 }
 0x36b   :  { %4086 = vmatmul.mubr.msk.bf16.vlgmr.msra.gmra.mrb[4].mxu0 %vm301_vm3, %v589_v24  ;;  %4094 = vmatmul.mubr.msk.bf16.vlgmr.msra.gmra.mrb[4].mxu1 %vm301_vm3, %v589_v24 }
 0x36c   :  { %4098 = vmatpush3.bf16.msra.mxu0 %v4458_v23  ;;  %4101 = vmatprep.mubr.msk.bf16.mxu0 %vm4609_vm5, %v4608_v2 }
 0x36d   :  { %4099 = vmatprep.subr.bf16.mxu0 %v4608_v2  ;;  %4107 = vmatprep.mubr.msk.bf16.mxu1 %vm4609_vm5, %v4608_v2 }
 0x370   :  { %4100 = vmatpush3.bf16.msra.mxu0 %v4459_v25 }
 0x371   :  { %4111 = vmatprep.subr.bf16.mxu0 %v4608_v2 }
 0x373   :  { %4102 = vmatmul.mubr.msk.bf16.vlgmr.msra.gmra.mrb[8].mxu0 %vm301_vm3, %v589_v24 }
 0x374   :  { %4113 = vmatprep.mubr.msk.bf16.mxu0 %vm4609_vm5, %v4608_v2 }
 0x43e   :  { %v647_v26 = vpop.f32.mrb[4].mxu0  ;;  %v705_v27 = vpop.f32.mrb[4].mxu1 }
 0x43f   :  { %v4824_v28 = vpack.c.bf16 %v705_v27, %v705_v27  ;;  %v4087_v29 = vpop.f32.mrb[5].mxu0  ;;  %v4095_v30 = vpop.f32.mrb[5].mxu1  ;;  %v648_v38 = vadd.f32 %v3772_v31, %v647_v26 }
 0x440   :  { %v650_v32 = vpop.f32.mrb[6].mxu0  ;;  %v708_v33 = vpop.f32.mrb[6].mxu1 }
 0x441   :  { %v4829_v34 = vpack.c.bf16 %v708_v33, %v708_v33  ;;  %v4088_v35 = vpop.f32.mrb[7].mxu0  ;;  %v4096_v36 = vpop.f32.mrb[7].mxu1  ;;  %v788_v37 = vsel %vm34_vm1, %v4824_v28, 0  ;;  %v651_v41 = vadd.f32 %v3772_v31, %v650_v32  ;;  %v4840_v43 = vpack.c.bf16 %v648_v38, %v648_v38 }
 0x442   :  { %4106 = vmatpush3.bf16.xpose.msra.mxu1 %v788_v37 }
 0x443   :  { %v834_v39 = vsel %vm34_vm1, %v4829_v34, 0  ;;  %4117 = vmatprep.subr.bf16.mxu1 %v4608_v2  ;;  %v4842_v47 = vpack.c.bf16 %v651_v41, %v651_v41 }
 0x444   :  { %4112 = vmatpush3.bf16.xpose.msra.mxu0 %v834_v39 }
 0x445   :  { %4123 = vmatprep.subr.bf16.mxu0 %v4608_v2 }
 0x446   :  { %v767_v42 = vpop.f32.mrb[8].mxu0 }
 0x447   :  { %v768_v44 = vadd.f32 %v3787_v40, %v767_v42  ;;  %v4103_v45 = vpop.f32.mrb[9].mxu0 }
 0x448   :  { %v770_v46 = vpop.f32.mrb[10].mxu0 }
 0x449   :  { %v4844_v48 = vpack.c.bf16 %v768_v44, %v768_v44  ;;  %v771_v49 = vadd.f32 %v3787_v40, %v770_v46  ;;  %v4104_v50 = vpop.f32.mrb[11].mxu0  ;;  %4108 = vmatmul.mubr.msk.bf16.vlgmr.msra.gmra.mrb[8].mxu1 %vm34_vm1, %v4840_v43 }
 0x44a   :  { %4119 = vmatprep.mubr.msk.bf16.mxu1 %vm4609_vm5, %v4608_v2 }
 0x44b   :  { %v4850_v52 = vpack.c.bf16 %v771_v49, %v771_v49  ;;  %4114 = vmatmul.mubr.msk.bf16.vlgmr.msra.gmra.mrb[12].mxu0 %vm34_vm1, %v4842_v47  ;;  %v904_v53 = vsel %vm64_vm0, %v4844_v48, 0 }
 0x44c   :  { %4118 = vmatpush3.bf16.msra.mxu1 %v904_v53  ;;  %4125 = vmatprep.mubr.msk.bf16.mxu0 %vm4609_vm5, %v4608_v2 }
 0x44d   :  { %v950_v55 = vsel %vm64_vm0, %v4850_v52, 0  ;;  %4129 = vmatprep.subr.bf16.mxu1 %v4608_v2 }
 0x44e   :  { %4124 = vmatpush3.bf16.msra.mxu0 %v950_v55 }
 0x44f   :  { %4135 = vmatprep.subr.bf16.mxu0 %v4608_v2 }
 0x51c   :  { %v824_v56 = vpop.f32.mrb[8].mxu1 }
 0x51d   :  { %v4109_v57 = vpop.f32.mrb[9].mxu1  ;;  %v876_v58 = vsel %vm34_vm1, %v824_v56, -inf }
 0x51e   :  { %v870_v59 = vpop.f32.mrb[12].mxu0  ;;  %877 = vmax.xlane.f32.xlu0 %v876_v58  ;;  %v827_v60 = vpop.f32.mrb[10].mxu1 }
 0x51f   :  { %v4110_v61 = vpop.f32.mrb[11].mxu1  ;;  %v4115_v62 = vpop.f32.mrb[13].mxu0  ;;  %v879_v63 = vsel %vm34_vm1, %v870_v59, -inf }
 0x520   :  { %880 = vmax.xlane.f32.xlu1 %v879_v63  ;;  %v873_v0 = vpop.f32.mrb[14].mxu0 }
 0x521   :  { %v4116_v1 = vpop.f32.mrb[15].mxu0 }
 0x5ab   :  { %v878_v3 = vpop.xlane.xlu0 %877 }
 0x5ac   :  { %v882_v4 = vsub.f32 %v824_v56, %v878_v3 }
 0x5ad   :  { %v881_v5 = vpop.xlane.xlu1 %880 }
 0x5ae   :  { %v884_v6 = vmul.f32 1.442695, %v882_v4  ;;  %v883_v7 = vsub.f32 %v870_v59, %v881_v5 }
 0x5b0   :  { %4496 = vpow2.f32 %v884_v6  ;;  %v886_v8 = vmul.f32 1.442695, %v883_v7 }
 0x5b2   :  { %4498 = vpow2.f32 %v886_v8 }
 0x5ba   :  { %v4497_v9 = vpop.eup %4496 }
 0x5bb   :  { %v888_v10 = vsel %vm34_vm1, %v4497_v9, 0.0 }
 0x5bc   :  { %v4499_v11 = vpop.eup %4498  ;;  %889 = vadd.xlane.f32.xlu0 %v888_v10 }
 0x5bd   :  { %v891_v12 = vsel %vm34_vm1, %v4499_v11, 0.0 }
 0x5be   :  { %892 = vadd.xlane.f32.xlu1 %v891_v12 }
 0x5cf   :  { %1102 = vrot.lane.b32.xlu1 %v4829_v34, %s4610_s14 }
 0x5d2   :  { %1050 = vrot.lane.b32.xlu0 %v4824_v28, %s4610_s14 }
 0x5d3   :  { %1047 = vrot.lane.b32.xlu1 %v4840_v43, %s4610_s14 }
 0x5d7   :  { %1099 = vrot.lane.b32.xlu1 %v4842_v47, %s4610_s14 }
 0x649   :  { %v890_v13 = vpop.xlane.xlu0 %889 }
 0x64a   :  { %4500 = vrcp.f32 %v890_v13 }
 0x64b   :  { %v893_v14 = vpop.xlane.xlu1 %892 }
 0x64c   :  { %4502 = vrcp.f32 %v893_v14 }
 0x64d   :  { %v1051_v22 = vpop.permute.xlu0 %1050 }
 0x64e   :  { %v1056_v24 = vsel %vm34_vm1, %v1051_v22, 0  ;;  %v775_v22 = vld [vmem:[%s5433_s4 + $0x4] sm:$0xf] }
 0x64f   :  { %v1103_v25 = vpop.permute.xlu1 %1102 }
 0x650   :  { %v1108_v37 = vsel %vm34_vm1, %v1103_v25, 0 }
 0x653   :  { %v1048_v26 = vpop.permute.xlu1 %1047 }
 0x654   :  { %v4501_v15 = vpop.eup %4500 }
 0x655   :  { %v896_v17 = vmul.f32 %v4501_v15, %v4497_v9 }
 0x656   :  { %v4503_v18 = vpop.eup %4502 }
 0x657   :  { %v897_v19 = vmul.f32 %v4503_v18, %v4499_v11  ;;  %v898_v20 = vpack.c.bf16 %v896_v17, %v896_v17  ;;  %v1100_v42 = vpop.permute.xlu1 %1099 }
 0x659   :  { %4120 = vmatmul.mubr.msk.bf16.vlgmr.msra.gmra.mrb[12].mxu1 %vm34_vm1, %v898_v20  ;;  %v899_v23 = vpack.c.bf16 %v897_v19, %v897_v19 }
 0x65a   :  { %4130 = vmatpush3.bf16.msra.mxu1 %v997_v21  ;;  %4131 = vmatprep.mubr.msk.bf16.mxu1 %vm4609_vm5, %v4608_v2 }
 0x65b   :  { %4126 = vmatmul.mubr.msk.bf16.vlgmr.msra.gmra.mrb[16].mxu0 %vm34_vm1, %v899_v23  ;;  %4141 = vmatprep.subr.bf16.mxu1 %v4608_v2  ;;  %v1277_v23 = vsel %vm64_vm0, %v775_v22, 0 }
 0x65c   :  { %4136 = vmatpush3.bf16.xpose.msra.mxu0 %v1056_v24  ;;  %4137 = vmatprep.mubr.msk.bf16.mxu0 %vm4609_vm5, %v4608_v2 }
 0x65d   :  { %4147 = vmatprep.subr.bf16.mxu0 %v4608_v2 }
 0x663   :  { %4138 = vmatmul.mubr.msk.bf16.vlgmr.msra.gmra.mrb[20].mxu0 %vm34_vm1, %v1048_v26 }
 0x664   :  { %4149 = vmatprep.mubr.msk.bf16.mxu0 %vm4609_vm5, %v4608_v2 }
 0x72c   :  { %v940_v27 = vpop.f32.mrb[12].mxu1 }
 0x72d   :  { %v4121_v29 = vpop.f32.mrb[13].mxu1 }
 0x72e   :  { %v943_v30 = vpop.f32.mrb[14].mxu1  ;;  %v986_v31 = vpop.f32.mrb[16].mxu0 }
 0x72f   :  { %v992_v32 = vpack.c.bf16 %v986_v31, %v940_v27  ;;  %v4122_v33 = vpop.f32.mrb[15].mxu1  ;;  %v4127_v35 = vpop.f32.mrb[17].mxu0 }
 0x730   :  { %v989_v36 = vpop.f32.mrb[18].mxu0 }
 0x731   :  { %v4128_v38 = vpop.f32.mrb[19].mxu0  ;;  %4132 = vmatmul.mubr.msk.bf16.vlgmr.msra.gmra.mrb[16].mxu1 %vm34_vm1, %v992_v32 }
 0x732   :  { %4142 = vmatpush3.bf16.xpose.msra.mxu1 %v1108_v37  ;;  %4143 = vmatprep.mubr.msk.bf16.mxu1 %vm4609_vm5, %v4608_v2 }
 0x733   :  { %4153 = vmatprep.subr.bf16.mxu1 %v4608_v2 }
 0x736   :  { %v1092_v39 = vpop.f32.mrb[20].mxu0 }
 0x737   :  { %v4139_v40 = vpop.f32.mrb[21].mxu0  ;;  %v1150_v41 = vsel %vm34_vm1, %v1092_v39, -inf }
 0x738   :  { %1151 = vmax.xlane.f32.xlu0 %v1150_v41  ;;  %v1095_v44 = vpop.f32.mrb[22].mxu0 }
 0x739   :  { %v4140_v45 = vpop.f32.mrb[23].mxu0  ;;  %4144 = vmatmul.mubr.msk.bf16.vlgmr.msra.gmra.mrb[20].mxu1 %vm34_vm1, %v1100_v42 }
 0x73a   :  { %4155 = vmatprep.mubr.msk.bf16.mxu1 %vm4609_vm5, %v4608_v2 }
 0x7c5   :  { %v1152_v46 = vpop.xlane.xlu0 %1151 }
 0x7c6   :  { %v1156_v49 = vsub.f32 %v1092_v39, %v1152_v46 }
 0x7c8   :  { %v1158_v50 = vmul.f32 1.442695, %v1156_v49 }
 0x7ca   :  { %4504 = vpow2.f32 %v1158_v50 }
 0x7d4   :  { %v4505_v53 = vpop.eup %4504 }
 0x7d5   :  { %v1162_v55 = vsel %vm34_vm1, %v4505_v53, 0.0 }
 0x7d6   :  { %1163 = vadd.xlane.f32.xlu0 %v1162_v55 }
 0x804   :  { %v4900_v56 = vpop.f32.mrb[16].mxu1 }
 0x805   :  { %v4133_v57 = vpop.f32.mrb[17].mxu1 }
 0x806   :  { %v4902_v58 = vpop.f32.mrb[18].mxu1 }
 0x807   :  { %v4134_v59 = vpop.f32.mrb[19].mxu1 }
 0x80c   :  { %v1144_v60 = vpop.f32.mrb[20].mxu1 }
 0x80d   :  { %v4145_v61 = vpop.f32.mrb[21].mxu1  ;;  %v1153_v62 = vsel %vm34_vm1, %v1144_v60, -inf }
 0x80e   :  { %1154 = vmax.xlane.f32.xlu1 %v1153_v62  ;;  %v1147_v63 = vpop.f32.mrb[22].mxu1 }
 0x80f   :  { %v4146_v0 = vpop.f32.mrb[23].mxu1 }
 0x81f   :  { %1224 = vrot.lane.b32.xlu1 %v4850_v52, %s4610_s14 }
 0x823   :  { %1324 = vrot.lane.b32.xlu1 %v4824_v28, %s4611_s16 }
 0x827   :  { %1374 = vrot.lane.b32.xlu1 %v4829_v34, %s4611_s16 }
 0x82b   :  { %1372 = vrot.lane.b32.xlu1 %v4842_v47, %s4611_s16 }
 0x863   :  { %v1164_v9 = vpop.xlane.xlu0 %1163 }
 0x89b   :  { %v1155_v1 = vpop.xlane.xlu1 %1154 }
 0x89c   :  { %v1157_v3 = vsub.f32 %v1144_v60, %v1155_v1 }
 0x89e   :  { %v1160_v4 = vmul.f32 1.442695, %v1157_v3 }
 0x89f   :  { %v1225_v5 = vpop.permute.xlu1 %1224 }
 0x8a0   :  { %4506 = vpow2.f32 %v1160_v4  ;;  %v1230_v6 = vsel %vm64_vm0, %v1225_v5, 0 }
 0x8a1   :  { %4154 = vmatpush3.bf16.msra.mxu1 %v1230_v6  ;;  %4508 = vrcp.f32 %v1164_v9 }
 0x8a2   :  { %4165 = vmatprep.subr.bf16.mxu1 %v4608_v2 }
 0x8a3   :  { %v1325_v18 = vpop.permute.xlu1 %1324 }
 0x8a4   :  { %v1330_v20 = vsel %vm34_vm1, %v1325_v18, 0 }
 0x8a7   :  { %v1375_v29 = vpop.permute.xlu1 %1374 }
 0x8a8   :  { %v1380_v35 = vsel %vm34_vm1, %v1375_v29, 0 }
 0x8aa   :  { %v4507_v7 = vpop.eup %4506 }
 0x8ab   :  { %v1165_v8 = vsel %vm34_vm1, %v4507_v7, 0.0  ;;  %v4509_v10 = vpop.eup %4508  ;;  %v1373_v40 = vpop.permute.xlu1 %1372 }
 0x8ac   :  { %1166 = vadd.xlane.f32.xlu0 %v1165_v8  ;;  %v1170_v12 = vmul.f32 %v4509_v10, %v4505_v53  ;;  %v3796_v53 = vld [vmem:[%s5437_s8 + $0xe] ss:$0 sm:$0xff] }
 0x8ad   :  { %v1044_v55 = vadd.f32 %v3796_v53, %v4900_v56  ;;  %v1045_v59 = vadd.f32 %v3796_v53, %v4902_v58 }
 0x8ae   :  { %v1172_v15 = vpack.c.bf16 %v1170_v12, %v1170_v12 }
 0x8c2   :  { %1175 = vrot.lane.b32.xlu0 %v4844_v48, %s4610_s14 }
 0x8c6   :  { %1322 = vrot.lane.b32.xlu0 %v4840_v43, %s4611_s16 }
 0x939   :  { %v1167_v11 = vpop.xlane.xlu0 %1166 }
 0x93a   :  { %4510 = vrcp.f32 %v1167_v11 }
 0x93d   :  { %v1176_v13 = vpop.permute.xlu0 %1175 }
 0x93e   :  { %v1181_v14 = vsel %vm64_vm0, %v1176_v13, 0 }
 0x93f   :  { %4148 = vmatpush3.bf16.msra.mxu0 %v1181_v14 }
 0x940   :  { %4159 = vmatprep.subr.bf16.mxu0 %v4608_v2 }
 0x941   :  { %v1323_v21 = vpop.permute.xlu0 %1322 }
 0x942   :  { %4150 = vmatmul.mubr.msk.bf16.vlgmr.msra.gmra.mrb[24].mxu0 %vm34_vm1, %v1172_v15 }
 0x943   :  { %4161 = vmatprep.mubr.msk.bf16.mxu0 %vm4609_vm5, %v4608_v2  ;;  %4160 = vmatpush3.bf16.msra.mxu0 %v1277_v23 }
 0x944   :  { %v4511_v16 = vpop.eup %4510  ;;  %4171 = vmatprep.subr.bf16.mxu0 %v4608_v2 }
 0x945   :  { %v1171_v17 = vmul.f32 %v4511_v16, %v4507_v7 }
 0x947   :  { %v1173_v19 = vpack.c.bf16 %v1171_v17, %v1171_v17 }
 0x949   :  { %4156 = vmatmul.mubr.msk.bf16.vlgmr.msra.gmra.mrb[24].mxu1 %vm34_vm1, %v1173_v19 }
 0x94a   :  { %4166 = vmatpush3.bf16.xpose.msra.mxu1 %v1330_v20  ;;  %4167 = vmatprep.mubr.msk.bf16.mxu1 %vm4609_vm5, %v4608_v2 }
 0x94b   :  { %4177 = vmatprep.subr.bf16.mxu1 %v4608_v2 }
 0x951   :  { %4168 = vmatmul.mubr.msk.bf16.vlgmr.msra.gmra.mrb[28].mxu1 %vm34_vm1, %v1323_v21  ;;  %v776_v21 = vld [vmem:[%s5433_s4 + $0x8] sm:$0xf] }
 0x952   :  { %4179 = vmatprep.mubr.msk.bf16.mxu1 %vm4609_vm5, %v4608_v2  ;;  %v1547_v22 = vsel %vm64_vm0, %v776_v21, 0 }
 0xa15   :  { %v1217_v24 = vpop.f32.mrb[24].mxu0 }
 0xa16   :  { %v4151_v25 = vpop.f32.mrb[25].mxu0 }
 0xa17   :  { %v1220_v26 = vpop.f32.mrb[26].mxu0 }
 0xa18   :  { %v4152_v27 = vpop.f32.mrb[27].mxu0 }
 0xa1c   :  { %v1266_v30 = vpop.f32.mrb[24].mxu1 }
 0xa1d   :  { %v1272_v31 = vpack.c.bf16 %v1266_v30, %v1217_v24  ;;  %v4157_v32 = vpop.f32.mrb[25].mxu1 }
 0xa1e   :  { %v1269_v33 = vpop.f32.mrb[26].mxu1 }
 0xa1f   :  { %v4158_v36 = vpop.f32.mrb[27].mxu1  ;;  %4162 = vmatmul.mubr.msk.bf16.vlgmr.msra.gmra.mrb[28].mxu0 %vm34_vm1, %v1272_v31 }
 0xa20   :  { %4172 = vmatpush3.bf16.xpose.msra.mxu0 %v1380_v35  ;;  %4173 = vmatprep.mubr.msk.bf16.mxu0 %vm4609_vm5, %v4608_v2 }
 0xa21   :  { %4183 = vmatprep.subr.bf16.mxu0 %v4608_v2 }
 0xa24   :  { %v1366_v37 = vpop.f32.mrb[28].mxu1 }
 0xa25   :  { %v4169_v38 = vpop.f32.mrb[29].mxu1  ;;  %v1422_v39 = vsel %vm34_vm1, %v1366_v37, -inf }
 0xa26   :  { %1423 = vmax.xlane.f32.xlu0 %v1422_v39  ;;  %v1369_v41 = vpop.f32.mrb[30].mxu1 }
 0xa27   :  { %v4170_v42 = vpop.f32.mrb[31].mxu1  ;;  %4174 = vmatmul.mubr.msk.bf16.vlgmr.msra.gmra.mrb[32].mxu0 %vm34_vm1, %v1373_v40 }
 0xa28   :  { %4185 = vmatprep.mubr.msk.bf16.mxu0 %vm4609_vm5, %v4608_v2 }
 0xab3   :  { %v1424_v44 = vpop.xlane.xlu0 %1423 }
 0xab4   :  { %v1428_v45 = vsub.f32 %v1366_v37, %v1424_v44 }
 0xab6   :  { %v1430_v46 = vmul.f32 1.442695, %v1428_v45 }
 0xab8   :  { %4512 = vpow2.f32 %v1430_v46 }
 0xac2   :  { %v4513_v49 = vpop.eup %4512 }
 0xac3   :  { %v1434_v50 = vsel %vm34_vm1, %v4513_v49, 0.0 }
 0xac4   :  { %1435 = vadd.xlane.f32.xlu0 %v1434_v50 }
 0xaf2   :  { %v1313_v57 = vpop.f32.mrb[28].mxu0 }
 0xaf3   :  { %v4953_v60 = vadd.f32 %v1313_v57, %v1044_v55  ;;  %v4163_v61 = vpop.f32.mrb[29].mxu0 }
 0xaf4   :  { %v1316_v62 = vpop.f32.mrb[30].mxu0 }
 0xaf5   :  { %v4955_v63 = vadd.f32 %v1316_v62, %v1045_v59  ;;  %v4164_v0 = vpop.f32.mrb[31].mxu0 }
 0xafa   :  { %v1416_v1 = vpop.f32.mrb[32].mxu0 }
 0xafb   :  { %v4175_v3 = vpop.f32.mrb[33].mxu0  ;;  %v1425_v4 = vsel %vm34_vm1, %v1416_v1, -inf }
 0xafc   :  { %1426 = vmax.xlane.f32.xlu1 %v1425_v4  ;;  %v1419_v5 = vpop.f32.mrb[34].mxu0 }
 0xafd   :  { %v4176_v6 = vpop.f32.mrb[35].mxu0 }
 0xb0d   :  { %1494 = vrot.lane.b32.xlu1 %v4850_v52, %s4611_s16 }
 0xb11   :  { %1594 = vrot.lane.b32.xlu1 %v4824_v28, %s4612_s21 }
 0xb15   :  { %1644 = vrot.lane.b32.xlu1 %v4829_v34, %s4612_s21 }
 0xb19   :  { %1642 = vrot.lane.b32.xlu1 %v4842_v47, %s4612_s21 }
 0xb51   :  { %v1436_v28 = vpop.xlane.xlu0 %1435 }
 0xb89   :  { %v1427_v56 = vpop.xlane.xlu1 %1426 }
 0xb8a   :  { %v1429_v58 = vsub.f32 %v1416_v1, %v1427_v56 }
 0xb8c   :  { %v1432_v7 = vmul.f32 1.442695, %v1429_v58 }
 0xb8d   :  { %v1495_v8 = vpop.permute.xlu1 %1494 }
 0xb8e   :  { %4514 = vpow2.f32 %v1432_v7  ;;  %v1500_v9 = vsel %vm64_vm0, %v1495_v8, 0 }
 0xb8f   :  { %4184 = vmatpush3.bf16.msra.mxu0 %v1500_v9  ;;  %4516 = vrcp.f32 %v1436_v28 }
 0xb90   :  { %4195 = vmatprep.subr.bf16.mxu0 %v4608_v2 }
 0xb91   :  { %v1595_v17 = vpop.permute.xlu1 %1594 }
 0xb92   :  { %v1600_v19 = vsel %vm34_vm1, %v1595_v17, 0 }
 0xb95   :  { %v1645_v27 = vpop.permute.xlu1 %1644 }
 0xb96   :  { %v1650_v33 = vsel %vm34_vm1, %v1645_v27, 0 }
 0xb98   :  { %v4515_v10 = vpop.eup %4514 }
 0xb99   :  { %v1437_v11 = vsel %vm34_vm1, %v4515_v10, 0.0  ;;  %v4517_v34 = vpop.eup %4516  ;;  %v1643_v39 = vpop.permute.xlu1 %1642 }
 0xb9a   :  { %1438 = vadd.xlane.f32.xlu0 %v1437_v11  ;;  %v1442_v12 = vmul.f32 %v4517_v34, %v4513_v49 }
 0xb9c   :  { %v1444_v15 = vpack.c.bf16 %v1442_v12, %v1442_v12 }
 0xbb0   :  { %1446 = vrot.lane.b32.xlu0 %v4844_v48, %s4611_s16 }
 0xbb4   :  { %1592 = vrot.lane.b32.xlu0 %v4840_v43, %s4612_s21 }
 0xc27   :  { %v1439_v47 = vpop.xlane.xlu0 %1438 }
 0xc28   :  { %4518 = vrcp.f32 %v1439_v47 }
 0xc2b   :  { %v1447_v13 = vpop.permute.xlu0 %1446 }
 0xc2c   :  { %v1452_v14 = vsel %vm64_vm0, %v1447_v13, 0  ;;  %v777_v13 = vld [vmem:[%s5433_s4 + $0xc] sm:$0xf] }
 0xc2d   :  { %4178 = vmatpush3.bf16.msra.mxu1 %v1452_v14  ;;  %v1817_v14 = vsel %vm64_vm0, %v777_v13, 0 }
 0xc2e   :  { %4189 = vmatprep.subr.bf16.mxu1 %v4608_v2 }
 0xc2f   :  { %v1593_v20 = vpop.permute.xlu0 %1592 }
 0xc30   :  { %4180 = vmatmul.mubr.msk.bf16.vlgmr.msra.gmra.mrb[32].mxu1 %vm34_vm1, %v1444_v15 }
 0xc31   :  { %4191 = vmatprep.mubr.msk.bf16.mxu1 %vm4609_vm5, %v4608_v2  ;;  %4190 = vmatpush3.bf16.msra.mxu1 %v1547_v22 }
 0xc32   :  { %v4519_v16 = vpop.eup %4518  ;;  %4201 = vmatprep.subr.bf16.mxu1 %v4608_v2 }
 0xc33   :  { %v1443_v43 = vmul.f32 %v4519_v16, %v4515_v10 }
 0xc35   :  { %v1445_v18 = vpack.c.bf16 %v1443_v43, %v1443_v43 }
 0xc37   :  { %4186 = vmatmul.mubr.msk.bf16.vlgmr.msra.gmra.mrb[36].mxu0 %vm34_vm1, %v1445_v18 }
 0xc38   :  { %4196 = vmatpush3.bf16.xpose.msra.mxu0 %v1600_v19  ;;  %4197 = vmatprep.mubr.msk.bf16.mxu0 %vm4609_vm5, %v4608_v2 }
 0xc39   :  { %4207 = vmatprep.subr.bf16.mxu0 %v4608_v2 }
 0xc3f   :  { %4198 = vmatmul.mubr.msk.bf16.vlgmr.msra.gmra.mrb[40].mxu0 %vm34_vm1, %v1593_v20 }
 0xc40   :  { %4209 = vmatprep.mubr.msk.bf16.mxu0 %vm4609_vm5, %v4608_v2 }
 0xd03   :  { %v1488_v23 = vpop.f32.mrb[32].mxu1 }
 0xd04   :  { %v4181_v24 = vpop.f32.mrb[33].mxu1 }
 0xd05   :  { %v1491_v25 = vpop.f32.mrb[34].mxu1 }
 0xd06   :  { %v4182_v26 = vpop.f32.mrb[35].mxu1 }
 0xd0a   :  { %v1536_v29 = vpop.f32.mrb[36].mxu0 }
 0xd0b   :  { %v1542_v30 = vpack.c.bf16 %v1536_v29, %v1488_v23  ;;  %v4187_v31 = vpop.f32.mrb[37].mxu0 }
 0xd0c   :  { %v1539_v32 = vpop.f32.mrb[38].mxu0 }
 0xd0d   :  { %v4188_v35 = vpop.f32.mrb[39].mxu0  ;;  %4192 = vmatmul.mubr.msk.bf16.vlgmr.msra.gmra.mrb[36].mxu1 %vm34_vm1, %v1542_v30 }
 0xd0e   :  { %4202 = vmatpush3.bf16.xpose.msra.mxu1 %v1650_v33  ;;  %4203 = vmatprep.mubr.msk.bf16.mxu1 %vm4609_vm5, %v4608_v2 }
 0xd0f   :  { %4213 = vmatprep.subr.bf16.mxu1 %v4608_v2 }
 0xd12   :  { %v1636_v36 = vpop.f32.mrb[40].mxu0 }
 0xd13   :  { %v4199_v37 = vpop.f32.mrb[41].mxu0  ;;  %v1692_v38 = vsel %vm34_vm1, %v1636_v36, -inf }
 0xd14   :  { %1693 = vmax.xlane.f32.xlu0 %v1692_v38  ;;  %v1639_v40 = vpop.f32.mrb[42].mxu0 }
 0xd15   :  { %v4200_v41 = vpop.f32.mrb[43].mxu0  ;;  %4204 = vmatmul.mubr.msk.bf16.vlgmr.msra.gmra.mrb[40].mxu1 %vm34_vm1, %v1643_v39 }
 0xd16   :  { %4215 = vmatprep.mubr.msk.bf16.mxu1 %vm4609_vm5, %v4608_v2 }
 0xda1   :  { %v1694_v42 = vpop.xlane.xlu0 %1693 }
 0xda2   :  { %v1698_v44 = vsub.f32 %v1636_v36, %v1694_v42 }
 0xda4   :  { %v1700_v45 = vmul.f32 1.442695, %v1698_v44  ;;  %v4460_v44 = vld [vmem:[%s5434_s5] sm:$0xff]  }
 0xda6   :  { %4520 = vpow2.f32 %v1700_v45  ;;  %v4461_v45 = vld [vmem:[%s5434_s5 + $0x8] sm:$0xff]  }
 0xdb0   :  { %v4521_v46 = vpop.eup %4520 }
 0xdb1   :  { %v1704_v49 = vsel %vm34_vm1, %v4521_v46, 0.0 }
 0xdb2   :  { %1705 = vadd.xlane.f32.xlu0 %v1704_v49 }
 0xde0   :  { %v1583_v50 = vpop.f32.mrb[36].mxu1 }
 0xde1   :  { %v1590_v53 = vadd.f32 %v1583_v50, %v4953_v60  ;;  %v4193_v55 = vpop.f32.mrb[37].mxu1 }
 0xde2   :  { %v1586_v57 = vpop.f32.mrb[38].mxu1 }
 0xde3   :  { %v1591_v59 = vadd.f32 %v1586_v57, %v4955_v63  ;;  %v4194_v61 = vpop.f32.mrb[39].mxu1 }
 0xde4   :  { %v3812_v61 = vld [vmem:[%s5437_s8 + $0xf] ss:$0 sm:$0xff] }
 0xde8   :  { %v1686_v62 = vpop.f32.mrb[40].mxu1 }
 0xde9   :  { %v4205_v0 = vpop.f32.mrb[41].mxu1  ;;  %v1695_v1 = vsel %vm34_vm1, %v1686_v62, -inf }
 0xdea   :  { %1696 = vmax.xlane.f32.xlu1 %v1695_v1  ;;  %v1689_v3 = vpop.f32.mrb[42].mxu1 }
 0xdeb   :  { %v4206_v4 = vpop.f32.mrb[43].mxu1 }
 0xdec   :  { %v3813_v4 = vld [vmem:[%s5437_s8 + $0x10] ss:$0 sm:$0xff] }
 0xdfb   :  { %1764 = vrot.lane.b32.xlu1 %v4850_v52, %s4612_s21 }
 0xe3f   :  { %v1706_v8 = vpop.xlane.xlu0 %1705 }
 0xe77   :  { %v1697_v5 = vpop.xlane.xlu1 %1696 }
 0xe78   :  { %v1699_v6 = vsub.f32 %v1686_v62, %v1697_v5 }
 0xe7a   :  { %v1702_v56 = vmul.f32 1.442695, %v1699_v6 }
 0xe7b   :  { %v1765_v58 = vpop.permute.xlu1 %1764 }
 0xe7c   :  { %4522 = vpow2.f32 %v1702_v56  ;;  %v1770_v60 = vsel %vm64_vm0, %v1765_v58, 0 }
 0xe7d   :  { %4214 = vmatpush3.bf16.msra.mxu1 %v1770_v60  ;;  %4524 = vrcp.f32 %v1706_v8  ;;  %v4462_v60 = vld [vmem:[%s5435_s6] sm:$0xff]   ;;  %v4465_v8 = vld [vmem:[%s5435_s6 + $0x18] sm:$0xff]  }
 0xe7e   :  { %4225 = vmatprep.subr.bf16.mxu1 %v4608_v2 }
 0xe86   :  { %v4523_v63 = vpop.eup %4522 }
 0xe87   :  { %v1707_v7 = vsel %vm34_vm1, %v4523_v63, 0.0  ;;  %v4525_v52 = vpop.eup %4524 }
 0xe88   :  { %1708 = vadd.xlane.f32.xlu0 %v1707_v7  ;;  %v1712_v10 = vmul.f32 %v4525_v52, %v4521_v46  ;;  %v4464_v7 = vld [vmem:[%s5435_s6 + $0x10] sm:$0xff]  }
 0xe89   :  { %v3814_v52 = vld [vmem:[%s5437_s8 + $0x11] ss:$0 sm:$0xff] }
 0xe8a   :  { %v1714_v34 = vpack.c.bf16 %v1712_v10, %v1712_v10 }
 0xe9e   :  { %1716 = vrot.lane.b32.xlu0 %v4844_v48, %s4612_s21 }
 0xf15   :  { %v1709_v9 = vpop.xlane.xlu0 %1708 }
 0xf16   :  { %4526 = vrcp.f32 %v1709_v9 }
 0xf19   :  { %v1717_v11 = vpop.permute.xlu0 %1716 }
 0xf1a   :  { %v1722_v28 = vsel %vm64_vm0, %v1717_v11, 0 }
 0xf1b   :  { %4208 = vmatpush3.bf16.msra.mxu0 %v1722_v28 }
 0xf1c   :  { %4219 = vmatprep.subr.bf16.mxu0 %v4608_v2 }
 0xf1e   :  { %4210 = vmatmul.mubr.msk.bf16.vlgmr.msra.gmra.mrb[44].mxu0 %vm34_vm1, %v1714_v34 }
 0xf1f   :  { %4221 = vmatprep.mubr.msk.bf16.mxu0 %vm4609_vm5, %v4608_v2  ;;  %4220 = vmatpush3.bf16.msra.mxu0 %v1817_v14 }
 0xf20   :  { %v4527_v47 = vpop.eup %4526  ;;  %4233 = vmatprep.subr.bf16.mxu0 %v4608_v2 }
 0xf21   :  { %v1713_v48 = vmul.f32 %v4527_v47, %v4523_v63  ;;  %v4463_v63 = vld [vmem:[%s5435_s6 + $0x8] sm:$0xff]  }
 0xf23   :  { %v1715_v12 = vpack.c.bf16 %v1713_v48, %v1713_v48 }
 0xf25   :  { %4216 = vmatmul.mubr.msk.bf16.vlgmr.msra.gmra.mrb[44].mxu1 %vm34_vm1, %v1715_v12 }
 0xf26   :  { %4229 = vmatprep.mubr.msk.bf16.mxu1 %vm4609_vm5, %v4608_v2  ;;  %4226 = vmatpush3.bf16.msra.mxu1 %v4460_v44 }
 0xf27   :  { %4227 = vmatprep.subr.bf16.mxu1 %v4608_v2 }
 0xf2a   :  { %4228 = vmatpush3.bf16.msra.mxu1 %v4461_v45 }
 0xf2b   :  { %4245 = vmatprep.subr.bf16.mxu1 %v4608_v2 }
 0xff1   :  { %v1758_v15 = vpop.f32.mrb[44].mxu0 }
 0xff2   :  { %v4211_v16 = vpop.f32.mrb[45].mxu0 }
 0xff3   :  { %v1761_v43 = vpop.f32.mrb[46].mxu0 }
 0xff4   :  { %v4212_v17 = vpop.f32.mrb[47].mxu0 }
 0xff8   :  { %v1806_v18 = vpop.f32.mrb[44].mxu1 }
 0xff9   :  { %v1812_v19 = vpack.c.bf16 %v1806_v18, %v1758_v15  ;;  %v4217_v20 = vpop.f32.mrb[45].mxu1 }
 0xffa   :  { %v1809_v21 = vpop.f32.mrb[46].mxu1 }
 0xffb   :  { %v4218_v22 = vpop.f32.mrb[47].mxu1  ;;  %4222 = vmatmul.mubr.msk.bf16.vlgmr.msra.gmra.mrb[48].mxu0 %vm34_vm1, %v1812_v19 }
 0xffc   :  { %4241 = vmatprep.mubr.msk.bf16.mxu0 %vm4609_vm5, %v4608_v2  ;;  %4234 = vmatpush3.bf16.msra.mxu0 %v4462_v60 }
 0xffd   :  { %4235 = vmatprep.subr.bf16.mxu0 %v4608_v2 }
0x1000   :  { %4236 = vmatpush3.bf16.msra.mxu0 %v4463_v63 }
0x1001   :  { %4237 = vmatprep.subr.bf16.mxu0 %v4608_v2 }
0x1004   :  { %4238 = vmatpush3.bf16.msra.mxu0 %v4464_v7 }
0x1005   :  { %4239 = vmatprep.subr.bf16.mxu0 %v4608_v2 }
0x1008   :  { %4240 = vmatpush3.bf16.msra.mxu0 %v4465_v8 }
0x1009   :  { %4261 = vmatprep.subr.bf16.mxu0 %v4608_v2 }
0x10ce   :  { %v1853_v23 = vpop.f32.mrb[48].mxu0 }
0x10cf   :  { %v1860_v24 = vadd.f32 %v1853_v23, %v1590_v53  ;;  %v4223_v25 = vpop.f32.mrb[49].mxu0 }
0x10d0   :  { %v1856_v26 = vpop.f32.mrb[50].mxu0 }
0x10d1   :  { %v5028_v27 = vadd.f32 %v1860_v24, %v4773_v51  ;;  %v1861_v29 = vadd.f32 %v1856_v26, %v1591_v59  ;;  %v4224_v30 = vpop.f32.mrb[51].mxu0 }
0x10d3   :  { %v5031_v31 = vadd.f32 %v1861_v29, %v4777_v54  ;;  %v1864_v32 = vsel %vm301_vm3, %v5028_v27, 0.0 }
0x10d4   :  { %1865 = vadd.xlane.f32.xlu1 %v1864_v32  ;;  %v3823_v32 = vld [vmem:[%s5437_s8 + $0x12] ss:$0 sm:$0xff] }
0x10d5   :  { %v1867_v33 = vsel %vm301_vm3, %v5031_v31, 0.0 }
0x10d6   :  { %1868 = vadd.xlane.f32.xlu0 %v1867_v33 }
0x1161   :  { %v1866_v35 = vpop.xlane.xlu1 %1865 }
0x1162   :  { %v1870_v36 = vmul.f32 0.03125, %v1866_v35 }
0x1163   :  { %v1869_v37 = vpop.xlane.xlu0 %1868 }
0x1164   :  { %v1872_v38 = vsub.f32 %v5028_v27, %v1870_v36  ;;  %v1871_v51 = vmul.f32 0.03125, %v1869_v37 }
0x1166   :  { %v1873_v39 = vsub.f32 %v5031_v31, %v1871_v51  ;;  %v1874_v40 = vmul.f32 %v1872_v38, %v1872_v38 }
0x1168   :  { %v1876_v54 = vsel %vm301_vm3, %v1874_v40, 0.0  ;;  %v1875_v41 = vmul.f32 %v1873_v39, %v1873_v39 }
0x1169   :  { %1877 = vadd.xlane.f32.xlu0 %v1876_v54 }
0x116a   :  { %v1879_v42 = vsel %vm301_vm3, %v1875_v41, 0.0 }
0x116b   :  { %1880 = vadd.xlane.f32.xlu1 %v1879_v42 }
0x11f6   :  { %v1878_v46 = vpop.xlane.xlu0 %1877 }
0x11f7   :  { %v1882_v49 = vmul.f32 0.03125, %v1878_v46 }
0x11f8   :  { %v1881_v50 = vpop.xlane.xlu1 %1880 }
0x11f9   :  { %v1884_v53 = vadd.f32 1e-05, %v1882_v49  ;;  %v1883_v55 = vmul.f32 0.03125, %v1881_v50 }
0x11fb   :  { %4528 = vrsqrt.f32 %v1884_v53  ;;  %v1885_v57 = vadd.f32 1e-05, %v1883_v55 }
0x11fd   :  { %4530 = vrsqrt.f32 %v1885_v57  ;;  %v4466_v57 = vld [vmem:[%s5432_s3 + $0x30] sm:$0xff]  }
0x1205   :  { %v4529_v59 = vpop.eup %4528 }
0x1206   :  { %v1888_v62 = vmul.f32 %v4529_v59, %v1872_v38  ;;  %v4467_v59 = vld [vmem:[%s5432_s3 + $0x50] sm:$0xff]  }
0x1207   :  { %v4531_v0 = vpop.eup %4530 }
0x1208   :  { %v1894_v1 = vmul.f32 %v3812_v61, %v1888_v62  ;;  %v1889_v3 = vmul.f32 %v4531_v0, %v1873_v39  ;;  %v4469_v62 = vld [vmem:[%s5432_s3 + $0x58] sm:$0xff]  }
0x120a   :  { %v1895_v5 = vmul.f32 %v3812_v61, %v1889_v3  ;;  %v1900_v6 = vadd.f32 %v3813_v4, %v1894_v1  ;;  %v4468_v61 = vld [vmem:[%s5432_s3 + $0x38] sm:$0xff]  }
0x120c   :  { %v1901_v56 = vadd.f32 %v3813_v4, %v1895_v5 }
0x120e   :  { %v1902_v58 = vpack.c.bf16 %v1901_v56, %v1900_v6 }
0x1210   :  { %4230 = vmatmul.mubr.msk.bf16.vlgmr.msra.gmra.mrb[48].mxu1 %vm301_vm3, %v1902_v58  ;;  %v3824_v58 = vld [vmem:[%s5437_s8 + $0x13] ss:$0 sm:$0xff] }
0x1211   :  { %4249 = vmatprep.mubr.msk.bf16.mxu1 %vm4609_vm5, %v4608_v2  ;;  %4246 = vmatpush3.bf16.msra.mxu1 %v4466_v57 }
0x1212   :  { %4247 = vmatprep.subr.bf16.mxu1 %v4608_v2 }
0x1215   :  { %4248 = vmatpush3.bf16.msra.mxu1 %v4468_v61 }
0x1216   :  { %4253 = vmatprep.subr.bf16.mxu1 %v4608_v2 }
0x12e3   :  { %v1960_v9 = vpop.f32.mrb[48].mxu1 }
0x12e4   :  { %v1961_v10 = vadd.f32 %v3814_v52, %v1960_v9  ;;  %v4231_v11 = vpop.f32.mrb[49].mxu1 }
0x12e5   :  { %v1963_v28 = vpop.f32.mrb[50].mxu1 }
0x12e6   :  { %v1969_v34 = vmul.f32 0.044715, %v1961_v10  ;;  %v1964_v47 = vadd.f32 %v3814_v52, %v1963_v28  ;;  %v4232_v48 = vpop.f32.mrb[51].mxu1  ;;  %v1967_v23 = vmul.f32 0.5, %v1961_v10  ;;  %v3825_v52 = vld [vmem:[%s5437_s8 + $0x14] ss:$0 sm:$0xff] }
0x12e7   :  { %v4470_v28 = vld [vmem:[%s5432_s3 + $0x40] sm:$0xff]  }
0x12e8   :  { %v1971_v12 = vmul.f32 %v1969_v34, %v1961_v10  ;;  %v1970_v13 = vmul.f32 0.044715, %v1964_v47  ;;  %v1968_v24 = vmul.f32 0.5, %v1964_v47 }
0x12ea   :  { %v1973_v14 = vmul.f32 %v1971_v12, %v1961_v10  ;;  %v1972_v15 = vmul.f32 %v1970_v13, %v1964_v47 }
0x12ec   :  { %v1975_v16 = vadd.f32 %v1973_v14, %v1961_v10  ;;  %v1974_v43 = vmul.f32 %v1972_v15, %v1964_v47 }
0x12ee   :  { %v1977_v17 = vmul.f32 0.7978846, %v1975_v16  ;;  %v1976_v18 = vadd.f32 %v1974_v43, %v1964_v47  ;;  %v4471_v47 = vld [vmem:[%s5432_s3 + $0x48] sm:$0xff]  }
0x12f0   :  { %4532 = vtanh.f32 %v1977_v17  ;;  %v1978_v19 = vmul.f32 0.7978846, %v1976_v18  ;;  %v3845_v18 = vld [vmem:[%s5437_s8 + $0x16] ss:$0 sm:$0xff] }
0x12f2   :  { %4534 = vtanh.f32 %v1978_v19 }
0x12fa   :  { %v4533_v20 = vpop.eup %4532 }
0x12fb   :  { %v1981_v21 = vadd.f32 1.0, %v4533_v20 }
0x12fc   :  { %v4535_v22 = vpop.eup %4534 }
0x12fd   :  { %v1982_v25 = vadd.f32 1.0, %v4535_v22  ;;  %v1983_v26 = vmul.f32 %v1981_v21, %v1967_v23  ;;  %v3830_v22 = vld [vmem:[%s5437_s8 + $0x15] ss:$0 sm:$0xff] }
0x12ff   :  { %v1984_v29 = vmul.f32 %v1982_v25, %v1968_v24 }
0x1301   :  { %v1993_v30 = vpack.c.bf16 %v1984_v29, %v1983_v26 }
0x1303   :  { %4242 = vmatmul.mubr.msk.bf16.vlgmr.msra.gmra.mrb[52].mxu0 %vm2018_vm6, %v1993_v30 }
0x1304   :  { %4265 = vmatprep.mubr.msk.bf16.mxu0 %vm4609_vm5, %v4608_v2  ;;  %4262 = vmatpush3.bf16.msra.mxu0 %v4467_v59 }
0x1305   :  { %4263 = vmatprep.subr.bf16.mxu0 %v4608_v2 }
0x1308   :  { %4264 = vmatpush3.bf16.msra.mxu0 %v4469_v62 }
0x1309   :  { %4275 = vmatprep.subr.bf16.mxu0 %v4608_v2 }
0x13d6   :  { %v2056_v33 = vpop.f32.mrb[52].mxu0 }
0x13d7   :  { %v2063_v35 = vadd.f32 %v2056_v33, %v5028_v27  ;;  %v4243_v36 = vpop.f32.mrb[53].mxu0 }
0x13d8   :  { %v2059_v37 = vpop.f32.mrb[54].mxu0 }
0x13d9   :  { %v5084_v38 = vadd.f32 %v3823_v32, %v2063_v35  ;;  %v2064_v51 = vadd.f32 %v2059_v37, %v5031_v31  ;;  %v4244_v39 = vpop.f32.mrb[55].mxu0 }
0x13db   :  { %v5087_v40 = vadd.f32 %v3823_v32, %v2064_v51  ;;  %v2080_v54 = vsel %vm301_vm3, %v5084_v38, 0.0 }
0x13dc   :  { %2081 = vadd.xlane.f32.xlu0 %v2080_v54 }
0x13dd   :  { %v2083_v41 = vsel %vm301_vm3, %v5087_v40, 0.0 }
0x13de   :  { %2084 = vadd.xlane.f32.xlu1 %v2083_v41 }
0x1469   :  { %v2082_v42 = vpop.xlane.xlu0 %2081 }
0x146a   :  { %v2086_v44 = vmul.f32 0.03125, %v2082_v42 }
0x146b   :  { %v2085_v27 = vpop.xlane.xlu1 %2084 }
0x146c   :  { %v2088_v45 = vsub.f32 %v5084_v38, %v2086_v44  ;;  %v2087_v46 = vmul.f32 0.03125, %v2085_v27 }
0x146e   :  { %v2089_v49 = vsub.f32 %v5087_v40, %v2087_v46  ;;  %v2090_v31 = vmul.f32 %v2088_v45, %v2088_v45 }
0x1470   :  { %v2092_v50 = vsel %vm301_vm3, %v2090_v31, 0.0  ;;  %v2091_v53 = vmul.f32 %v2089_v49, %v2089_v49 }
0x1471   :  { %2093 = vadd.xlane.f32.xlu0 %v2092_v50 }
0x1472   :  { %v2095_v55 = vsel %vm301_vm3, %v2091_v53, 0.0 }
0x1473   :  { %2096 = vadd.xlane.f32.xlu1 %v2095_v55 }
0x14fe   :  { %v2094_v0 = vpop.xlane.xlu0 %2093 }
0x14ff   :  { %v2098_v1 = vmul.f32 0.03125, %v2094_v0 }
0x1500   :  { %v2097_v3 = vpop.xlane.xlu1 %2096 }
0x1501   :  { %v2100_v4 = vadd.f32 1e-05, %v2098_v1  ;;  %v2099_v5 = vmul.f32 0.03125, %v2097_v3 }
0x1503   :  { %4536 = vrsqrt.f32 %v2100_v4  ;;  %v2101_v6 = vadd.f32 1e-05, %v2099_v5 }
0x1505   :  { %4538 = vrsqrt.f32 %v2101_v6 }
0x150d   :  { %v4537_v56 = vpop.eup %4536 }
0x150e   :  { %v2104_v60 = vmul.f32 %v4537_v56, %v2088_v45 }
0x150f   :  { %v4539_v63 = vpop.eup %4538 }
0x1510   :  { %v2110_v7 = vmul.f32 %v3824_v58, %v2104_v60  ;;  %v2105_v8 = vmul.f32 %v4539_v63, %v2089_v49  ;;  %v3849_v63 = vld [vmem:[%s5433_s4 + $0x10] sm:$0xf] }
0x1512   :  { %v2111_v9 = vmul.f32 %v3824_v58, %v2105_v8  ;;  %v2116_v10 = vadd.f32 %v3825_v52, %v2110_v7 }
0x1514   :  { %v2117_v11 = vadd.f32 %v3825_v52, %v2111_v9 }
0x1516   :  { %v2118_v34 = vpack.c.bf16 %v2117_v11, %v2116_v10  ;;  %v2528_v10 = vsel %vm64_vm0, %v3849_v63, 0 }
0x1518   :  { %4250 = vmatmul.mubr.msk.bf16.vlgmr.msra.gmra.mrb[52].mxu1 %vm301_vm3, %v2118_v34  ;;  %4266 = vmatmul.mubr.msk.bf16.vlgmr.msra.gmra.mrb[56].mxu0 %vm301_vm3, %v2118_v34 }
0x1519   :  { %4254 = vmatpush3.bf16.msra.mxu1 %v4470_v28  ;;  %4257 = vmatprep.mubr.msk.bf16.mxu1 %vm4609_vm5, %v4608_v2 }
0x151a   :  { %4255 = vmatprep.subr.bf16.mxu1 %v4608_v2  ;;  %4277 = vmatprep.mubr.msk.bf16.mxu0 %vm4609_vm5, %v4608_v2 }
0x151d   :  { %4256 = vmatpush3.bf16.msra.mxu1 %v4471_v47 }
0x151e   :  { %4269 = vmatprep.subr.bf16.mxu1 %v4608_v2 }
0x1520   :  { %4258 = vmatmul.mubr.msk.bf16.vlgmr.msra.gmra.mrb[56].mxu1 %vm301_vm3, %v2118_v34 }
0x1521   :  { %4271 = vmatprep.mubr.msk.bf16.mxu1 %vm4609_vm5, %v4608_v2 }
0x15eb   :  { %v2177_v48 = vpop.f32.mrb[52].mxu1  ;;  %v2297_v12 = vpop.f32.mrb[56].mxu0 }
0x15ec   :  { %v4251_v13 = vpop.f32.mrb[53].mxu1  ;;  %v4267_v14 = vpop.f32.mrb[57].mxu0  ;;  %v2298_v24 = vadd.f32 %v3845_v18, %v2297_v12  ;;  %v2178_v30 = vadd.f32 %v3830_v22, %v2177_v48 }
0x15ed   :  { %v2180_v15 = vpop.f32.mrb[54].mxu1  ;;  %v2300_v16 = vpop.f32.mrb[58].mxu0 }
0x15ee   :  { %v4252_v43 = vpop.f32.mrb[55].mxu1  ;;  %v4268_v17 = vpop.f32.mrb[59].mxu0  ;;  %v2301_v32 = vadd.f32 %v3845_v18, %v2300_v16  ;;  %v5151_v35 = vpack.c.bf16 %v2298_v24, %v2298_v24  ;;  %v2181_v36 = vadd.f32 %v3830_v22, %v2180_v15  ;;  %v5154_v37 = vpack.c.bf16 %v2178_v30, %v2178_v30 }
0x15f0   :  { %v5156_v51 = vpack.c.bf16 %v2301_v32, %v2301_v32  ;;  %v5158_v39 = vpack.c.bf16 %v2181_v36, %v2181_v36  ;;  %v2435_v54 = vsel %vm64_vm0, %v5151_v35, 0 }
0x15f2   :  { %v2481_v41 = vsel %vm64_vm0, %v5156_v51, 0 }
0x15f3   :  { %v2235_v19 = vpop.f32.mrb[56].mxu1 }
0x15f4   :  { %v5139_v20 = vpack.c.bf16 %v2235_v19, %v2235_v19  ;;  %v4259_v21 = vpop.f32.mrb[57].mxu1 }
0x15f5   :  { %v2238_v23 = vpop.f32.mrb[58].mxu1 }
0x15f6   :  { %v5144_v25 = vpack.c.bf16 %v2238_v23, %v2238_v23  ;;  %v4260_v26 = vpop.f32.mrb[59].mxu1  ;;  %v2319_v29 = vsel %vm34_vm1, %v5139_v20, 0 }
0x15f7   :  { %4270 = vmatpush3.bf16.xpose.msra.mxu1 %v2319_v29 }
0x15f8   :  { %v2365_v33 = vsel %vm34_vm1, %v5144_v25, 0  ;;  %4281 = vmatprep.subr.bf16.mxu1 %v4608_v2 }
0x15f9   :  { %4276 = vmatpush3.bf16.xpose.msra.mxu0 %v2365_v33 }
0x15fa   :  { %4287 = vmatprep.subr.bf16.mxu0 %v4608_v2 }
0x15fe   :  { %4272 = vmatmul.mubr.msk.bf16.vlgmr.msra.gmra.mrb[60].mxu1 %vm34_vm1, %v5154_v37 }
0x15ff   :  { %4282 = vmatpush3.bf16.msra.mxu1 %v2435_v54  ;;  %4283 = vmatprep.mubr.msk.bf16.mxu1 %vm4609_vm5, %v4608_v2 }
0x1600   :  { %4278 = vmatmul.mubr.msk.bf16.vlgmr.msra.gmra.mrb[60].mxu0 %vm34_vm1, %v5158_v39  ;;  %4293 = vmatprep.subr.bf16.mxu1 %v4608_v2 }
0x1601   :  { %4288 = vmatpush3.bf16.msra.mxu0 %v2481_v41  ;;  %4289 = vmatprep.mubr.msk.bf16.mxu0 %vm4609_vm5, %v4608_v2 }
0x1602   :  { %4299 = vmatprep.subr.bf16.mxu0 %v4608_v2 }
0x16d1   :  { %v2355_v42 = vpop.f32.mrb[60].mxu1 }
0x16d2   :  { %v4273_v44 = vpop.f32.mrb[61].mxu1  ;;  %v2407_v27 = vsel %vm34_vm1, %v2355_v42, -inf }
0x16d3   :  { %v2401_v45 = vpop.f32.mrb[60].mxu0  ;;  %2408 = vmax.xlane.f32.xlu0 %v2407_v27  ;;  %v2358_v46 = vpop.f32.mrb[62].mxu1 }
0x16d4   :  { %v4274_v49 = vpop.f32.mrb[63].mxu1  ;;  %v4279_v31 = vpop.f32.mrb[61].mxu0  ;;  %v2410_v50 = vsel %vm34_vm1, %v2401_v45, -inf }
0x16d5   :  { %2411 = vmax.xlane.f32.xlu1 %v2410_v50  ;;  %v2404_v53 = vpop.f32.mrb[62].mxu0 }
0x16d6   :  { %v4280_v55 = vpop.f32.mrb[63].mxu0 }
0x1760   :  { %v2409_v57 = vpop.xlane.xlu0 %2408 }
0x1761   :  { %v2413_v59 = vsub.f32 %v2355_v42, %v2409_v57 }
0x1762   :  { %v2412_v61 = vpop.xlane.xlu1 %2411 }
0x1763   :  { %v2415_v62 = vmul.f32 1.442695, %v2413_v59  ;;  %v2414_v0 = vsub.f32 %v2401_v45, %v2412_v61 }
0x1765   :  { %4540 = vpow2.f32 %v2415_v62  ;;  %v2417_v1 = vmul.f32 1.442695, %v2414_v0 }
0x1767   :  { %4542 = vpow2.f32 %v2417_v1 }
0x176f   :  { %v4541_v3 = vpop.eup %4540 }
0x1770   :  { %v2419_v4 = vsel %vm34_vm1, %v4541_v3, 0.0 }
0x1771   :  { %v4543_v5 = vpop.eup %4542  ;;  %2420 = vadd.xlane.f32.xlu0 %v2419_v4 }
0x1772   :  { %v2422_v6 = vsel %vm34_vm1, %v4543_v5, 0.0 }
0x1773   :  { %2423 = vadd.xlane.f32.xlu1 %v2422_v6 }
0x1784   :  { %2633 = vrot.lane.b32.xlu1 %v5144_v25, %s4610_s14 }
0x1787   :  { %2581 = vrot.lane.b32.xlu0 %v5139_v20, %s4610_s14 }
0x1788   :  { %2578 = vrot.lane.b32.xlu1 %v5154_v37, %s4610_s14 }
0x178c   :  { %2630 = vrot.lane.b32.xlu1 %v5158_v39, %s4610_s14 }
0x17fe   :  { %v2421_v56 = vpop.xlane.xlu0 %2420 }
0x17ff   :  { %4544 = vrcp.f32 %v2421_v56 }
0x1800   :  { %v2424_v58 = vpop.xlane.xlu1 %2423 }
0x1801   :  { %4546 = vrcp.f32 %v2424_v58 }
0x1802   :  { %v2582_v11 = vpop.permute.xlu0 %2581 }
0x1803   :  { %v2587_v34 = vsel %vm34_vm1, %v2582_v11, 0  ;;  %v3850_v11 = vld [vmem:[%s5433_s4 + $0x14] sm:$0xf] }
0x1804   :  { %v2634_v47 = vpop.permute.xlu1 %2633 }
0x1805   :  { %v2639_v19 = vsel %vm34_vm1, %v2634_v47, 0 }
0x1808   :  { %v2579_v48 = vpop.permute.xlu1 %2578 }
0x1809   :  { %v4545_v60 = vpop.eup %4544 }
0x180a   :  { %v2427_v7 = vmul.f32 %v4545_v60, %v4541_v3 }
0x180b   :  { %v4547_v8 = vpop.eup %4546 }
0x180c   :  { %v2428_v52 = vmul.f32 %v4547_v8, %v4543_v5  ;;  %v2429_v9 = vpack.c.bf16 %v2427_v7, %v2427_v7  ;;  %v2631_v26 = vpop.permute.xlu1 %2630 }
0x180e   :  { %4284 = vmatmul.mubr.msk.bf16.vlgmr.msra.gmra.mrb[64].mxu1 %vm34_vm1, %v2429_v9  ;;  %v2430_v28 = vpack.c.bf16 %v2428_v52, %v2428_v52 }
0x180f   :  { %4294 = vmatpush3.bf16.msra.mxu1 %v2528_v10  ;;  %4295 = vmatprep.mubr.msk.bf16.mxu1 %vm4609_vm5, %v4608_v2 }
0x1810   :  { %4290 = vmatmul.mubr.msk.bf16.vlgmr.msra.gmra.mrb[64].mxu0 %vm34_vm1, %v2430_v28  ;;  %4305 = vmatprep.subr.bf16.mxu1 %v4608_v2  ;;  %v2808_v28 = vsel %vm64_vm0, %v3850_v11, 0 }
0x1811   :  { %4300 = vmatpush3.bf16.xpose.msra.mxu0 %v2587_v34  ;;  %4301 = vmatprep.mubr.msk.bf16.mxu0 %vm4609_vm5, %v4608_v2 }
0x1812   :  { %4311 = vmatprep.subr.bf16.mxu0 %v4608_v2 }
0x1818   :  { %4302 = vmatmul.mubr.msk.bf16.vlgmr.msra.gmra.mrb[68].mxu0 %vm34_vm1, %v2579_v48 }
0x1819   :  { %4313 = vmatprep.mubr.msk.bf16.mxu0 %vm4609_vm5, %v4608_v2 }
0x18e1   :  { %v2471_v12 = vpop.f32.mrb[64].mxu1 }
0x18e2   :  { %v4285_v13 = vpop.f32.mrb[65].mxu1 }
0x18e3   :  { %v2474_v14 = vpop.f32.mrb[66].mxu1  ;;  %v2517_v15 = vpop.f32.mrb[64].mxu0 }
0x18e4   :  { %v2523_v16 = vpack.c.bf16 %v2517_v15, %v2471_v12  ;;  %v4286_v43 = vpop.f32.mrb[67].mxu1  ;;  %v4291_v17 = vpop.f32.mrb[65].mxu0 }
0x18e5   :  { %v2520_v18 = vpop.f32.mrb[66].mxu0 }
0x18e6   :  { %v4292_v21 = vpop.f32.mrb[67].mxu0  ;;  %4296 = vmatmul.mubr.msk.bf16.vlgmr.msra.gmra.mrb[68].mxu1 %vm34_vm1, %v2523_v16 }
0x18e7   :  { %4306 = vmatpush3.bf16.xpose.msra.mxu1 %v2639_v19  ;;  %4307 = vmatprep.mubr.msk.bf16.mxu1 %vm4609_vm5, %v4608_v2 }
0x18e8   :  { %4317 = vmatprep.subr.bf16.mxu1 %v4608_v2 }
0x18eb   :  { %v2623_v22 = vpop.f32.mrb[68].mxu0 }
0x18ec   :  { %v4303_v23 = vpop.f32.mrb[69].mxu0  ;;  %v2681_v24 = vsel %vm34_vm1, %v2623_v22, -inf }
0x18ed   :  { %2682 = vmax.xlane.f32.xlu0 %v2681_v24  ;;  %v2626_v29 = vpop.f32.mrb[70].mxu0 }
0x18ee   :  { %v4304_v30 = vpop.f32.mrb[71].mxu0  ;;  %4308 = vmatmul.mubr.msk.bf16.vlgmr.msra.gmra.mrb[72].mxu1 %vm34_vm1, %v2631_v26 }
0x18ef   :  { %4319 = vmatprep.mubr.msk.bf16.mxu1 %vm4609_vm5, %v4608_v2 }
0x197a   :  { %v2683_v32 = vpop.xlane.xlu0 %2682 }
0x197b   :  { %v2687_v33 = vsub.f32 %v2623_v22, %v2683_v32 }
0x197d   :  { %v2689_v36 = vmul.f32 1.442695, %v2687_v33 }
0x197f   :  { %4548 = vpow2.f32 %v2689_v36 }
0x1989   :  { %v4549_v54 = vpop.eup %4548 }
0x198a   :  { %v2693_v41 = vsel %vm34_vm1, %v4549_v54, 0.0 }
0x198b   :  { %2694 = vadd.xlane.f32.xlu0 %v2693_v41 }
0x19b9   :  { %v5212_v42 = vpop.f32.mrb[68].mxu1 }
0x19ba   :  { %v4297_v44 = vpop.f32.mrb[69].mxu1 }
0x19bb   :  { %v5214_v27 = vpop.f32.mrb[70].mxu1 }
0x19bc   :  { %v4298_v45 = vpop.f32.mrb[71].mxu1 }
0x19c1   :  { %v2675_v46 = vpop.f32.mrb[72].mxu1 }
0x19c2   :  { %v4309_v49 = vpop.f32.mrb[73].mxu1  ;;  %v2684_v31 = vsel %vm34_vm1, %v2675_v46, -inf }
0x19c3   :  { %2685 = vmax.xlane.f32.xlu1 %v2684_v31  ;;  %v2678_v50 = vpop.f32.mrb[74].mxu1 }
0x19c4   :  { %v4310_v53 = vpop.f32.mrb[75].mxu1 }
0x19d4   :  { %2755 = vrot.lane.b32.xlu1 %v5156_v51, %s4610_s14 }
0x19d8   :  { %2855 = vrot.lane.b32.xlu1 %v5139_v20, %s4611_s16 }
0x19dc   :  { %2905 = vrot.lane.b32.xlu1 %v5144_v25, %s4611_s16 }
0x19e0   :  { %2903 = vrot.lane.b32.xlu1 %v5158_v39, %s4611_s16 }
0x1a18   :  { %v2695_v3 = vpop.xlane.xlu0 %2694 }
0x1a50   :  { %v2686_v55 = vpop.xlane.xlu1 %2685 }
0x1a51   :  { %v2688_v57 = vsub.f32 %v2675_v46, %v2686_v55 }
0x1a53   :  { %v2691_v59 = vmul.f32 1.442695, %v2688_v57 }
0x1a54   :  { %v2756_v61 = vpop.permute.xlu1 %2755 }
0x1a55   :  { %4550 = vpow2.f32 %v2691_v59  ;;  %v2761_v62 = vsel %vm64_vm0, %v2756_v61, 0 }
0x1a56   :  { %4318 = vmatpush3.bf16.msra.mxu1 %v2761_v62  ;;  %4552 = vrcp.f32 %v2695_v3 }
0x1a57   :  { %4329 = vmatprep.subr.bf16.mxu1 %v4608_v2 }
0x1a58   :  { %v2856_v8 = vpop.permute.xlu1 %2855 }
0x1a59   :  { %v2861_v9 = vsel %vm34_vm1, %v2856_v8, 0 }
0x1a5c   :  { %v2906_v13 = vpop.permute.xlu1 %2905 }
0x1a5d   :  { %v2911_v17 = vsel %vm34_vm1, %v2906_v13, 0 }
0x1a5f   :  { %v4551_v0 = vpop.eup %4550 }
0x1a60   :  { %v2696_v1 = vsel %vm34_vm1, %v4551_v0, 0.0  ;;  %v4553_v4 = vpop.eup %4552  ;;  %v2904_v23 = vpop.permute.xlu1 %2903 }
0x1a61   :  { %2697 = vadd.xlane.f32.xlu0 %v2696_v1  ;;  %v2701_v6 = vmul.f32 %v4553_v4, %v4549_v54  ;;  %v3858_v54 = vld [vmem:[%s5437_s8 + $0x17] ss:$0 sm:$0xff] }
0x1a62   :  { %v2575_v41 = vadd.f32 %v3858_v54, %v5212_v42  ;;  %v2576_v45 = vadd.f32 %v3858_v54, %v5214_v27 }
0x1a63   :  { %v2703_v60 = vpack.c.bf16 %v2701_v6, %v2701_v6 }
0x1a77   :  { %2706 = vrot.lane.b32.xlu0 %v5151_v35, %s4610_s14 }
0x1a7b   :  { %2853 = vrot.lane.b32.xlu0 %v5154_v37, %s4611_s16 }
0x1aee   :  { %v2698_v5 = vpop.xlane.xlu0 %2697 }
0x1aef   :  { %4554 = vrcp.f32 %v2698_v5 }
0x1af2   :  { %v2707_v56 = vpop.permute.xlu0 %2706 }
0x1af3   :  { %v2712_v58 = vsel %vm64_vm0, %v2707_v56, 0 }
0x1af4   :  { %4312 = vmatpush3.bf16.msra.mxu0 %v2712_v58 }
0x1af5   :  { %4323 = vmatprep.subr.bf16.mxu0 %v4608_v2 }
0x1af6   :  { %v2854_v10 = vpop.permute.xlu0 %2853 }
0x1af7   :  { %4314 = vmatmul.mubr.msk.bf16.vlgmr.msra.gmra.mrb[72].mxu0 %vm34_vm1, %v2703_v60 }
0x1af8   :  { %4325 = vmatprep.mubr.msk.bf16.mxu0 %vm4609_vm5, %v4608_v2  ;;  %4324 = vmatpush3.bf16.msra.mxu0 %v2808_v28 }
0x1af9   :  { %v4555_v63 = vpop.eup %4554  ;;  %4335 = vmatprep.subr.bf16.mxu0 %v4608_v2 }
0x1afa   :  { %v2702_v7 = vmul.f32 %v4555_v63, %v4551_v0 }
0x1afc   :  { %v2704_v52 = vpack.c.bf16 %v2702_v7, %v2702_v7 }
0x1afe   :  { %4320 = vmatmul.mubr.msk.bf16.vlgmr.msra.gmra.mrb[76].mxu1 %vm34_vm1, %v2704_v52 }
0x1aff   :  { %4330 = vmatpush3.bf16.xpose.msra.mxu1 %v2861_v9  ;;  %4331 = vmatprep.mubr.msk.bf16.mxu1 %vm4609_vm5, %v4608_v2 }
0x1b00   :  { %4341 = vmatprep.subr.bf16.mxu1 %v4608_v2 }
0x1b06   :  { %4332 = vmatmul.mubr.msk.bf16.vlgmr.msra.gmra.mrb[80].mxu1 %vm34_vm1, %v2854_v10  ;;  %v3851_v10 = vld [vmem:[%s5433_s4 + $0x18] sm:$0xf] }
0x1b07   :  { %4343 = vmatprep.mubr.msk.bf16.mxu1 %vm4609_vm5, %v4608_v2  ;;  %v3078_v11 = vsel %vm64_vm0, %v3851_v10, 0 }
0x1bca   :  { %v2748_v34 = vpop.f32.mrb[72].mxu0 }
0x1bcb   :  { %v4315_v47 = vpop.f32.mrb[73].mxu0 }
0x1bcc   :  { %v2751_v48 = vpop.f32.mrb[74].mxu0 }
0x1bcd   :  { %v4316_v12 = vpop.f32.mrb[75].mxu0 }
0x1bd1   :  { %v2797_v14 = vpop.f32.mrb[76].mxu1 }
0x1bd2   :  { %v2803_v15 = vpack.c.bf16 %v2797_v14, %v2748_v34  ;;  %v4321_v16 = vpop.f32.mrb[77].mxu1 }
0x1bd3   :  { %v2800_v43 = vpop.f32.mrb[78].mxu1 }
0x1bd4   :  { %v4322_v18 = vpop.f32.mrb[79].mxu1  ;;  %4326 = vmatmul.mubr.msk.bf16.vlgmr.msra.gmra.mrb[76].mxu0 %vm34_vm1, %v2803_v15 }
0x1bd5   :  { %4336 = vmatpush3.bf16.xpose.msra.mxu0 %v2911_v17  ;;  %4337 = vmatprep.mubr.msk.bf16.mxu0 %vm4609_vm5, %v4608_v2 }
0x1bd6   :  { %4347 = vmatprep.subr.bf16.mxu0 %v4608_v2 }
0x1bd9   :  { %v2897_v19 = vpop.f32.mrb[80].mxu1 }
0x1bda   :  { %v4333_v21 = vpop.f32.mrb[81].mxu1  ;;  %v2953_v22 = vsel %vm34_vm1, %v2897_v19, -inf }
0x1bdb   :  { %2954 = vmax.xlane.f32.xlu0 %v2953_v22  ;;  %v2900_v24 = vpop.f32.mrb[82].mxu1 }
0x1bdc   :  { %v4334_v26 = vpop.f32.mrb[83].mxu1  ;;  %4338 = vmatmul.mubr.msk.bf16.vlgmr.msra.gmra.mrb[80].mxu0 %vm34_vm1, %v2904_v23 }
0x1bdd   :  { %4349 = vmatprep.mubr.msk.bf16.mxu0 %vm4609_vm5, %v4608_v2 }
0x1c68   :  { %v2955_v29 = vpop.xlane.xlu0 %2954 }
0x1c69   :  { %v2959_v30 = vsub.f32 %v2897_v19, %v2955_v29 }
0x1c6b   :  { %v2961_v32 = vmul.f32 1.442695, %v2959_v30 }
0x1c6d   :  { %4556 = vpow2.f32 %v2961_v32 }
0x1c77   :  { %v4557_v33 = vpop.eup %4556 }
0x1c78   :  { %v2965_v36 = vsel %vm34_vm1, %v4557_v33, 0.0 }
0x1c79   :  { %2966 = vadd.xlane.f32.xlu0 %v2965_v36 }
0x1ca7   :  { %v2844_v44 = vpop.f32.mrb[76].mxu0 }
0x1ca8   :  { %v5265_v46 = vadd.f32 %v2844_v44, %v2575_v41  ;;  %v4327_v49 = vpop.f32.mrb[77].mxu0 }
0x1ca9   :  { %v2847_v31 = vpop.f32.mrb[78].mxu0 }
0x1caa   :  { %v5267_v50 = vadd.f32 %v2847_v31, %v2576_v45  ;;  %v4328_v53 = vpop.f32.mrb[79].mxu0 }
0x1caf   :  { %v2947_v55 = vpop.f32.mrb[80].mxu0 }
0x1cb0   :  { %v4339_v57 = vpop.f32.mrb[81].mxu0  ;;  %v2956_v59 = vsel %vm34_vm1, %v2947_v55, -inf }
0x1cb1   :  { %2957 = vmax.xlane.f32.xlu1 %v2956_v59  ;;  %v2950_v61 = vpop.f32.mrb[82].mxu0 }
0x1cb2   :  { %v4340_v62 = vpop.f32.mrb[83].mxu0 }
0x1cc2   :  { %3025 = vrot.lane.b32.xlu1 %v5156_v51, %s4611_s16 }
0x1cc6   :  { %3125 = vrot.lane.b32.xlu1 %v5139_v20, %s4612_s21 }
0x1cca   :  { %3175 = vrot.lane.b32.xlu1 %v5144_v25, %s4612_s21 }
0x1cce   :  { %3173 = vrot.lane.b32.xlu1 %v5158_v39, %s4612_s21 }
0x1d06   :  { %v2967_v20 = vpop.xlane.xlu0 %2966 }
0x1d3e   :  { %v2958_v42 = vpop.xlane.xlu1 %2957 }
0x1d3f   :  { %v2960_v27 = vsub.f32 %v2947_v55, %v2958_v42 }
0x1d41   :  { %v2963_v0 = vmul.f32 1.442695, %v2960_v27 }
0x1d42   :  { %v3026_v1 = vpop.permute.xlu1 %3025 }
0x1d43   :  { %4558 = vpow2.f32 %v2963_v0  ;;  %v3031_v3 = vsel %vm64_vm0, %v3026_v1, 0 }
0x1d44   :  { %4348 = vmatpush3.bf16.msra.mxu0 %v3031_v3  ;;  %4560 = vrcp.f32 %v2967_v20 }
0x1d45   :  { %4359 = vmatprep.subr.bf16.mxu0 %v4608_v2 }
0x1d46   :  { %v3126_v7 = vpop.permute.xlu1 %3125 }
0x1d47   :  { %v3131_v52 = vsel %vm34_vm1, %v3126_v7, 0 }
0x1d4a   :  { %v3176_v12 = vpop.permute.xlu1 %3175 }
0x1d4b   :  { %v3181_v43 = vsel %vm34_vm1, %v3176_v12, 0 }
0x1d4d   :  { %v4559_v4 = vpop.eup %4558 }
0x1d4e   :  { %v2968_v5 = vsel %vm34_vm1, %v4559_v4, 0.0  ;;  %v4561_v25 = vpop.eup %4560  ;;  %v3174_v22 = vpop.permute.xlu1 %3173 }
0x1d4f   :  { %2969 = vadd.xlane.f32.xlu0 %v2968_v5  ;;  %v2973_v6 = vmul.f32 %v4561_v25, %v4557_v33 }
0x1d51   :  { %v2975_v60 = vpack.c.bf16 %v2973_v6, %v2973_v6 }
0x1d65   :  { %2977 = vrot.lane.b32.xlu0 %v5151_v35, %s4611_s16 }
0x1d69   :  { %3123 = vrot.lane.b32.xlu0 %v5154_v37, %s4612_s21 }
0x1ddc   :  { %v2970_v39 = vpop.xlane.xlu0 %2969 }
0x1ddd   :  { %4562 = vrcp.f32 %v2970_v39 }
0x1de0   :  { %v2978_v56 = vpop.permute.xlu0 %2977 }
0x1de1   :  { %v2983_v58 = vsel %vm64_vm0, %v2978_v56, 0  ;;  %v3852_v56 = vld [vmem:[%s5433_s4 + $0x1c] sm:$0xf] }
0x1de2   :  { %4342 = vmatpush3.bf16.msra.mxu1 %v2983_v58  ;;  %v3348_v58 = vsel %vm64_vm0, %v3852_v56, 0 }
0x1de3   :  { %4353 = vmatprep.subr.bf16.mxu1 %v4608_v2 }
0x1de4   :  { %v3124_v9 = vpop.permute.xlu0 %3123 }
0x1de5   :  { %4344 = vmatmul.mubr.msk.bf16.vlgmr.msra.gmra.mrb[84].mxu1 %vm34_vm1, %v2975_v60 }
0x1de6   :  { %4355 = vmatprep.mubr.msk.bf16.mxu1 %vm4609_vm5, %v4608_v2  ;;  %4354 = vmatpush3.bf16.msra.mxu1 %v3078_v11 }
0x1de7   :  { %v4563_v63 = vpop.eup %4562  ;;  %4365 = vmatprep.subr.bf16.mxu1 %v4608_v2 }
0x1de8   :  { %v2974_v37 = vmul.f32 %v4563_v63, %v4559_v4 }
0x1dea   :  { %v2976_v8 = vpack.c.bf16 %v2974_v37, %v2974_v37 }
0x1dec   :  { %4350 = vmatmul.mubr.msk.bf16.vlgmr.msra.gmra.mrb[84].mxu0 %vm34_vm1, %v2976_v8 }
0x1ded   :  { %4360 = vmatpush3.bf16.xpose.msra.mxu0 %v3131_v52  ;;  %4361 = vmatprep.mubr.msk.bf16.mxu0 %vm4609_vm5, %v4608_v2 }
0x1dee   :  { %4371 = vmatprep.subr.bf16.mxu0 %v4608_v2 }
0x1df4   :  { %4362 = vmatmul.mubr.msk.bf16.vlgmr.msra.gmra.mrb[88].mxu0 %vm34_vm1, %v3124_v9 }
0x1df5   :  { %4373 = vmatprep.mubr.msk.bf16.mxu0 %vm4609_vm5, %v4608_v2 }
0x1eb8   :  { %v3019_v28 = vpop.f32.mrb[84].mxu1 }
0x1eb9   :  { %v4345_v34 = vpop.f32.mrb[85].mxu1 }
0x1eba   :  { %v3022_v47 = vpop.f32.mrb[86].mxu1 }
0x1ebb   :  { %v4346_v48 = vpop.f32.mrb[87].mxu1 }
0x1ebf   :  { %v3067_v13 = vpop.f32.mrb[84].mxu0 }
0x1ec0   :  { %v3073_v14 = vpack.c.bf16 %v3067_v13, %v3019_v28  ;;  %v4351_v15 = vpop.f32.mrb[85].mxu0 }
0x1ec1   :  { %v3070_v16 = vpop.f32.mrb[86].mxu0 }
0x1ec2   :  { %v4352_v17 = vpop.f32.mrb[87].mxu0  ;;  %4356 = vmatmul.mubr.msk.bf16.vlgmr.msra.gmra.mrb[88].mxu1 %vm34_vm1, %v3073_v14 }
0x1ec3   :  { %4366 = vmatpush3.bf16.xpose.msra.mxu1 %v3181_v43  ;;  %4367 = vmatprep.mubr.msk.bf16.mxu1 %vm4609_vm5, %v4608_v2 }
0x1ec4   :  { %4377 = vmatprep.subr.bf16.mxu1 %v4608_v2 }
0x1ec7   :  { %v3167_v18 = vpop.f32.mrb[88].mxu0 }
0x1ec8   :  { %v4363_v19 = vpop.f32.mrb[89].mxu0  ;;  %v3223_v21 = vsel %vm34_vm1, %v3167_v18, -inf }
0x1ec9   :  { %3224 = vmax.xlane.f32.xlu0 %v3223_v21  ;;  %v3170_v23 = vpop.f32.mrb[90].mxu0 }
0x1eca   :  { %v4364_v24 = vpop.f32.mrb[91].mxu0  ;;  %4368 = vmatmul.mubr.msk.bf16.vlgmr.msra.gmra.mrb[92].mxu1 %vm34_vm1, %v3174_v22 }
0x1ecb   :  { %4379 = vmatprep.mubr.msk.bf16.mxu1 %vm4609_vm5, %v4608_v2 }
0x1f56   :  { %v3225_v26 = vpop.xlane.xlu0 %3224 }
0x1f57   :  { %v3229_v29 = vsub.f32 %v3167_v18, %v3225_v26 }
0x1f59   :  { %v3231_v30 = vmul.f32 1.442695, %v3229_v29  ;;  %v4472_v29 = vld [vmem:[%s5434_s5 + $0x10] sm:$0xff]  }
0x1f5b   :  { %4564 = vpow2.f32 %v3231_v30  ;;  %v4473_v30 = vld [vmem:[%s5434_s5 + $0x18] sm:$0xff]  }
0x1f65   :  { %v4565_v32 = vpop.eup %4564 }
0x1f66   :  { %v3235_v33 = vsel %vm34_vm1, %v4565_v32, 0.0 }
0x1f67   :  { %3236 = vadd.xlane.f32.xlu0 %v3235_v33 }
0x1f95   :  { %v3114_v36 = vpop.f32.mrb[88].mxu1 }
0x1f96   :  { %v3121_v54 = vadd.f32 %v3114_v36, %v5265_v46  ;;  %v4357_v41 = vpop.f32.mrb[89].mxu1 }
0x1f97   :  { %v3117_v44 = vpop.f32.mrb[90].mxu1 }
0x1f98   :  { %v3122_v45 = vadd.f32 %v3117_v44, %v5267_v50  ;;  %v4358_v49 = vpop.f32.mrb[91].mxu1 }
0x1f99   :  { %v3874_v49 = vld [vmem:[%s5437_s8 + $0x18] ss:$0 sm:$0xff] }
0x1f9d   :  { %v3217_v31 = vpop.f32.mrb[92].mxu1 }
0x1f9e   :  { %v4369_v53 = vpop.f32.mrb[93].mxu1  ;;  %v3226_v55 = vsel %vm34_vm1, %v3217_v31, -inf }
0x1f9f   :  { %3227 = vmax.xlane.f32.xlu1 %v3226_v55  ;;  %v3220_v57 = vpop.f32.mrb[94].mxu1 }
0x1fa0   :  { %v4370_v59 = vpop.f32.mrb[95].mxu1 }
0x1fa1   :  { %v3875_v59 = vld [vmem:[%s5437_s8 + $0x19] ss:$0 sm:$0xff] }
0x1fb0   :  { %3295 = vrot.lane.b32.xlu1 %v5156_v51, %s4612_s21 }
0x1ff4   :  { %v3237_v1 = vpop.xlane.xlu0 %3236 }
0x202c   :  { %v3228_v61 = vpop.xlane.xlu1 %3227 }
0x202d   :  { %v3230_v62 = vsub.f32 %v3217_v31, %v3228_v61 }
0x202f   :  { %v3233_v42 = vmul.f32 1.442695, %v3230_v62 }
0x2030   :  { %v3296_v27 = vpop.permute.xlu1 %3295 }
0x2031   :  { %4566 = vpow2.f32 %v3233_v42  ;;  %v3301_v46 = vsel %vm64_vm0, %v3296_v27, 0 }
0x2032   :  { %4378 = vmatpush3.bf16.msra.mxu1 %v3301_v46  ;;  %4568 = vrcp.f32 %v3237_v1  ;;  %v4474_v46 = vld [vmem:[%s5435_s6 + $0x20] sm:$0xff]   ;;  %v4477_v1 = vld [vmem:[%s5435_s6 + $0x38] sm:$0xff]  }
0x2033   :  { %4389 = vmatprep.subr.bf16.mxu1 %v4608_v2 }
0x203b   :  { %v4567_v50 = vpop.eup %4566 }
0x203c   :  { %v3238_v0 = vsel %vm34_vm1, %v4567_v50, 0.0  ;;  %v4569_v51 = vpop.eup %4568 }
0x203d   :  { %3239 = vadd.xlane.f32.xlu0 %v3238_v0  ;;  %v3243_v4 = vmul.f32 %v4569_v51, %v4565_v32  ;;  %v4476_v0 = vld [vmem:[%s5435_s6 + $0x30] sm:$0xff]   ;;  %v3880_v51 = vld [vmem:[%s5437_s8 + $0x1a] ss:$0 sm:$0xff] }
0x203f   :  { %v3245_v25 = vpack.c.bf16 %v3243_v4, %v3243_v4 }
0x2053   :  { %3247 = vrot.lane.b32.xlu0 %v5151_v35, %s4612_s21 }
0x20ca   :  { %v3240_v3 = vpop.xlane.xlu0 %3239 }
0x20cb   :  { %4570 = vrcp.f32 %v3240_v3 }
0x20ce   :  { %v3248_v5 = vpop.permute.xlu0 %3247 }
0x20cf   :  { %v3253_v20 = vsel %vm64_vm0, %v3248_v5, 0 }
0x20d0   :  { %4372 = vmatpush3.bf16.msra.mxu0 %v3253_v20 }
0x20d1   :  { %4383 = vmatprep.subr.bf16.mxu0 %v4608_v2 }
0x20d3   :  { %4374 = vmatmul.mubr.msk.bf16.vlgmr.msra.gmra.mrb[92].mxu0 %vm34_vm1, %v3245_v25 }
0x20d4   :  { %4385 = vmatprep.mubr.msk.bf16.mxu0 %vm4609_vm5, %v4608_v2  ;;  %4384 = vmatpush3.bf16.msra.mxu0 %v3348_v58 }
0x20d5   :  { %v4571_v39 = vpop.eup %4570  ;;  %4397 = vmatprep.subr.bf16.mxu0 %v4608_v2 }
0x20d6   :  { %v3244_v35 = vmul.f32 %v4571_v39, %v4567_v50  ;;  %v4475_v50 = vld [vmem:[%s5435_s6 + $0x28] sm:$0xff]  }
0x20d8   :  { %v3246_v6 = vpack.c.bf16 %v3244_v35, %v3244_v35 }
0x20da   :  { %4380 = vmatmul.mubr.msk.bf16.vlgmr.msra.gmra.mrb[96].mxu1 %vm34_vm1, %v3246_v6 }
0x20db   :  { %4393 = vmatprep.mubr.msk.bf16.mxu1 %vm4609_vm5, %v4608_v2  ;;  %4390 = vmatpush3.bf16.msra.mxu1 %v4472_v29 }
0x20dc   :  { %4391 = vmatprep.subr.bf16.mxu1 %v4608_v2 }
0x20df   :  { %4392 = vmatpush3.bf16.msra.mxu1 %v4473_v30 }
0x20e0   :  { %4409 = vmatprep.subr.bf16.mxu1 %v4608_v2 }
0x21a6   :  { %v3289_v60 = vpop.f32.mrb[92].mxu0 }
0x21a7   :  { %v4375_v63 = vpop.f32.mrb[93].mxu0 }
0x21a8   :  { %v3292_v37 = vpop.f32.mrb[94].mxu0 }
0x21a9   :  { %v4376_v7 = vpop.f32.mrb[95].mxu0 }
0x21ad   :  { %v3337_v8 = vpop.f32.mrb[96].mxu1 }
0x21ae   :  { %v3343_v52 = vpack.c.bf16 %v3337_v8, %v3289_v60  ;;  %v4381_v9 = vpop.f32.mrb[97].mxu1 }
0x21af   :  { %v3340_v10 = vpop.f32.mrb[98].mxu1 }
0x21b0   :  { %v4382_v11 = vpop.f32.mrb[99].mxu1  ;;  %4386 = vmatmul.mubr.msk.bf16.vlgmr.msra.gmra.mrb[96].mxu0 %vm34_vm1, %v3343_v52 }
0x21b1   :  { %4405 = vmatprep.mubr.msk.bf16.mxu0 %vm4609_vm5, %v4608_v2  ;;  %4398 = vmatpush3.bf16.msra.mxu0 %v4474_v46 }
0x21b2   :  { %4399 = vmatprep.subr.bf16.mxu0 %v4608_v2 }
0x21b5   :  { %4400 = vmatpush3.bf16.msra.mxu0 %v4475_v50 }
0x21b6   :  { %4401 = vmatprep.subr.bf16.mxu0 %v4608_v2 }
0x21b9   :  { %4402 = vmatpush3.bf16.msra.mxu0 %v4476_v0 }
0x21ba   :  { %4403 = vmatprep.subr.bf16.mxu0 %v4608_v2 }
0x21bd   :  { %4404 = vmatpush3.bf16.msra.mxu0 %v4477_v1 }
0x2283   :  { %v3384_v28 = vpop.f32.mrb[96].mxu0 }
0x2284   :  { %v3391_v34 = vadd.f32 %v3384_v28, %v3121_v54  ;;  %v4387_v47 = vpop.f32.mrb[97].mxu0 }
0x2285   :  { %v3387_v48 = vpop.f32.mrb[98].mxu0 }
0x2286   :  { %v5340_v12 = vadd.f32 %v3391_v34, %v5084_v38  ;;  %v3392_v13 = vadd.f32 %v3387_v48, %v3122_v45  ;;  %v4388_v14 = vpop.f32.mrb[99].mxu0 }
0x2288   :  { %v5343_v15 = vadd.f32 %v3392_v13, %v5087_v40  ;;  %v3395_v16 = vsel %vm301_vm3, %v5340_v12, 0.0 }
0x2289   :  { %3396 = vadd.xlane.f32.xlu1 %v3395_v16 }
0x228a   :  { %v3398_v43 = vsel %vm301_vm3, %v5343_v15, 0.0 }
0x228b   :  { %3399 = vadd.xlane.f32.xlu0 %v3398_v43  ;;  %v3897_v43 = vld [vmem:[%s5437_s8 + $0x1b] ss:$0 sm:$0xff] }
0x2316   :  { %v3397_v17 = vpop.xlane.xlu1 %3396 }
0x2317   :  { %v3401_v18 = vmul.f32 0.03125, %v3397_v17 }
0x2318   :  { %v3400_v19 = vpop.xlane.xlu0 %3399 }
0x2319   :  { %v3403_v21 = vsub.f32 %v5340_v12, %v3401_v18  ;;  %v3402_v38 = vmul.f32 0.03125, %v3400_v19 }
0x231b   :  { %v3404_v22 = vsub.f32 %v5343_v15, %v3402_v38  ;;  %v3405_v23 = vmul.f32 %v3403_v21, %v3403_v21 }
0x231d   :  { %v3407_v40 = vsel %vm301_vm3, %v3405_v23, 0.0  ;;  %v3406_v24 = vmul.f32 %v3404_v22, %v3404_v22 }
0x231e   :  { %3408 = vadd.xlane.f32.xlu0 %v3407_v40 }
0x231f   :  { %v3410_v26 = vsel %vm301_vm3, %v3406_v24, 0.0 }
0x2320   :  { %3411 = vadd.xlane.f32.xlu1 %v3410_v26 }
0x23ab   :  { %v3409_v32 = vpop.xlane.xlu0 %3408 }
0x23ac   :  { %v3413_v33 = vmul.f32 0.03125, %v3409_v32 }
0x23ad   :  { %v3412_v36 = vpop.xlane.xlu1 %3411 }
0x23ae   :  { %v3415_v54 = vadd.f32 1e-05, %v3413_v33  ;;  %v3414_v41 = vmul.f32 0.03125, %v3412_v36 }
0x23b0   :  { %4572 = vrsqrt.f32 %v3415_v54  ;;  %v3416_v44 = vadd.f32 1e-05, %v3414_v41 }
0x23b2   :  { %4574 = vrsqrt.f32 %v3416_v44  ;;  %v4478_v44 = vld [vmem:[%s5436_s7] sm:$0xff]  }
0x23ba   :  { %v4573_v45 = vpop.eup %4572 }
0x23bb   :  { %v3419_v31 = vmul.f32 %v4573_v45, %v3403_v21  ;;  %v4479_v45 = vld [vmem:[%s5436_s7 + $0x8] sm:$0xff]  }
0x23bc   :  { %v4575_v53 = vpop.eup %4574 }
0x23bd   :  { %v3425_v55 = vmul.f32 %v3874_v49, %v3419_v31  ;;  %v3420_v57 = vmul.f32 %v4575_v53, %v3404_v22 }
0x23bf   :  { %v3426_v61 = vmul.f32 %v3874_v49, %v3420_v57  ;;  %v3431_v62 = vadd.f32 %v3875_v59, %v3425_v55 }
0x23c1   :  { %v3432_v42 = vadd.f32 %v3875_v59, %v3426_v61 }
0x23c3   :  { %v3433_v27 = vpack.c.bf16 %v3432_v42, %v3431_v62  ;;  %v3898_v62 = vld [vmem:[%s5437_s8 + $0x1c] ss:$0 sm:$0xff] }
0x23c5   :  { %4394 = vmatmul.mubr.msk.bf16.vlgmr.msra.gmra.mrb[100].mxu1 %vm301_vm3, %v3433_v27 }
0x23c6   :  { %4413 = vmatprep.mubr.msk.bf16.mxu1 %vm4609_vm5, %v4608_v2  ;;  %4410 = vmatpush3.bf16.msra.mxu1 %v4478_v44 }
0x23c7   :  { %4411 = vmatprep.subr.bf16.mxu1 %v4608_v2  ;;  %v3899_v2 = vld [vmem:[%s5437_s8 + $0x1d] ss:$0 sm:$0xff] }
0x23ca   :  { %4412 = vmatpush3.bf16.msra.mxu1 %v4479_v45 }
0x2498   :  { %v3492_v3 = vpop.f32.mrb[100].mxu1 }
0x2499   :  { %v3493_v4 = vadd.f32 %v3880_v51, %v3492_v3  ;;  %v4395_v5 = vpop.f32.mrb[101].mxu1 }
0x249a   :  { %v3495_v20 = vpop.f32.mrb[102].mxu1 }
0x249b   :  { %v3501_v25 = vmul.f32 0.044715, %v3493_v4  ;;  %v3496_v39 = vadd.f32 %v3880_v51, %v3495_v20  ;;  %v4396_v35 = vpop.f32.mrb[103].mxu1  ;;  %v3499_v28 = vmul.f32 0.5, %v3493_v4 }
0x249d   :  { %v3503_v6 = vmul.f32 %v3501_v25, %v3493_v4  ;;  %v3502_v56 = vmul.f32 0.044715, %v3496_v39  ;;  %v3500_v34 = vmul.f32 0.5, %v3496_v39 }
0x249f   :  { %v3505_v58 = vmul.f32 %v3503_v6, %v3493_v4  ;;  %v3504_v60 = vmul.f32 %v3502_v56, %v3496_v39 }
0x24a1   :  { %v3507_v63 = vadd.f32 %v3505_v58, %v3493_v4  ;;  %v3506_v37 = vmul.f32 %v3504_v60, %v3496_v39 }
0x24a3   :  { %v3509_v7 = vmul.f32 0.7978846, %v3507_v63  ;;  %v3508_v8 = vadd.f32 %v3506_v37, %v3496_v39 }
0x24a5   :  { %4576 = vtanh.f32 %v3509_v7  ;;  %v3510_v52 = vmul.f32 0.7978846, %v3508_v8 }
0x24a7   :  { %4578 = vtanh.f32 %v3510_v52 }
0x24af   :  { %v4577_v9 = vpop.eup %4576 }
0x24b0   :  { %v3513_v10 = vadd.f32 1.0, %v4577_v9 }
0x24b1   :  { %v4579_v11 = vpop.eup %4578 }
0x24b2   :  { %v3514_v47 = vadd.f32 1.0, %v4579_v11  ;;  %v3515_v48 = vmul.f32 %v3513_v10, %v3499_v28  ;;  %v3900_v11 = vld [vmem:[%s5437_s8 + $0x1e] ss:$0 sm:$0xff] }
0x24b4   :  { %v3516_v13 = vmul.f32 %v3514_v47, %v3500_v34 }
0x24b6   :  { %v3526_v14 = vpack.c.bf16 %v3516_v13, %v3515_v48 }
0x24b8   :  { %4406 = vmatmul.mubr.msk.bf16.vlgmr.msra.gmra.mrb[100].mxu0 %vm2018_vm6, %v3526_v14 }
0x258b   :  { %v3588_v16 = vpop.f32.mrb[100].mxu0 }
0x258c   :  { %v3595_v17 = vadd.f32 %v3588_v16, %v5340_v12  ;;  %v4407_v18 = vpop.f32.mrb[101].mxu0 }
0x258d   :  { %v3591_v19 = vpop.f32.mrb[102].mxu0 }
0x258e   :  { %v3596_v21 = vadd.f32 %v3591_v19, %v5343_v15  ;;  %v4408_v38 = vpop.f32.mrb[103].mxu0  ;;  %v3601_v22 = vadd.f32 %v3897_v43, %v3595_v17 }
0x2590   :  { %v3605_v23 = vsel %vm301_vm3, %v3601_v22, 0.0  ;;  %v3602_v40 = vadd.f32 %v3897_v43, %v3596_v21 }
0x2591   :  { %3606 = vadd.xlane.f32.xlu0 %v3605_v23 }
0x2592   :  { %v3608_v24 = vsel %vm301_vm3, %v3602_v40, 0.0 }
0x2593   :  { %3609 = vadd.xlane.f32.xlu1 %v3608_v24 }
0x261e   :  { %v3607_v26 = vpop.xlane.xlu0 %3606 }
0x261f   :  { %v3611_v29 = vmul.f32 0.03125, %v3607_v26 }
0x2620   :  { %v3610_v30 = vpop.xlane.xlu1 %3609 }
0x2621   :  { %v3613_v32 = vsub.f32 %v3601_v22, %v3611_v29  ;;  %v3612_v33 = vmul.f32 0.03125, %v3610_v30 }
0x2623   :  { %v3614_v36 = vsub.f32 %v3602_v40, %v3612_v33  ;;  %v3615_v12 = vmul.f32 %v3613_v32, %v3613_v32 }
0x2625   :  { %v3617_v54 = vsel %vm301_vm3, %v3615_v12, 0.0  ;;  %v3616_v41 = vmul.f32 %v3614_v36, %v3614_v36 }
0x2626   :  { %3618 = vadd.xlane.f32.xlu0 %v3617_v54 }
0x2627   :  { %v3620_v15 = vsel %vm301_vm3, %v3616_v41, 0.0 }
0x2628   :  { %3621 = vadd.xlane.f32.xlu1 %v3620_v15 }
0x26b3   :  { %v3619_v49 = vpop.xlane.xlu0 %3618 }
0x26b4   :  { %v3623_v31 = vmul.f32 0.03125, %v3619_v49 }
0x26b5   :  { %v3622_v53 = vpop.xlane.xlu1 %3621 }
0x26b6   :  { %v3625_v55 = vadd.f32 1e-05, %v3623_v31  ;;  %v3624_v57 = vmul.f32 0.03125, %v3622_v53 }
0x26b8   :  { %4580 = vrsqrt.f32 %v3625_v55  ;;  %v3626_v59 = vadd.f32 1e-05, %v3624_v57 }
0x26ba   :  { %4582 = vrsqrt.f32 %v3626_v59 }
0x26c2   :  { %v4581_v61 = vpop.eup %4580 }
0x26c3   :  { %v3629_v42 = vmul.f32 %v4581_v61, %v3613_v32 }
0x26c4   :  { %v4583_v27 = vpop.eup %4582 }
0x26c5   :  { %v3635_v46 = vmul.f32 %v3898_v62, %v3629_v42  ;;  %v3630_v50 = vmul.f32 %v4583_v27, %v3614_v36 }
0x26c7   :  { %v3641_v0 = vadd.f32 %v3899_v2, %v3635_v46  ;;  %v3636_v1 = vmul.f32 %v3898_v62, %v3630_v50 }
0x26c9   :  { %v3643_v51 = vsel %vm301_vm3, %v3641_v0, 0.0  ;;  %v3642_v3 = vadd.f32 %v3899_v2, %v3636_v1 }
0x26ca   :  { %v3644_v4 = vrot.slane %v3643_v51, 4 }
0x26cb   :  { %v3652_v5 = vsel %vm301_vm3, %v3642_v3, 0.0 }
0x26cc   :  { %v3645_v20 = vadd.f32 %v3644_v4, %v3643_v51  ;;  %v3653_v25 = vrot.slane %v3652_v5, 4 }
0x26ce   :  { %v3646_v39 = vrot.slane %v3645_v20, 2  ;;  %v3654_v35 = vadd.f32 %v3653_v25, %v3652_v5 }
0x26d0   :  { %v3655_v6 = vrot.slane %v3654_v35, 2  ;;  %v3647_v56 = vadd.f32 %v3646_v39, %v3645_v20 }
0x26d2   :  { %v3648_v58 = vrot.slane %v3647_v56, 1  ;;  %v3656_v60 = vadd.f32 %v3655_v6, %v3654_v35 }
0x26d4   :  { %v3649_v63 = vadd.f32 %v3648_v58, %v3647_v56  ;;  %v3657_v37 = vrot.slane %v3656_v60, 1 }
0x26d6   :  { %v3658_v7 = vadd.f32 %v3657_v37, %v3656_v60  ;;  %v3651_v8 = vmul.f32 0.125, %v3649_v63 }
0x26d8   :  { %v3659_v52 = vmul.f32 0.125, %v3658_v7 }
0x26da   :  { %v3661_v9 = vsel %vm3660_vm7, %v3651_v8, %v3659_v52 }
0x26db   :  { %v3666_v10 = vpack.c.bf16 %v3661_v9, %v3661_v9 }
0x26dd   :  { %4414 = vmatmul.mubr.msk.bf16.vlgmr.msra.gmra.mrb[104].mxu1 %vm301_vm3, %v3666_v10 }
0x27b0   :  { %v3721_v28 = vpop.f32.mrb[104].mxu1 }
0x27b1   :  { %v3722_v34 = vadd.f32 %v3900_v11, %v3721_v28  ;;  %v4415_v47 = vpop.f32.mrb[105].mxu1 }
0x27b2   :  { %v3724_v48 = vpop.f32.mrb[106].mxu1 }
0x27b3   :  { %v4416_v13 = vpop.f32.mrb[107].mxu1  ;;  %3728 = vst.msk [vmem:[#allocation4] sm:$0x3] %vm3727_vm8, %v3722_v34 }
0x27b4   :  { %4595 = shalt.err (!%p4592_p4)
}
0x27b5   :  { %s4596_s8 = scalar_lea.hbm %s5438_s9, 32 }
0x27b6   :  { %p4597_p5 = scmp.ne.s32.totalorder %s5438_s9, %s4596_s8  ;;  %p4600_p6 = scmp.lt.u32.totalorder %s4596_s8, %s5438_s9 }
0x27b8   :  { %p4602_p7 = pnand %p4600_p6, %p4597_p5 }
0x27ba   :  { %4605 = shalt.err (!%p4602_p7)
}
0x27bb   :  { %3738 = dma.vmem_to_hbm [thread:$0]  %s3736_s29, 32, %s5438_s9, [#allocation5]  }
0x27bc   :  { %4606 = dma.done.wait [#allocation5], 32  }
0x27bd   :  { %4607 = vsyncadd [#allocation5], 4294967264 }
0x27be   :  { %3742 = vsyncpa [#allocation5], 1 }

</bundles_post_ra>
